<compile_context>
chip_gen: v5e
topology: v5e:2x2
jax: 0.10.0
libtpu: 0.0.40
codegen_flags: <defaults>
</compile_context>

<pallas_src>
import jax
import jax.numpy as jnp
from jax import lax
from jax.experimental import pallas as pl
from jax.experimental.pallas import tpu as pltpu


def gru_layernorm_kernel(gi_ref, lens_ref, whh_ref, bhn_ref, gamma_ref,
                         beta_ref, out_ref, hidden_ref):
    """GRU recurrence (input projection pre-computed) + LayerNorm on final h.

    gi_ref:    (T, B, 3H) f32   x @ W_ih^T + b_ih + [b_hr, b_hz, 0]  (r,z,n)
    lens_ref:  (B, 1)     int32 sequence lengths
    whh_ref:   (H, 3H)    bf16  hidden-to-hidden weights (gate order r, z, n)
    bhn_ref:   (1, H)     f32   b_hn (recurrent bias of the n gate)
    gamma/beta:(1, H)     f32   LayerNorm affine params
    out_ref:   (T, B, H)  f32   per-step hidden, zeroed at padded steps
    hidden_ref:(B, H)     f32   layernorm(final hidden)
    """
    T, B, _ = gi_ref.shape
    H = hidden_ref.shape[-1]

    lens = lens_ref[...]                                   # (B, 1) int32
    bhn = jnp.broadcast_to(bhn_ref[...], (B, H))           # hoisted broadcast

    # ---- Sequential recurrence; only h (one (8,128) f32 vreg) is carried ----
    # gi / whh come from VMEM refs each step, so vreg pressure stays low.
    h = jnp.zeros((B, H), jnp.float32)
    for t in range(T):                                     # static unroll (T small)
        gi = gi_ref[t]                                     # (B, 3H) f32, full vregs
        gh = jnp.dot(h.astype(jnp.bfloat16), whh_ref[...],
                     preferred_element_type=jnp.float32)   # (B, 3H) f32 accum
        r = jax.nn.sigmoid(gi[:, 0 * H:1 * H] + gh[:, 0 * H:1 * H])
        z = jax.nn.sigmoid(gi[:, 1 * H:2 * H] + gh[:, 1 * H:2 * H])
        n = jnp.tanh(gi[:, 2 * H:3 * H] + r * (gh[:, 2 * H:3 * H] + bhn))
        h_new = (1.0 - z) * n + z * h
        valid = lens > t                                   # (B, 1); reused below
        h = jnp.where(valid, h_new, h)
        out_ref[t] = jnp.where(valid, h_new, 0.0).astype(out_ref.dtype)

    # ---- LayerNorm over the hidden dim of the final hidden state (f32). ----
    mu = jnp.mean(h, axis=-1, keepdims=True)
    var = jnp.mean((h - mu) * (h - mu), axis=-1, keepdims=True)
    h_norm = (h - mu) * lax.rsqrt(var + 1e-5)
    hidden_ref[...] = (h_norm * gamma_ref[...] + beta_ref[...]).astype(hidden_ref.dtype)


def init_params(key, emb_dim, hidden_dim):
    """Deterministic init matching nn.GRU's U(-1/sqrt(H), 1/sqrt(H)) + default LayerNorm."""
    k = 1.0 / (hidden_dim ** 0.5)
    k0, k1, k2, k3 = jax.random.split(key, 4)
    return dict(
        w_ih=jax.random.uniform(k0, (3 * hidden_dim, emb_dim), jnp.float32, -k, k),
        w_hh=jax.random.uniform(k1, (3 * hidden_dim, hidden_dim), jnp.float32, -k, k),
        b_ih=jax.random.uniform(k2, (3 * hidden_dim,), jnp.float32, -k, k),
        b_hh=jax.random.uniform(k3, (3 * hidden_dim,), jnp.float32, -k, k),
        gamma=jnp.ones((hidden_dim,), jnp.float32),
        beta=jnp.zeros((hidden_dim,), jnp.float32),
    )


@jax.jit
def encoder_forward(inputs, seq_lens, params):
    """inputs: (B, T, E) batch-first; seq_lens: (B,). Returns (outputs, hidden).

    outputs: (B, T, H) with zeros beyond each sequence length.
    hidden:  (1, B, H) layernorm(final GRU hidden), matching nn.GRU's shape.
    """
    B, T, E = inputs.shape
    H = params["w_hh"].shape[1]

    bih, bhh = params["b_ih"], params["b_hh"]
    # Fold b_ih (all gates) + b_hh (r, z gates) into the input projection;
    # b_hn must stay inside r * (W_hn h + b_hn) and is passed separately.
    bias_i = bih + jnp.concatenate([bhh[:2 * H], jnp.zeros((H,), bhh.dtype)])

    # Input projection in XLA: the batch-first -> time-major transpose fuses
    # into this matmul; the kernel only gets the sequential recurrence.
    gi = jnp.einsum("bte,ge->tbg", inputs.astype(jnp.float32),
                    params["w_ih"]) + bias_i                      # (T, B, 3H)

    lens = seq_lens.astype(jnp.int32).reshape(B, 1)
    whh_t = jnp.transpose(params["w_hh"]).astype(jnp.bfloat16)    # (H, 3H) bf16 MXU operand
    bhn = bhh[2 * H:].reshape(1, H)
    gamma = params["gamma"].reshape(1, H)
    beta = params["beta"].reshape(1, H)

    out_tbh, hidden_bh = pl.pallas_call(
        gru_layernorm_kernel,
        out_shape=(jax.ShapeDtypeStruct((T, B, H), jnp.float32),
                   jax.ShapeDtypeStruct((B, H), jnp.float32)),
        in_specs=[pl.BlockSpec(memory_space=pltpu.MemorySpace.VMEM)] * 6,
        out_specs=(pl.BlockSpec(memory_space=pltpu.MemorySpace.VMEM),
                   pl.BlockSpec(memory_space=pltpu.MemorySpace.VMEM)),
    )(gi, lens, whh_t, bhn, gamma, beta)

    # Time-major stores in the kernel are full unmasked vregs; this 40 KiB
    # transpose back to batch-first is negligible and fuses under jit.
    outputs = jnp.transpose(out_tbh, (1, 0, 2))    # (B, T, H)
    hidden = hidden_bh[None]                       # (1, B, H)
    return outputs, hidden


def encoder_reference(inputs, seq_lens, params):
    """Pure-JAX reference (lax.scan) with the same PackedSequence semantics.

    The recurrent matmul uses bf16 operands with f32 accumulation, mirroring
    the kernel's MXU operand precision (all other math is f32); versus a
    strict-f32 recurrence the deviation is O(1e-2) after LayerNorm.
    """
    B, T, E = inputs.shape
    H = params["w_hh"].shape[1]
    wih, whh = params["w_ih"], params["w_hh"]
    bih, bhh = params["b_ih"], params["b_hh"]
    whh_t_bf16 = jnp.transpose(whh).astype(jnp.bfloat16)

    def cell(h, xm):
        x_t, m = xm
        gi = x_t @ wih.T + bih
        gh = jnp.dot(h.astype(jnp.bfloat16), whh_t_bf16,
                     preferred_element_type=jnp.float32) + bhh
        r = jax.nn.sigmoid(gi[:, :H] + gh[:, :H])
        z = jax.nn.sigmoid(gi[:, H:2 * H] + gh[:, H:2 * H])
        n = jnp.tanh(gi[:, 2 * H:] + r * gh[:, 2 * H:])
        h_new = (1.0 - z) * n + z * h
        m = m[:, None]
        return m * h_new + (1.0 - m) * h, m * h_new

    x_tbe = jnp.transpose(inputs, (1, 0, 2)).astype(jnp.float32)
    mask = (jnp.arange(T)[:, None] < seq_lens[None, :]).astype(jnp.float32)
    h_last, outs = lax.scan(cell, jnp.zeros((B, H), jnp.float32), (x_tbe, mask))
    mu = h_last.mean(-1, keepdims=True)
    var = ((h_last - mu) ** 2).mean(-1, keepdims=True)
    hn = (h_last - mu) / jnp.sqrt(var + 1e-5)
    hidden = hn * params["gamma"] + params["beta"]
    return jnp.transpose(outs, (1, 0, 2)), hidden[None]


if __name__ == "__main__":
    B, T, EMB_DIM, ENC_HIDDEN_DIM = 8, 10, 32, 128

    key = jax.random.PRNGKey(0)
    k_param, k_x, k_len = jax.random.split(key, 3)

    params = init_params(k_param, EMB_DIM, ENC_HIDDEN_DIM)
    inputs = jax.random.normal(k_x, (B, T, EMB_DIM), jnp.float32)
    seq_lens = jax.random.randint(k_len, (B,), 1, T + 1, jnp.int32)

    outputs, hidden = encoder_forward(inputs, seq_lens, params)
    outputs, hidden = jax.block_until_ready((outputs, hidden))

    outputs_ref, hidden_ref = encoder_reference(inputs, seq_lens, params)
    assert outputs.shape == (B, T, ENC_HIDDEN_DIM)
    assert hidden.shape == (1, B, ENC_HIDDEN_DIM)
    # Kernel and reference share bf16 MXU operand precision on the recurrent
    # matmul (f32 accumulation), so they agree to ~1e-5; keep a safety margin.
    assert jnp.allclose(outputs, outputs_ref, atol=5e-3, rtol=5e-3)
    assert jnp.allclose(hidden, hidden_ref, atol=5e-3, rtol=5e-3)

    print("KERNEL_OK")
</pallas_src>

<mosaic_0001>
module attributes {stable_mosaic.version = 11 : i64} {
  func.func @gru_layernorm_kernel(%arg0: memref<10x8x384xf32, #tpu.memory_space<vmem>>, %arg1: memref<8x1xi32, #tpu.memory_space<vmem>>, %arg2: memref<128x384xbf16, #tpu.memory_space<vmem>>, %arg3: memref<1x128xf32, #tpu.memory_space<vmem>>, %arg4: memref<1x128xf32, #tpu.memory_space<vmem>>, %arg5: memref<1x128xf32, #tpu.memory_space<vmem>>, %arg6: memref<10x8x128xf32, #tpu.memory_space<vmem>>, %arg7: memref<8x128xf32, #tpu.memory_space<vmem>>) attributes {dimension_semantics = [], scalar_prefetch = 0 : i64, scratch_operands = 0 : i64, tpu.core_type = #tpu.core_type<tc>} {
    %c0 = arith.constant 0 : index
    %c0_0 = arith.constant 0 : index
    %0 = vector.load %arg1[%c0, %c0_0] : memref<8x1xi32, #tpu.memory_space<vmem>>, vector<8x1xi32>
    %c0_1 = arith.constant 0 : index
    %c0_2 = arith.constant 0 : index
    %1 = vector.load %arg3[%c0_1, %c0_2] : memref<1x128xf32, #tpu.memory_space<vmem>>, vector<1x128xf32>
    %2 = vector.shape_cast %1 : vector<1x128xf32> to vector<1x128xf32>
    %3 = vector.broadcast %2 : vector<1x128xf32> to vector<8x128xf32>
    %cst = arith.constant 0.000000e+00 : f32
    %4 = vector.broadcast %cst : f32 to vector<8x128xf32>
    %c0_3 = arith.constant 0 : index
    %c0_4 = arith.constant 0 : index
    %c0_5 = arith.constant 0 : index
    %5 = vector.load %arg0[%c0_3, %c0_4, %c0_5] : memref<10x8x384xf32, #tpu.memory_space<vmem>>, vector<1x8x384xf32>
    %6 = vector.shape_cast %5 : vector<1x8x384xf32> to vector<8x384xf32>
    %7 = arith.truncf %4 : vector<8x128xf32> to vector<8x128xbf16>
    %c0_6 = arith.constant 0 : index
    %c0_7 = arith.constant 0 : index
    %8 = vector.load %arg2[%c0_6, %c0_7] : memref<128x384xbf16, #tpu.memory_space<vmem>>, vector<128x384xbf16>
    %cst_8 = arith.constant dense<0.000000e+00> : vector<8x384xf32>
    %9 = tpu.matmul %7, %8, %cst_8 {dimension_numbers = #tpu.dot_dimension_numbers<[1], [0], [0], [1], [0, 0, 1, 1], [], []>} : vector<8x128xbf16>, vector<128x384xbf16>, vector<8x384xf32> -> vector<8x384xf32>
    %10 = vector.extract_strided_slice %6 {offsets = [0, 0], sizes = [8, 128], strides = [1, 1]} : vector<8x384xf32> to vector<8x128xf32>
    %11 = vector.extract_strided_slice %9 {offsets = [0, 0], sizes = [8, 128], strides = [1, 1]} : vector<8x384xf32> to vector<8x128xf32>
    %12 = arith.addf %10, %11 : vector<8x128xf32>
    %13 = arith.negf %12 : vector<8x128xf32>
    %14 = math.exp %13 : vector<8x128xf32>
    %cst_9 = arith.constant 1.000000e+00 : f32
    %15 = vector.broadcast %cst_9 : f32 to vector<8x128xf32>
    %16 = arith.addf %15, %14 : vector<8x128xf32>
    %17 = arith.divf %15, %16 : vector<8x128xf32>
    %18 = vector.extract_strided_slice %6 {offsets = [0, 128], sizes = [8, 128], strides = [1, 1]} : vector<8x384xf32> to vector<8x128xf32>
    %19 = vector.extract_strided_slice %9 {offsets = [0, 128], sizes = [8, 128], strides = [1, 1]} : vector<8x384xf32> to vector<8x128xf32>
    %20 = arith.addf %18, %19 : vector<8x128xf32>
    %21 = arith.negf %20 : vector<8x128xf32>
    %22 = math.exp %21 : vector<8x128xf32>
    %cst_10 = arith.constant 1.000000e+00 : f32
    %23 = vector.broadcast %cst_10 : f32 to vector<8x128xf32>
    %24 = arith.addf %23, %22 : vector<8x128xf32>
    %25 = arith.divf %23, %24 : vector<8x128xf32>
    %26 = vector.extract_strided_slice %6 {offsets = [0, 256], sizes = [8, 128], strides = [1, 1]} : vector<8x384xf32> to vector<8x128xf32>
    %27 = vector.extract_strided_slice %9 {offsets = [0, 256], sizes = [8, 128], strides = [1, 1]} : vector<8x384xf32> to vector<8x128xf32>
    %28 = arith.addf %27, %3 : vector<8x128xf32>
    %29 = arith.mulf %17, %28 : vector<8x128xf32>
    %30 = arith.addf %26, %29 : vector<8x128xf32>
    %31 = math.tanh %30 : vector<8x128xf32>
    %cst_11 = arith.constant 1.000000e+00 : f32
    %32 = vector.broadcast %cst_11 : f32 to vector<8x128xf32>
    %33 = arith.subf %32, %25 : vector<8x128xf32>
    %34 = arith.mulf %33, %31 : vector<8x128xf32>
    %35 = arith.mulf %25, %4 : vector<8x128xf32>
    %36 = arith.addf %34, %35 : vector<8x128xf32>
    %c0_i32 = arith.constant 0 : i32
    %37 = vector.broadcast %c0_i32 : i32 to vector<8x1xi32>
    %38 = arith.cmpi sgt, %0, %37 : vector<8x1xi32>
    %39 = vector.shape_cast %38 : vector<8x1xi1> to vector<8x1xi1>
    %40 = vector.broadcast %39 : vector<8x1xi1> to vector<8x128xi1>
    %41 = arith.select %40, %36, %4 : vector<8x128xi1>, vector<8x128xf32>
    %cst_12 = arith.constant 0.000000e+00 : f32
    %42 = vector.shape_cast %38 : vector<8x1xi1> to vector<8x1xi1>
    %43 = vector.broadcast %42 : vector<8x1xi1> to vector<8x128xi1>
    %44 = vector.broadcast %cst_12 : f32 to vector<8x128xf32>
    %45 = arith.select %43, %36, %44 : vector<8x128xi1>, vector<8x128xf32>
    %c0_13 = arith.constant 0 : index
    %c0_14 = arith.constant 0 : index
    %c0_15 = arith.constant 0 : index
    %46 = vector.load %arg6[%c0_13, %c0_14, %c0_15] : memref<10x8x128xf32, #tpu.memory_space<vmem>>, vector<1x8x128xf32>
    %47 = vector.shape_cast %46 : vector<1x8x128xf32> to vector<8x128xf32>
    %48 = vector.shape_cast %45 : vector<8x128xf32> to vector<1x8x128xf32>
    tpu.vector_store %arg6[%c0_13, %c0_14, %c0_15], %48 {strides = array<i32>} : memref<10x8x128xf32, #tpu.memory_space<vmem>>, vector<1x8x128xf32>,
    %c1 = arith.constant 1 : index
    %c0_16 = arith.constant 0 : index
    %c0_17 = arith.constant 0 : index
    %49 = vector.load %arg0[%c1, %c0_16, %c0_17] : memref<10x8x384xf32, #tpu.memory_space<vmem>>, vector<1x8x384xf32>
    %50 = vector.shape_cast %49 : vector<1x8x384xf32> to vector<8x384xf32>
    %51 = arith.truncf %41 : vector<8x128xf32> to vector<8x128xbf16>
    %c0_18 = arith.constant 0 : index
    %c0_19 = arith.constant 0 : index
    %52 = vector.load %arg2[%c0_18, %c0_19] : memref<128x384xbf16, #tpu.memory_space<vmem>>, vector<128x384xbf16>
    %cst_20 = arith.constant dense<0.000000e+00> : vector<8x384xf32>
    %53 = tpu.matmul %51, %52, %cst_20 {dimension_numbers = #tpu.dot_dimension_numbers<[1], [0], [0], [1], [0, 0, 1, 1], [], []>} : vector<8x128xbf16>, vector<128x384xbf16>, vector<8x384xf32> -> vector<8x384xf32>
    %54 = vector.extract_strided_slice %50 {offsets = [0, 0], sizes = [8, 128], strides = [1, 1]} : vector<8x384xf32> to vector<8x128xf32>
    %55 = vector.extract_strided_slice %53 {offsets = [0, 0], sizes = [8, 128], strides = [1, 1]} : vector<8x384xf32> to vector<8x128xf32>
    %56 = arith.addf %54, %55 : vector<8x128xf32>
    %57 = arith.negf %56 : vector<8x128xf32>
    %58 = math.exp %57 : vector<8x128xf32>
    %cst_21 = arith.constant 1.000000e+00 : f32
    %59 = vector.broadcast %cst_21 : f32 to vector<8x128xf32>
    %60 = arith.addf %59, %58 : vector<8x128xf32>
    %61 = arith.divf %59, %60 : vector<8x128xf32>
    %62 = vector.extract_strided_slice %50 {offsets = [0, 128], sizes = [8, 128], strides = [1, 1]} : vector<8x384xf32> to vector<8x128xf32>
    %63 = vector.extract_strided_slice %53 {offsets = [0, 128], sizes = [8, 128], strides = [1, 1]} : vector<8x384xf32> to vector<8x128xf32>
    %64 = arith.addf %62, %63 : vector<8x128xf32>
    %65 = arith.negf %64 : vector<8x128xf32>
    %66 = math.exp %65 : vector<8x128xf32>
    %cst_22 = arith.constant 1.000000e+00 : f32
    %67 = vector.broadcast %cst_22 : f32 to vector<8x128xf32>
    %68 = arith.addf %67, %66 : vector<8x128xf32>
    %69 = arith.divf %67, %68 : vector<8x128xf32>
    %70 = vector.extract_strided_slice %50 {offsets = [0, 256], sizes = [8, 128], strides = [1, 1]} : vector<8x384xf32> to vector<8x128xf32>
    %71 = vector.extract_strided_slice %53 {offsets = [0, 256], sizes = [8, 128], strides = [1, 1]} : vector<8x384xf32> to vector<8x128xf32>
    %72 = arith.addf %71, %3 : vector<8x128xf32>
    %73 = arith.mulf %61, %72 : vector<8x128xf32>
    %74 = arith.addf %70, %73 : vector<8x128xf32>
    %75 = math.tanh %74 : vector<8x128xf32>
    %cst_23 = arith.constant 1.000000e+00 : f32
    %76 = vector.broadcast %cst_23 : f32 to vector<8x128xf32>
    %77 = arith.subf %76, %69 : vector<8x128xf32>
    %78 = arith.mulf %77, %75 : vector<8x128xf32>
    %79 = arith.mulf %69, %41 : vector<8x128xf32>
    %80 = arith.addf %78, %79 : vector<8x128xf32>
    %c1_i32 = arith.constant 1 : i32
    %81 = vector.broadcast %c1_i32 : i32 to vector<8x1xi32>
    %82 = arith.cmpi sgt, %0, %81 : vector<8x1xi32>
    %83 = vector.shape_cast %82 : vector<8x1xi1> to vector<8x1xi1>
    %84 = vector.broadcast %83 : vector<8x1xi1> to vector<8x128xi1>
    %85 = arith.select %84, %80, %41 : vector<8x128xi1>, vector<8x128xf32>
    %cst_24 = arith.constant 0.000000e+00 : f32
    %86 = vector.shape_cast %82 : vector<8x1xi1> to vector<8x1xi1>
    %87 = vector.broadcast %86 : vector<8x1xi1> to vector<8x128xi1>
    %88 = vector.broadcast %cst_24 : f32 to vector<8x128xf32>
    %89 = arith.select %87, %80, %88 : vector<8x128xi1>, vector<8x128xf32>
    %c1_25 = arith.constant 1 : index
    %c0_26 = arith.constant 0 : index
    %c0_27 = arith.constant 0 : index
    %90 = vector.load %arg6[%c1_25, %c0_26, %c0_27] : memref<10x8x128xf32, #tpu.memory_space<vmem>>, vector<1x8x128xf32>
    %91 = vector.shape_cast %90 : vector<1x8x128xf32> to vector<8x128xf32>
    %92 = vector.shape_cast %89 : vector<8x128xf32> to vector<1x8x128xf32>
    tpu.vector_store %arg6[%c1_25, %c0_26, %c0_27], %92 {strides = array<i32>} : memref<10x8x128xf32, #tpu.memory_space<vmem>>, vector<1x8x128xf32>,
    %c2 = arith.constant 2 : index
    %c0_28 = arith.constant 0 : index
    %c0_29 = arith.constant 0 : index
    %93 = vector.load %arg0[%c2, %c0_28, %c0_29] : memref<10x8x384xf32, #tpu.memory_space<vmem>>, vector<1x8x384xf32>
    %94 = vector.shape_cast %93 : vector<1x8x384xf32> to vector<8x384xf32>
    %95 = arith.truncf %85 : vector<8x128xf32> to vector<8x128xbf16>
    %c0_30 = arith.constant 0 : index
    %c0_31 = arith.constant 0 : index
    %96 = vector.load %arg2[%c0_30, %c0_31] : memref<128x384xbf16, #tpu.memory_space<vmem>>, vector<128x384xbf16>
    %cst_32 = arith.constant dense<0.000000e+00> : vector<8x384xf32>
    %97 = tpu.matmul %95, %96, %cst_32 {dimension_numbers = #tpu.dot_dimension_numbers<[1], [0], [0], [1], [0, 0, 1, 1], [], []>} : vector<8x128xbf16>, vector<128x384xbf16>, vector<8x384xf32> -> vector<8x384xf32>
    %98 = vector.extract_strided_slice %94 {offsets = [0, 0], sizes = [8, 128], strides = [1, 1]} : vector<8x384xf32> to vector<8x128xf32>
    %99 = vector.extract_strided_slice %97 {offsets = [0, 0], sizes = [8, 128], strides = [1, 1]} : vector<8x384xf32> to vector<8x128xf32>
    %100 = arith.addf %98, %99 : vector<8x128xf32>
    %101 = arith.negf %100 : vector<8x128xf32>
    %102 = math.exp %101 : vector<8x128xf32>
    %cst_33 = arith.constant 1.000000e+00 : f32
    %103 = vector.broadcast %cst_33 : f32 to vector<8x128xf32>
    %104 = arith.addf %103, %102 : vector<8x128xf32>
    %105 = arith.divf %103, %104 : vector<8x128xf32>
    %106 = vector.extract_strided_slice %94 {offsets = [0, 128], sizes = [8, 128], strides = [1, 1]} : vector<8x384xf32> to vector<8x128xf32>
    %107 = vector.extract_strided_slice %97 {offsets = [0, 128], sizes = [8, 128], strides = [1, 1]} : vector<8x384xf32> to vector<8x128xf32>
    %108 = arith.addf %106, %107 : vector<8x128xf32>
    %109 = arith.negf %108 : vector<8x128xf32>
    %110 = math.exp %109 : vector<8x128xf32>
    %cst_34 = arith.constant 1.000000e+00 : f32
    %111 = vector.broadcast %cst_34 : f32 to vector<8x128xf32>
    %112 = arith.addf %111, %110 : vector<8x128xf32>
    %113 = arith.divf %111, %112 : vector<8x128xf32>
    %114 = vector.extract_strided_slice %94 {offsets = [0, 256], sizes = [8, 128], strides = [1, 1]} : vector<8x384xf32> to vector<8x128xf32>
    %115 = vector.extract_strided_slice %97 {offsets = [0, 256], sizes = [8, 128], strides = [1, 1]} : vector<8x384xf32> to vector<8x128xf32>
    %116 = arith.addf %115, %3 : vector<8x128xf32>
    %117 = arith.mulf %105, %116 : vector<8x128xf32>
    %118 = arith.addf %114, %117 : vector<8x128xf32>
    %119 = math.tanh %118 : vector<8x128xf32>
    %cst_35 = arith.constant 1.000000e+00 : f32
    %120 = vector.broadcast %cst_35 : f32 to vector<8x128xf32>
    %121 = arith.subf %120, %113 : vector<8x128xf32>
    %122 = arith.mulf %121, %119 : vector<8x128xf32>
    %123 = arith.mulf %113, %85 : vector<8x128xf32>
    %124 = arith.addf %122, %123 : vector<8x128xf32>
    %c2_i32 = arith.constant 2 : i32
    %125 = vector.broadcast %c2_i32 : i32 to vector<8x1xi32>
    %126 = arith.cmpi sgt, %0, %125 : vector<8x1xi32>
    %127 = vector.shape_cast %126 : vector<8x1xi1> to vector<8x1xi1>
    %128 = vector.broadcast %127 : vector<8x1xi1> to vector<8x128xi1>
    %129 = arith.select %128, %124, %85 : vector<8x128xi1>, vector<8x128xf32>
    %cst_36 = arith.constant 0.000000e+00 : f32
    %130 = vector.shape_cast %126 : vector<8x1xi1> to vector<8x1xi1>
    %131 = vector.broadcast %130 : vector<8x1xi1> to vector<8x128xi1>
    %132 = vector.broadcast %cst_36 : f32 to vector<8x128xf32>
    %133 = arith.select %131, %124, %132 : vector<8x128xi1>, vector<8x128xf32>
    %c2_37 = arith.constant 2 : index
    %c0_38 = arith.constant 0 : index
    %c0_39 = arith.constant 0 : index
    %134 = vector.load %arg6[%c2_37, %c0_38, %c0_39] : memref<10x8x128xf32, #tpu.memory_space<vmem>>, vector<1x8x128xf32>
    %135 = vector.shape_cast %134 : vector<1x8x128xf32> to vector<8x128xf32>
    %136 = vector.shape_cast %133 : vector<8x128xf32> to vector<1x8x128xf32>
    tpu.vector_store %arg6[%c2_37, %c0_38, %c0_39], %136 {strides = array<i32>} : memref<10x8x128xf32, #tpu.memory_space<vmem>>, vector<1x8x128xf32>,
    %c3 = arith.constant 3 : index
    %c0_40 = arith.constant 0 : index
    %c0_41 = arith.constant 0 : index
    %137 = vector.load %arg0[%c3, %c0_40, %c0_41] : memref<10x8x384xf32, #tpu.memory_space<vmem>>, vector<1x8x384xf32>
    %138 = vector.shape_cast %137 : vector<1x8x384xf32> to vector<8x384xf32>
    %139 = arith.truncf %129 : vector<8x128xf32> to vector<8x128xbf16>
    %c0_42 = arith.constant 0 : index
    %c0_43 = arith.constant 0 : index
    %140 = vector.load %arg2[%c0_42, %c0_43] : memref<128x384xbf16, #tpu.memory_space<vmem>>, vector<128x384xbf16>
    %cst_44 = arith.constant dense<0.000000e+00> : vector<8x384xf32>
    %141 = tpu.matmul %139, %140, %cst_44 {dimension_numbers = #tpu.dot_dimension_numbers<[1], [0], [0], [1], [0, 0, 1, 1], [], []>} : vector<8x128xbf16>, vector<128x384xbf16>, vector<8x384xf32> -> vector<8x384xf32>
    %142 = vector.extract_strided_slice %138 {offsets = [0, 0], sizes = [8, 128], strides = [1, 1]} : vector<8x384xf32> to vector<8x128xf32>
    %143 = vector.extract_strided_slice %141 {offsets = [0, 0], sizes = [8, 128], strides = [1, 1]} : vector<8x384xf32> to vector<8x128xf32>
    %144 = arith.addf %142, %143 : vector<8x128xf32>
    %145 = arith.negf %144 : vector<8x128xf32>
    %146 = math.exp %145 : vector<8x128xf32>
    %cst_45 = arith.constant 1.000000e+00 : f32
    %147 = vector.broadcast %cst_45 : f32 to vector<8x128xf32>
    %148 = arith.addf %147, %146 : vector<8x128xf32>
    %149 = arith.divf %147, %148 : vector<8x128xf32>
    %150 = vector.extract_strided_slice %138 {offsets = [0, 128], sizes = [8, 128], strides = [1, 1]} : vector<8x384xf32> to vector<8x128xf32>
    %151 = vector.extract_strided_slice %141 {offsets = [0, 128], sizes = [8, 128], strides = [1, 1]} : vector<8x384xf32> to vector<8x128xf32>
    %152 = arith.addf %150, %151 : vector<8x128xf32>
    %153 = arith.negf %152 : vector<8x128xf32>
    %154 = math.exp %153 : vector<8x128xf32>
    %cst_46 = arith.constant 1.000000e+00 : f32
    %155 = vector.broadcast %cst_46 : f32 to vector<8x128xf32>
    %156 = arith.addf %155, %154 : vector<8x128xf32>
    %157 = arith.divf %155, %156 : vector<8x128xf32>
    %158 = vector.extract_strided_slice %138 {offsets = [0, 256], sizes = [8, 128], strides = [1, 1]} : vector<8x384xf32> to vector<8x128xf32>
    %159 = vector.extract_strided_slice %141 {offsets = [0, 256], sizes = [8, 128], strides = [1, 1]} : vector<8x384xf32> to vector<8x128xf32>
    %160 = arith.addf %159, %3 : vector<8x128xf32>
    %161 = arith.mulf %149, %160 : vector<8x128xf32>
    %162 = arith.addf %158, %161 : vector<8x128xf32>
    %163 = math.tanh %162 : vector<8x128xf32>
    %cst_47 = arith.constant 1.000000e+00 : f32
    %164 = vector.broadcast %cst_47 : f32 to vector<8x128xf32>
    %165 = arith.subf %164, %157 : vector<8x128xf32>
    %166 = arith.mulf %165, %163 : vector<8x128xf32>
    %167 = arith.mulf %157, %129 : vector<8x128xf32>
    %168 = arith.addf %166, %167 : vector<8x128xf32>
    %c3_i32 = arith.constant 3 : i32
    %169 = vector.broadcast %c3_i32 : i32 to vector<8x1xi32>
    %170 = arith.cmpi sgt, %0, %169 : vector<8x1xi32>
    %171 = vector.shape_cast %170 : vector<8x1xi1> to vector<8x1xi1>
    %172 = vector.broadcast %171 : vector<8x1xi1> to vector<8x128xi1>
    %173 = arith.select %172, %168, %129 : vector<8x128xi1>, vector<8x128xf32>
    %cst_48 = arith.constant 0.000000e+00 : f32
    %174 = vector.shape_cast %170 : vector<8x1xi1> to vector<8x1xi1>
    %175 = vector.broadcast %174 : vector<8x1xi1> to vector<8x128xi1>
    %176 = vector.broadcast %cst_48 : f32 to vector<8x128xf32>
    %177 = arith.select %175, %168, %176 : vector<8x128xi1>, vector<8x128xf32>
    %c3_49 = arith.constant 3 : index
    %c0_50 = arith.constant 0 : index
    %c0_51 = arith.constant 0 : index
    %178 = vector.load %arg6[%c3_49, %c0_50, %c0_51] : memref<10x8x128xf32, #tpu.memory_space<vmem>>, vector<1x8x128xf32>
    %179 = vector.shape_cast %178 : vector<1x8x128xf32> to vector<8x128xf32>
    %180 = vector.shape_cast %177 : vector<8x128xf32> to vector<1x8x128xf32>
    tpu.vector_store %arg6[%c3_49, %c0_50, %c0_51], %180 {strides = array<i32>} : memref<10x8x128xf32, #tpu.memory_space<vmem>>, vector<1x8x128xf32>,
    %c4 = arith.constant 4 : index
    %c0_52 = arith.constant 0 : index
    %c0_53 = arith.constant 0 : index
    %181 = vector.load %arg0[%c4, %c0_52, %c0_53] : memref<10x8x384xf32, #tpu.memory_space<vmem>>, vector<1x8x384xf32>
    %182 = vector.shape_cast %181 : vector<1x8x384xf32> to vector<8x384xf32>
    %183 = arith.truncf %173 : vector<8x128xf32> to vector<8x128xbf16>
    %c0_54 = arith.constant 0 : index
    %c0_55 = arith.constant 0 : index
    %184 = vector.load %arg2[%c0_54, %c0_55] : memref<128x384xbf16, #tpu.memory_space<vmem>>, vector<128x384xbf16>
    %cst_56 = arith.constant dense<0.000000e+00> : vector<8x384xf32>
    %185 = tpu.matmul %183, %184, %cst_56 {dimension_numbers = #tpu.dot_dimension_numbers<[1], [0], [0], [1], [0, 0, 1, 1], [], []>} : vector<8x128xbf16>, vector<128x384xbf16>, vector<8x384xf32> -> vector<8x384xf32>
    %186 = vector.extract_strided_slice %182 {offsets = [0, 0], sizes = [8, 128], strides = [1, 1]} : vector<8x384xf32> to vector<8x128xf32>
    %187 = vector.extract_strided_slice %185 {offsets = [0, 0], sizes = [8, 128], strides = [1, 1]} : vector<8x384xf32> to vector<8x128xf32>
    %188 = arith.addf %186, %187 : vector<8x128xf32>
    %189 = arith.negf %188 : vector<8x128xf32>
    %190 = math.exp %189 : vector<8x128xf32>
    %cst_57 = arith.constant 1.000000e+00 : f32
    %191 = vector.broadcast %cst_57 : f32 to vector<8x128xf32>
    %192 = arith.addf %191, %190 : vector<8x128xf32>
    %193 = arith.divf %191, %192 : vector<8x128xf32>
    %194 = vector.extract_strided_slice %182 {offsets = [0, 128], sizes = [8, 128], strides = [1, 1]} : vector<8x384xf32> to vector<8x128xf32>
    %195 = vector.extract_strided_slice %185 {offsets = [0, 128], sizes = [8, 128], strides = [1, 1]} : vector<8x384xf32> to vector<8x128xf32>
    %196 = arith.addf %194, %195 : vector<8x128xf32>
    %197 = arith.negf %196 : vector<8x128xf32>
    %198 = math.exp %197 : vector<8x128xf32>
    %cst_58 = arith.constant 1.000000e+00 : f32
    %199 = vector.broadcast %cst_58 : f32 to vector<8x128xf32>
    %200 = arith.addf %199, %198 : vector<8x128xf32>
    %201 = arith.divf %199, %200 : vector<8x128xf32>
    %202 = vector.extract_strided_slice %182 {offsets = [0, 256], sizes = [8, 128], strides = [1, 1]} : vector<8x384xf32> to vector<8x128xf32>
    %203 = vector.extract_strided_slice %185 {offsets = [0, 256], sizes = [8, 128], strides = [1, 1]} : vector<8x384xf32> to vector<8x128xf32>
    %204 = arith.addf %203, %3 : vector<8x128xf32>
    %205 = arith.mulf %193, %204 : vector<8x128xf32>
    %206 = arith.addf %202, %205 : vector<8x128xf32>
    %207 = math.tanh %206 : vector<8x128xf32>
    %cst_59 = arith.constant 1.000000e+00 : f32
    %208 = vector.broadcast %cst_59 : f32 to vector<8x128xf32>
    %209 = arith.subf %208, %201 : vector<8x128xf32>
    %210 = arith.mulf %209, %207 : vector<8x128xf32>
    %211 = arith.mulf %201, %173 : vector<8x128xf32>
    %212 = arith.addf %210, %211 : vector<8x128xf32>
    %c4_i32 = arith.constant 4 : i32
    %213 = vector.broadcast %c4_i32 : i32 to vector<8x1xi32>
    %214 = arith.cmpi sgt, %0, %213 : vector<8x1xi32>
    %215 = vector.shape_cast %214 : vector<8x1xi1> to vector<8x1xi1>
    %216 = vector.broadcast %215 : vector<8x1xi1> to vector<8x128xi1>
    %217 = arith.select %216, %212, %173 : vector<8x128xi1>, vector<8x128xf32>
    %cst_60 = arith.constant 0.000000e+00 : f32
    %218 = vector.shape_cast %214 : vector<8x1xi1> to vector<8x1xi1>
    %219 = vector.broadcast %218 : vector<8x1xi1> to vector<8x128xi1>
    %220 = vector.broadcast %cst_60 : f32 to vector<8x128xf32>
    %221 = arith.select %219, %212, %220 : vector<8x128xi1>, vector<8x128xf32>
    %c4_61 = arith.constant 4 : index
    %c0_62 = arith.constant 0 : index
    %c0_63 = arith.constant 0 : index
    %222 = vector.load %arg6[%c4_61, %c0_62, %c0_63] : memref<10x8x128xf32, #tpu.memory_space<vmem>>, vector<1x8x128xf32>
    %223 = vector.shape_cast %222 : vector<1x8x128xf32> to vector<8x128xf32>
    %224 = vector.shape_cast %221 : vector<8x128xf32> to vector<1x8x128xf32>
    tpu.vector_store %arg6[%c4_61, %c0_62, %c0_63], %224 {strides = array<i32>} : memref<10x8x128xf32, #tpu.memory_space<vmem>>, vector<1x8x128xf32>,
    %c5 = arith.constant 5 : index
    %c0_64 = arith.constant 0 : index
    %c0_65 = arith.constant 0 : index
    %225 = vector.load %arg0[%c5, %c0_64, %c0_65] : memref<10x8x384xf32, #tpu.memory_space<vmem>>, vector<1x8x384xf32>
    %226 = vector.shape_cast %225 : vector<1x8x384xf32> to vector<8x384xf32>
    %227 = arith.truncf %217 : vector<8x128xf32> to vector<8x128xbf16>
    %c0_66 = arith.constant 0 : index
    %c0_67 = arith.constant 0 : index
    %228 = vector.load %arg2[%c0_66, %c0_67] : memref<128x384xbf16, #tpu.memory_space<vmem>>, vector<128x384xbf16>
    %cst_68 = arith.constant dense<0.000000e+00> : vector<8x384xf32>
    %229 = tpu.matmul %227, %228, %cst_68 {dimension_numbers = #tpu.dot_dimension_numbers<[1], [0], [0], [1], [0, 0, 1, 1], [], []>} : vector<8x128xbf16>, vector<128x384xbf16>, vector<8x384xf32> -> vector<8x384xf32>
    %230 = vector.extract_strided_slice %226 {offsets = [0, 0], sizes = [8, 128], strides = [1, 1]} : vector<8x384xf32> to vector<8x128xf32>
    %231 = vector.extract_strided_slice %229 {offsets = [0, 0], sizes = [8, 128], strides = [1, 1]} : vector<8x384xf32> to vector<8x128xf32>
    %232 = arith.addf %230, %231 : vector<8x128xf32>
    %233 = arith.negf %232 : vector<8x128xf32>
    %234 = math.exp %233 : vector<8x128xf32>
    %cst_69 = arith.constant 1.000000e+00 : f32
    %235 = vector.broadcast %cst_69 : f32 to vector<8x128xf32>
    %236 = arith.addf %235, %234 : vector<8x128xf32>
    %237 = arith.divf %235, %236 : vector<8x128xf32>
    %238 = vector.extract_strided_slice %226 {offsets = [0, 128], sizes = [8, 128], strides = [1, 1]} : vector<8x384xf32> to vector<8x128xf32>
    %239 = vector.extract_strided_slice %229 {offsets = [0, 128], sizes = [8, 128], strides = [1, 1]} : vector<8x384xf32> to vector<8x128xf32>
    %240 = arith.addf %238, %239 : vector<8x128xf32>
    %241 = arith.negf %240 : vector<8x128xf32>
    %242 = math.exp %241 : vector<8x128xf32>
    %cst_70 = arith.constant 1.000000e+00 : f32
    %243 = vector.broadcast %cst_70 : f32 to vector<8x128xf32>
    %244 = arith.addf %243, %242 : vector<8x128xf32>
    %245 = arith.divf %243, %244 : vector<8x128xf32>
    %246 = vector.extract_strided_slice %226 {offsets = [0, 256], sizes = [8, 128], strides = [1, 1]} : vector<8x384xf32> to vector<8x128xf32>
    %247 = vector.extract_strided_slice %229 {offsets = [0, 256], sizes = [8, 128], strides = [1, 1]} : vector<8x384xf32> to vector<8x128xf32>
    %248 = arith.addf %247, %3 : vector<8x128xf32>
    %249 = arith.mulf %237, %248 : vector<8x128xf32>
    %250 = arith.addf %246, %249 : vector<8x128xf32>
    %251 = math.tanh %250 : vector<8x128xf32>
    %cst_71 = arith.constant 1.000000e+00 : f32
    %252 = vector.broadcast %cst_71 : f32 to vector<8x128xf32>
    %253 = arith.subf %252, %245 : vector<8x128xf32>
    %254 = arith.mulf %253, %251 : vector<8x128xf32>
    %255 = arith.mulf %245, %217 : vector<8x128xf32>
    %256 = arith.addf %254, %255 : vector<8x128xf32>
    %c5_i32 = arith.constant 5 : i32
    %257 = vector.broadcast %c5_i32 : i32 to vector<8x1xi32>
    %258 = arith.cmpi sgt, %0, %257 : vector<8x1xi32>
    %259 = vector.shape_cast %258 : vector<8x1xi1> to vector<8x1xi1>
    %260 = vector.broadcast %259 : vector<8x1xi1> to vector<8x128xi1>
    %261 = arith.select %260, %256, %217 : vector<8x128xi1>, vector<8x128xf32>
    %cst_72 = arith.constant 0.000000e+00 : f32
    %262 = vector.shape_cast %258 : vector<8x1xi1> to vector<8x1xi1>
    %263 = vector.broadcast %262 : vector<8x1xi1> to vector<8x128xi1>
    %264 = vector.broadcast %cst_72 : f32 to vector<8x128xf32>
    %265 = arith.select %263, %256, %264 : vector<8x128xi1>, vector<8x128xf32>
    %c5_73 = arith.constant 5 : index
    %c0_74 = arith.constant 0 : index
    %c0_75 = arith.constant 0 : index
    %266 = vector.load %arg6[%c5_73, %c0_74, %c0_75] : memref<10x8x128xf32, #tpu.memory_space<vmem>>, vector<1x8x128xf32>
    %267 = vector.shape_cast %266 : vector<1x8x128xf32> to vector<8x128xf32>
    %268 = vector.shape_cast %265 : vector<8x128xf32> to vector<1x8x128xf32>
    tpu.vector_store %arg6[%c5_73, %c0_74, %c0_75], %268 {strides = array<i32>} : memref<10x8x128xf32, #tpu.memory_space<vmem>>, vector<1x8x128xf32>,
    %c6 = arith.constant 6 : index
    %c0_76 = arith.constant 0 : index
    %c0_77 = arith.constant 0 : index
    %269 = vector.load %arg0[%c6, %c0_76, %c0_77] : memref<10x8x384xf32, #tpu.memory_space<vmem>>, vector<1x8x384xf32>
    %270 = vector.shape_cast %269 : vector<1x8x384xf32> to vector<8x384xf32>
    %271 = arith.truncf %261 : vector<8x128xf32> to vector<8x128xbf16>
    %c0_78 = arith.constant 0 : index
    %c0_79 = arith.constant 0 : index
    %272 = vector.load %arg2[%c0_78, %c0_79] : memref<128x384xbf16, #tpu.memory_space<vmem>>, vector<128x384xbf16>
    %cst_80 = arith.constant dense<0.000000e+00> : vector<8x384xf32>
    %273 = tpu.matmul %271, %272, %cst_80 {dimension_numbers = #tpu.dot_dimension_numbers<[1], [0], [0], [1], [0, 0, 1, 1], [], []>} : vector<8x128xbf16>, vector<128x384xbf16>, vector<8x384xf32> -> vector<8x384xf32>
    %274 = vector.extract_strided_slice %270 {offsets = [0, 0], sizes = [8, 128], strides = [1, 1]} : vector<8x384xf32> to vector<8x128xf32>
    %275 = vector.extract_strided_slice %273 {offsets = [0, 0], sizes = [8, 128], strides = [1, 1]} : vector<8x384xf32> to vector<8x128xf32>
    %276 = arith.addf %274, %275 : vector<8x128xf32>
    %277 = arith.negf %276 : vector<8x128xf32>
    %278 = math.exp %277 : vector<8x128xf32>
    %cst_81 = arith.constant 1.000000e+00 : f32
    %279 = vector.broadcast %cst_81 : f32 to vector<8x128xf32>
    %280 = arith.addf %279, %278 : vector<8x128xf32>
    %281 = arith.divf %279, %280 : vector<8x128xf32>
    %282 = vector.extract_strided_slice %270 {offsets = [0, 128], sizes = [8, 128], strides = [1, 1]} : vector<8x384xf32> to vector<8x128xf32>
    %283 = vector.extract_strided_slice %273 {offsets = [0, 128], sizes = [8, 128], strides = [1, 1]} : vector<8x384xf32> to vector<8x128xf32>
    %284 = arith.addf %282, %283 : vector<8x128xf32>
    %285 = arith.negf %284 : vector<8x128xf32>
    %286 = math.exp %285 : vector<8x128xf32>
    %cst_82 = arith.constant 1.000000e+00 : f32
    %287 = vector.broadcast %cst_82 : f32 to vector<8x128xf32>
    %288 = arith.addf %287, %286 : vector<8x128xf32>
    %289 = arith.divf %287, %288 : vector<8x128xf32>
    %290 = vector.extract_strided_slice %270 {offsets = [0, 256], sizes = [8, 128], strides = [1, 1]} : vector<8x384xf32> to vector<8x128xf32>
    %291 = vector.extract_strided_slice %273 {offsets = [0, 256], sizes = [8, 128], strides = [1, 1]} : vector<8x384xf32> to vector<8x128xf32>
    %292 = arith.addf %291, %3 : vector<8x128xf32>
    %293 = arith.mulf %281, %292 : vector<8x128xf32>
    %294 = arith.addf %290, %293 : vector<8x128xf32>
    %295 = math.tanh %294 : vector<8x128xf32>
    %cst_83 = arith.constant 1.000000e+00 : f32
    %296 = vector.broadcast %cst_83 : f32 to vector<8x128xf32>
    %297 = arith.subf %296, %289 : vector<8x128xf32>
    %298 = arith.mulf %297, %295 : vector<8x128xf32>
    %299 = arith.mulf %289, %261 : vector<8x128xf32>
    %300 = arith.addf %298, %299 : vector<8x128xf32>
    %c6_i32 = arith.constant 6 : i32
    %301 = vector.broadcast %c6_i32 : i32 to vector<8x1xi32>
    %302 = arith.cmpi sgt, %0, %301 : vector<8x1xi32>
    %303 = vector.shape_cast %302 : vector<8x1xi1> to vector<8x1xi1>
    %304 = vector.broadcast %303 : vector<8x1xi1> to vector<8x128xi1>
    %305 = arith.select %304, %300, %261 : vector<8x128xi1>, vector<8x128xf32>
    %cst_84 = arith.constant 0.000000e+00 : f32
    %306 = vector.shape_cast %302 : vector<8x1xi1> to vector<8x1xi1>
    %307 = vector.broadcast %306 : vector<8x1xi1> to vector<8x128xi1>
    %308 = vector.broadcast %cst_84 : f32 to vector<8x128xf32>
    %309 = arith.select %307, %300, %308 : vector<8x128xi1>, vector<8x128xf32>
    %c6_85 = arith.constant 6 : index
    %c0_86 = arith.constant 0 : index
    %c0_87 = arith.constant 0 : index
    %310 = vector.load %arg6[%c6_85, %c0_86, %c0_87] : memref<10x8x128xf32, #tpu.memory_space<vmem>>, vector<1x8x128xf32>
    %311 = vector.shape_cast %310 : vector<1x8x128xf32> to vector<8x128xf32>
    %312 = vector.shape_cast %309 : vector<8x128xf32> to vector<1x8x128xf32>
    tpu.vector_store %arg6[%c6_85, %c0_86, %c0_87], %312 {strides = array<i32>} : memref<10x8x128xf32, #tpu.memory_space<vmem>>, vector<1x8x128xf32>,
    %c7 = arith.constant 7 : index
    %c0_88 = arith.constant 0 : index
    %c0_89 = arith.constant 0 : index
    %313 = vector.load %arg0[%c7, %c0_88, %c0_89] : memref<10x8x384xf32, #tpu.memory_space<vmem>>, vector<1x8x384xf32>
    %314 = vector.shape_cast %313 : vector<1x8x384xf32> to vector<8x384xf32>
    %315 = arith.truncf %305 : vector<8x128xf32> to vector<8x128xbf16>
    %c0_90 = arith.constant 0 : index
    %c0_91 = arith.constant 0 : index
    %316 = vector.load %arg2[%c0_90, %c0_91] : memref<128x384xbf16, #tpu.memory_space<vmem>>, vector<128x384xbf16>
    %cst_92 = arith.constant dense<0.000000e+00> : vector<8x384xf32>
    %317 = tpu.matmul %315, %316, %cst_92 {dimension_numbers = #tpu.dot_dimension_numbers<[1], [0], [0], [1], [0, 0, 1, 1], [], []>} : vector<8x128xbf16>, vector<128x384xbf16>, vector<8x384xf32> -> vector<8x384xf32>
    %318 = vector.extract_strided_slice %314 {offsets = [0, 0], sizes = [8, 128], strides = [1, 1]} : vector<8x384xf32> to vector<8x128xf32>
    %319 = vector.extract_strided_slice %317 {offsets = [0, 0], sizes = [8, 128], strides = [1, 1]} : vector<8x384xf32> to vector<8x128xf32>
    %320 = arith.addf %318, %319 : vector<8x128xf32>
    %321 = arith.negf %320 : vector<8x128xf32>
    %322 = math.exp %321 : vector<8x128xf32>
    %cst_93 = arith.constant 1.000000e+00 : f32
    %323 = vector.broadcast %cst_93 : f32 to vector<8x128xf32>
    %324 = arith.addf %323, %322 : vector<8x128xf32>
    %325 = arith.divf %323, %324 : vector<8x128xf32>
    %326 = vector.extract_strided_slice %314 {offsets = [0, 128], sizes = [8, 128], strides = [1, 1]} : vector<8x384xf32> to vector<8x128xf32>
    %327 = vector.extract_strided_slice %317 {offsets = [0, 128], sizes = [8, 128], strides = [1, 1]} : vector<8x384xf32> to vector<8x128xf32>
    %328 = arith.addf %326, %327 : vector<8x128xf32>
    %329 = arith.negf %328 : vector<8x128xf32>
    %330 = math.exp %329 : vector<8x128xf32>
    %cst_94 = arith.constant 1.000000e+00 : f32
    %331 = vector.broadcast %cst_94 : f32 to vector<8x128xf32>
    %332 = arith.addf %331, %330 : vector<8x128xf32>
    %333 = arith.divf %331, %332 : vector<8x128xf32>
    %334 = vector.extract_strided_slice %314 {offsets = [0, 256], sizes = [8, 128], strides = [1, 1]} : vector<8x384xf32> to vector<8x128xf32>
    %335 = vector.extract_strided_slice %317 {offsets = [0, 256], sizes = [8, 128], strides = [1, 1]} : vector<8x384xf32> to vector<8x128xf32>
    %336 = arith.addf %335, %3 : vector<8x128xf32>
    %337 = arith.mulf %325, %336 : vector<8x128xf32>
    %338 = arith.addf %334, %337 : vector<8x128xf32>
    %339 = math.tanh %338 : vector<8x128xf32>
    %cst_95 = arith.constant 1.000000e+00 : f32
    %340 = vector.broadcast %cst_95 : f32 to vector<8x128xf32>
    %341 = arith.subf %340, %333 : vector<8x128xf32>
    %342 = arith.mulf %341, %339 : vector<8x128xf32>
    %343 = arith.mulf %333, %305 : vector<8x128xf32>
    %344 = arith.addf %342, %343 : vector<8x128xf32>
    %c7_i32 = arith.constant 7 : i32
    %345 = vector.broadcast %c7_i32 : i32 to vector<8x1xi32>
    %346 = arith.cmpi sgt, %0, %345 : vector<8x1xi32>
    %347 = vector.shape_cast %346 : vector<8x1xi1> to vector<8x1xi1>
    %348 = vector.broadcast %347 : vector<8x1xi1> to vector<8x128xi1>
    %349 = arith.select %348, %344, %305 : vector<8x128xi1>, vector<8x128xf32>
    %cst_96 = arith.constant 0.000000e+00 : f32
    %350 = vector.shape_cast %346 : vector<8x1xi1> to vector<8x1xi1>
    %351 = vector.broadcast %350 : vector<8x1xi1> to vector<8x128xi1>
    %352 = vector.broadcast %cst_96 : f32 to vector<8x128xf32>
    %353 = arith.select %351, %344, %352 : vector<8x128xi1>, vector<8x128xf32>
    %c7_97 = arith.constant 7 : index
    %c0_98 = arith.constant 0 : index
    %c0_99 = arith.constant 0 : index
    %354 = vector.load %arg6[%c7_97, %c0_98, %c0_99] : memref<10x8x128xf32, #tpu.memory_space<vmem>>, vector<1x8x128xf32>
    %355 = vector.shape_cast %354 : vector<1x8x128xf32> to vector<8x128xf32>
    %356 = vector.shape_cast %353 : vector<8x128xf32> to vector<1x8x128xf32>
    tpu.vector_store %arg6[%c7_97, %c0_98, %c0_99], %356 {strides = array<i32>} : memref<10x8x128xf32, #tpu.memory_space<vmem>>, vector<1x8x128xf32>,
    %c8 = arith.constant 8 : index
    %c0_100 = arith.constant 0 : index
    %c0_101 = arith.constant 0 : index
    %357 = vector.load %arg0[%c8, %c0_100, %c0_101] : memref<10x8x384xf32, #tpu.memory_space<vmem>>, vector<1x8x384xf32>
    %358 = vector.shape_cast %357 : vector<1x8x384xf32> to vector<8x384xf32>
    %359 = arith.truncf %349 : vector<8x128xf32> to vector<8x128xbf16>
    %c0_102 = arith.constant 0 : index
    %c0_103 = arith.constant 0 : index
    %360 = vector.load %arg2[%c0_102, %c0_103] : memref<128x384xbf16, #tpu.memory_space<vmem>>, vector<128x384xbf16>
    %cst_104 = arith.constant dense<0.000000e+00> : vector<8x384xf32>
    %361 = tpu.matmul %359, %360, %cst_104 {dimension_numbers = #tpu.dot_dimension_numbers<[1], [0], [0], [1], [0, 0, 1, 1], [], []>} : vector<8x128xbf16>, vector<128x384xbf16>, vector<8x384xf32> -> vector<8x384xf32>
    %362 = vector.extract_strided_slice %358 {offsets = [0, 0], sizes = [8, 128], strides = [1, 1]} : vector<8x384xf32> to vector<8x128xf32>
    %363 = vector.extract_strided_slice %361 {offsets = [0, 0], sizes = [8, 128], strides = [1, 1]} : vector<8x384xf32> to vector<8x128xf32>
    %364 = arith.addf %362, %363 : vector<8x128xf32>
    %365 = arith.negf %364 : vector<8x128xf32>
    %366 = math.exp %365 : vector<8x128xf32>
    %cst_105 = arith.constant 1.000000e+00 : f32
    %367 = vector.broadcast %cst_105 : f32 to vector<8x128xf32>
    %368 = arith.addf %367, %366 : vector<8x128xf32>
    %369 = arith.divf %367, %368 : vector<8x128xf32>
    %370 = vector.extract_strided_slice %358 {offsets = [0, 128], sizes = [8, 128], strides = [1, 1]} : vector<8x384xf32> to vector<8x128xf32>
    %371 = vector.extract_strided_slice %361 {offsets = [0, 128], sizes = [8, 128], strides = [1, 1]} : vector<8x384xf32> to vector<8x128xf32>
    %372 = arith.addf %370, %371 : vector<8x128xf32>
    %373 = arith.negf %372 : vector<8x128xf32>
    %374 = math.exp %373 : vector<8x128xf32>
    %cst_106 = arith.constant 1.000000e+00 : f32
    %375 = vector.broadcast %cst_106 : f32 to vector<8x128xf32>
    %376 = arith.addf %375, %374 : vector<8x128xf32>
    %377 = arith.divf %375, %376 : vector<8x128xf32>
    %378 = vector.extract_strided_slice %358 {offsets = [0, 256], sizes = [8, 128], strides = [1, 1]} : vector<8x384xf32> to vector<8x128xf32>
    %379 = vector.extract_strided_slice %361 {offsets = [0, 256], sizes = [8, 128], strides = [1, 1]} : vector<8x384xf32> to vector<8x128xf32>
    %380 = arith.addf %379, %3 : vector<8x128xf32>
    %381 = arith.mulf %369, %380 : vector<8x128xf32>
    %382 = arith.addf %378, %381 : vector<8x128xf32>
    %383 = math.tanh %382 : vector<8x128xf32>
    %cst_107 = arith.constant 1.000000e+00 : f32
    %384 = vector.broadcast %cst_107 : f32 to vector<8x128xf32>
    %385 = arith.subf %384, %377 : vector<8x128xf32>
    %386 = arith.mulf %385, %383 : vector<8x128xf32>
    %387 = arith.mulf %377, %349 : vector<8x128xf32>
    %388 = arith.addf %386, %387 : vector<8x128xf32>
    %c8_i32 = arith.constant 8 : i32
    %389 = vector.broadcast %c8_i32 : i32 to vector<8x1xi32>
    %390 = arith.cmpi sgt, %0, %389 : vector<8x1xi32>
    %391 = vector.shape_cast %390 : vector<8x1xi1> to vector<8x1xi1>
    %392 = vector.broadcast %391 : vector<8x1xi1> to vector<8x128xi1>
    %393 = arith.select %392, %388, %349 : vector<8x128xi1>, vector<8x128xf32>
    %cst_108 = arith.constant 0.000000e+00 : f32
    %394 = vector.shape_cast %390 : vector<8x1xi1> to vector<8x1xi1>
    %395 = vector.broadcast %394 : vector<8x1xi1> to vector<8x128xi1>
    %396 = vector.broadcast %cst_108 : f32 to vector<8x128xf32>
    %397 = arith.select %395, %388, %396 : vector<8x128xi1>, vector<8x128xf32>
    %c8_109 = arith.constant 8 : index
    %c0_110 = arith.constant 0 : index
    %c0_111 = arith.constant 0 : index
    %398 = vector.load %arg6[%c8_109, %c0_110, %c0_111] : memref<10x8x128xf32, #tpu.memory_space<vmem>>, vector<1x8x128xf32>
    %399 = vector.shape_cast %398 : vector<1x8x128xf32> to vector<8x128xf32>
    %400 = vector.shape_cast %397 : vector<8x128xf32> to vector<1x8x128xf32>
    tpu.vector_store %arg6[%c8_109, %c0_110, %c0_111], %400 {strides = array<i32>} : memref<10x8x128xf32, #tpu.memory_space<vmem>>, vector<1x8x128xf32>,
    %c9 = arith.constant 9 : index
    %c0_112 = arith.constant 0 : index
    %c0_113 = arith.constant 0 : index
    %401 = vector.load %arg0[%c9, %c0_112, %c0_113] : memref<10x8x384xf32, #tpu.memory_space<vmem>>, vector<1x8x384xf32>
    %402 = vector.shape_cast %401 : vector<1x8x384xf32> to vector<8x384xf32>
    %403 = arith.truncf %393 : vector<8x128xf32> to vector<8x128xbf16>
    %c0_114 = arith.constant 0 : index
    %c0_115 = arith.constant 0 : index
    %404 = vector.load %arg2[%c0_114, %c0_115] : memref<128x384xbf16, #tpu.memory_space<vmem>>, vector<128x384xbf16>
    %cst_116 = arith.constant dense<0.000000e+00> : vector<8x384xf32>
    %405 = tpu.matmul %403, %404, %cst_116 {dimension_numbers = #tpu.dot_dimension_numbers<[1], [0], [0], [1], [0, 0, 1, 1], [], []>} : vector<8x128xbf16>, vector<128x384xbf16>, vector<8x384xf32> -> vector<8x384xf32>
    %406 = vector.extract_strided_slice %402 {offsets = [0, 0], sizes = [8, 128], strides = [1, 1]} : vector<8x384xf32> to vector<8x128xf32>
    %407 = vector.extract_strided_slice %405 {offsets = [0, 0], sizes = [8, 128], strides = [1, 1]} : vector<8x384xf32> to vector<8x128xf32>
    %408 = arith.addf %406, %407 : vector<8x128xf32>
    %409 = arith.negf %408 : vector<8x128xf32>
    %410 = math.exp %409 : vector<8x128xf32>
    %cst_117 = arith.constant 1.000000e+00 : f32
    %411 = vector.broadcast %cst_117 : f32 to vector<8x128xf32>
    %412 = arith.addf %411, %410 : vector<8x128xf32>
    %413 = arith.divf %411, %412 : vector<8x128xf32>
    %414 = vector.extract_strided_slice %402 {offsets = [0, 128], sizes = [8, 128], strides = [1, 1]} : vector<8x384xf32> to vector<8x128xf32>
    %415 = vector.extract_strided_slice %405 {offsets = [0, 128], sizes = [8, 128], strides = [1, 1]} : vector<8x384xf32> to vector<8x128xf32>
    %416 = arith.addf %414, %415 : vector<8x128xf32>
    %417 = arith.negf %416 : vector<8x128xf32>
    %418 = math.exp %417 : vector<8x128xf32>
    %cst_118 = arith.constant 1.000000e+00 : f32
    %419 = vector.broadcast %cst_118 : f32 to vector<8x128xf32>
    %420 = arith.addf %419, %418 : vector<8x128xf32>
    %421 = arith.divf %419, %420 : vector<8x128xf32>
    %422 = vector.extract_strided_slice %402 {offsets = [0, 256], sizes = [8, 128], strides = [1, 1]} : vector<8x384xf32> to vector<8x128xf32>
    %423 = vector.extract_strided_slice %405 {offsets = [0, 256], sizes = [8, 128], strides = [1, 1]} : vector<8x384xf32> to vector<8x128xf32>
    %424 = arith.addf %423, %3 : vector<8x128xf32>
    %425 = arith.mulf %413, %424 : vector<8x128xf32>
    %426 = arith.addf %422, %425 : vector<8x128xf32>
    %427 = math.tanh %426 : vector<8x128xf32>
    %cst_119 = arith.constant 1.000000e+00 : f32
    %428 = vector.broadcast %cst_119 : f32 to vector<8x128xf32>
    %429 = arith.subf %428, %421 : vector<8x128xf32>
    %430 = arith.mulf %429, %427 : vector<8x128xf32>
    %431 = arith.mulf %421, %393 : vector<8x128xf32>
    %432 = arith.addf %430, %431 : vector<8x128xf32>
    %c9_i32 = arith.constant 9 : i32
    %433 = vector.broadcast %c9_i32 : i32 to vector<8x1xi32>
    %434 = arith.cmpi sgt, %0, %433 : vector<8x1xi32>
    %435 = vector.shape_cast %434 : vector<8x1xi1> to vector<8x1xi1>
    %436 = vector.broadcast %435 : vector<8x1xi1> to vector<8x128xi1>
    %437 = arith.select %436, %432, %393 : vector<8x128xi1>, vector<8x128xf32>
    %cst_120 = arith.constant 0.000000e+00 : f32
    %438 = vector.shape_cast %434 : vector<8x1xi1> to vector<8x1xi1>
    %439 = vector.broadcast %438 : vector<8x1xi1> to vector<8x128xi1>
    %440 = vector.broadcast %cst_120 : f32 to vector<8x128xf32>
    %441 = arith.select %439, %432, %440 : vector<8x128xi1>, vector<8x128xf32>
    %c9_121 = arith.constant 9 : index
    %c0_122 = arith.constant 0 : index
    %c0_123 = arith.constant 0 : index
    %442 = vector.load %arg6[%c9_121, %c0_122, %c0_123] : memref<10x8x128xf32, #tpu.memory_space<vmem>>, vector<1x8x128xf32>
    %443 = vector.shape_cast %442 : vector<1x8x128xf32> to vector<8x128xf32>
    %444 = vector.shape_cast %441 : vector<8x128xf32> to vector<1x8x128xf32>
    tpu.vector_store %arg6[%c9_121, %c0_122, %c0_123], %444 {strides = array<i32>} : memref<10x8x128xf32, #tpu.memory_space<vmem>>, vector<1x8x128xf32>,
    %cst_124 = arith.constant dense<0.000000e+00> : vector<8xf32>
    %445 = vector.multi_reduction <add>, %437, %cst_124 [1] : vector<8x128xf32> to vector<8xf32>
    %446 = vector.shape_cast %445 : vector<8xf32> to vector<8x1xf32>
    %cst_125 = arith.constant 1.280000e+02 : f32
    %447 = vector.broadcast %cst_125 : f32 to vector<8x1xf32>
    %448 = arith.divf %446, %447 : vector<8x1xf32>
    %449 = vector.broadcast %448 : vector<8x1xf32> to vector<8x128xf32>
    %450 = arith.subf %437, %449 : vector<8x128xf32>
    %451 = vector.broadcast %448 : vector<8x1xf32> to vector<8x128xf32>
    %452 = arith.subf %437, %451 : vector<8x128xf32>
    %453 = arith.mulf %450, %452 : vector<8x128xf32>
    %cst_126 = arith.constant dense<0.000000e+00> : vector<8xf32>
    %454 = vector.multi_reduction <add>, %453, %cst_126 [1] : vector<8x128xf32> to vector<8xf32>
    %455 = vector.shape_cast %454 : vector<8xf32> to vector<8x1xf32>
    %cst_127 = arith.constant 1.280000e+02 : f32
    %456 = vector.broadcast %cst_127 : f32 to vector<8x1xf32>
    %457 = arith.divf %455, %456 : vector<8x1xf32>
    %458 = vector.broadcast %448 : vector<8x1xf32> to vector<8x128xf32>
    %459 = arith.subf %437, %458 : vector<8x128xf32>
    %cst_128 = arith.constant 9.99999974E-6 : f32
    %460 = vector.broadcast %cst_128 : f32 to vector<8x1xf32>
    %461 = arith.addf %457, %460 : vector<8x1xf32>
    %462 = math.rsqrt %461 : vector<8x1xf32>
    %463 = vector.broadcast %462 : vector<8x1xf32> to vector<8x128xf32>
    %464 = arith.mulf %459, %463 : vector<8x128xf32>
    %c0_129 = arith.constant 0 : index
    %c0_130 = arith.constant 0 : index
    %465 = vector.load %arg4[%c0_129, %c0_130] : memref<1x128xf32, #tpu.memory_space<vmem>>, vector<1x128xf32>
    %466 = vector.broadcast %465 : vector<1x128xf32> to vector<8x128xf32>
    %467 = arith.mulf %464, %466 : vector<8x128xf32>
    %c0_131 = arith.constant 0 : index
    %c0_132 = arith.constant 0 : index
    %468 = vector.load %arg5[%c0_131, %c0_132] : memref<1x128xf32, #tpu.memory_space<vmem>>, vector<1x128xf32>
    %469 = vector.broadcast %468 : vector<1x128xf32> to vector<8x128xf32>
    %470 = arith.addf %467, %469 : vector<8x128xf32>
    %c0_133 = arith.constant 0 : index
    %c0_134 = arith.constant 0 : index
    %471 = vector.load %arg7[%c0_133, %c0_134] : memref<8x128xf32, #tpu.memory_space<vmem>>, vector<8x128xf32>
    tpu.vector_store %arg7[%c0_133, %c0_134], %470 {strides = array<i32>} : memref<8x128xf32, #tpu.memory_space<vmem>>, vector<8x128xf32>,
    return
  }
}

</mosaic_0001>

<bundles_post_ra>
// kernel: encoder_forward.1
= control target key start
LH: loop header
LB: loop body
LE: loop exit
PB: predicated region body
PF: predicated region fallthrough
CT: control target
= control target key end

     0   :  { %13 = vsyncpa [#allocation3], 0  ;;  %v4148_v44 = vmov 0   ;;  %s5874_s0 = inlined_call_operand.vmem [shape: f32[10,8,384], index: 0, kind: input, shape index: {}]   ;;  %s5875_s1 = inlined_call_operand.vmem [shape: s32[8,1], index: 1, kind: input, shape index: {}]   ;;  %s5876_s2 = inlined_call_operand.vmem [shape: bf16[128,384], index: 2, kind: input, shape index: {}]   ;;  %s5877_s3 = inlined_call_operand.vmem [shape: f32[1,128], index: 3, kind: input, shape index: {}]   ;;  %s5878_s4 = inlined_call_operand.vmem [shape: f32[1,128], index: 4, kind: input, shape index: {}]   ;;  %s5879_s5 = inlined_call_operand.vmem [shape: f32[1,128], index: 5, kind: input, shape index: {}]   ;;  %s5880_s6 = inlined_call_operand.hbm [shape: f32[10,8,128], index: 6, kind: output, shape index: {0}]   ;;  %s5881_s7 = inlined_call_operand.hbm [shape: f32[8,128], index: 7, kind: output, shape index: {1}]  }
   0x1   :  { %v2807_v0 = vld [vmem:[%s5876_s2 + $0xa8] sm:$0xf]  ;;  %v3759_v1 = vld [vmem:[%s5876_s2 + $0xb0] sm:$0xf0]  ;;  %v3758_v2 = vld [vmem:[%s5876_s2 + $0xac] sm:$0xf]  ;;  %3983 = vset.pattern.permute.xlu0 %v4148_v44  ;;  %3984 = vset.pattern.permute.xlu1 %v4148_v44 }
   0x2   :  { %v2808_v3 = vor.u32 %v3759_v1, %v2807_v0  ;;  %v2809_v4 = vld [vmem:[%s5876_s2 + $0xb4] sm:$0xf0]  ;;  %v2795_v5 = vld [vmem:[%s5876_s2 + $0x90] sm:$0xf]  ;;  %v3756_v6 = vld [vmem:[%s5876_s2 + $0x98] sm:$0xf0]  ;;  %3985 = vset.pattern.permute.xlu2 %v4148_v44 }
   0x3   :  { %v2812_v7 = vor.u32 %v3758_v2, %v2809_v4  ;;  %v3755_v8 = vld [vmem:[%s5876_s2 + $0x94] sm:$0xf]  ;;  %v2797_v9 = vld [vmem:[%s5876_s2 + $0x9c] sm:$0xf0]  ;;  %v2796_v10 = vor.u32 %v3756_v6, %v2795_v5  ;;  %v2783_v12 = vld [vmem:[%s5876_s2 + $0x78] sm:$0xf] }
   0x4   :  { %196 = vmatpush.bf16.msra.mxu0 %v2808_v3  ;;  %v2800_v11 = vor.u32 %v3755_v8, %v2797_v9  ;;  %v3753_v13 = vld [vmem:[%s5876_s2 + $0x80] sm:$0xf0]  ;;  %v3752_v14 = vld [vmem:[%s5876_s2 + $0x7c] sm:$0xf]  ;;  %v2785_v15 = vld [vmem:[%s5876_s2 + $0x84] sm:$0xf0] }
   0x5   :  { %209 = vmatpush.bf16.msra.mxu1 %v2812_v7  ;;  %v2815_v16 = vld [vmem:[%s5876_s2 + $0xb0] sm:$0xf]  ;;  %v3760_v17 = vld [vmem:[%s5876_s2 + $0xb8] sm:$0xf0]  ;;  %v2784_v19 = vor.u32 %v3753_v13, %v2783_v12  ;;  %v2803_v20 = vld [vmem:[%s5876_s2 + $0x98] sm:$0xf]  ;;  %v2788_v22 = vor.u32 %v3752_v14, %v2785_v15 }
   0x6   :  { %v2816_v18 = vor.u32 %v3760_v17, %v2815_v16  ;;  %v3757_v21 = vld [vmem:[%s5876_s2 + $0xa0] sm:$0xf0]  ;;  %v2771_v23 = vld [vmem:[%s5876_s2 + $0x60] sm:$0xf]  ;;  %v3750_v24 = vld [vmem:[%s5876_s2 + $0x68] sm:$0xf0] }
   0x7   :  { %v3749_v25 = vld [vmem:[%s5876_s2 + $0x64] sm:$0xf]  ;;  %v2804_v26 = vor.u32 %v3757_v21, %v2803_v20  ;;  %v2773_v27 = vld [vmem:[%s5876_s2 + $0x6c] sm:$0xf0]  ;;  %v2791_v28 = vld [vmem:[%s5876_s2 + $0x80] sm:$0xf]  ;;  %v2772_v30 = vor.u32 %v3750_v24, %v2771_v23 }
   0x8   :  { %197 = vmatpush.bf16.msra.mxu0 %v2796_v10  ;;  %222 = vmatpush.bf16.msra.mxu2 %v2816_v18  ;;  %v3754_v29 = vld [vmem:[%s5876_s2 + $0x88] sm:$0xf0]  ;;  %v2776_v31 = vor.u32 %v3749_v25, %v2773_v27  ;;  %v2759_v32 = vld [vmem:[%s5876_s2 + $0x48] sm:$0xf]  ;;  %v3747_v33 = vld [vmem:[%s5876_s2 + $0x50] sm:$0xf0] }
   0x9   :  { %210 = vmatpush.bf16.msra.mxu1 %v2800_v11  ;;  %v3746_v34 = vld [vmem:[%s5876_s2 + $0x4c] sm:$0xf]  ;;  %v2792_v35 = vor.u32 %v3754_v29, %v2791_v28  ;;  %v2761_v36 = vld [vmem:[%s5876_s2 + $0x54] sm:$0xf0]  ;;  %v2779_v37 = vld [vmem:[%s5876_s2 + $0x68] sm:$0xf]  ;;  %v2760_v40 = vor.u32 %v3747_v33, %v2759_v32 }
   0xa   :  { %v3751_v38 = vld [vmem:[%s5876_s2 + $0x70] sm:$0xf0]  ;;  %v4281_v39 = vld [vmem:[%s5875_s1] sm:$0xff]  ;;  %v2747_v41 = vld [vmem:[%s5876_s2 + $0x30] sm:$0xf]  ;;  %v2764_v45 = vor.u32 %v3746_v34, %v2761_v36 }
   0xb   :  { %v3744_v42 = vld [vmem:[%s5876_s2 + $0x38] sm:$0xf0]  ;;  %v3743_v43 = vld [vmem:[%s5876_s2 + $0x34] sm:$0xf]  ;;  %v2749_v46 = vld [vmem:[%s5876_s2 + $0x3c] sm:$0xf0]  ;;  %v2780_v47 = vor.u32 %v3751_v38, %v2779_v37 }
   0xc   :  { %198 = vmatpush.bf16.msra.mxu0 %v2784_v19  ;;  %223 = vmatpush.bf16.msra.mxu2 %v2804_v26  ;;  %v2767_v48 = vld [vmem:[%s5876_s2 + $0x50] sm:$0xf]  ;;  %vm283_vm0 = vcmp.gt.s32.totalorder %v4281_v39, 0  ;;  %v3748_v49 = vld [vmem:[%s5876_s2 + $0x58] sm:$0xf0] }
   0xd   :  { %211 = vmatpush.bf16.msra.mxu1 %v2788_v22  ;;  %v284_v50 = vsel %vm283_vm0, 1, %v4148_v44 }
   0xe   :  { %286 = vperm.xlu0 %3983, %v284_v50  }
  0x10   :  { %199 = vmatpush.bf16.msra.mxu0 %v2772_v30  ;;  %224 = vmatpush.bf16.msra.mxu2 %v2792_v35 }
  0x11   :  { %212 = vmatpush.bf16.msra.mxu1 %v2776_v31 }
  0x12   :  { %14 = vsyncpa [#allocation5], 0  ;;  %v2748_v51 = vor.u32 %v3744_v42, %v2747_v41  ;;  %v2735_v52 = vld [vmem:[%s5876_s2 + $0x18] sm:$0xf]  ;;  %v2752_v53 = vor.u32 %v3743_v43, %v2749_v46  ;;  %v3741_v54 = vld [vmem:[%s5876_s2 + $0x20] sm:$0xf0]  ;;  %v2768_v56 = vor.u32 %v3748_v49, %v2767_v48 }
  0x13   :  { %v3740_v55 = vld [vmem:[%s5876_s2 + $0x1c] sm:$0xf]  ;;  %vm543_vm1 = vcmp.gt.s32.totalorder %v4281_v39, 1  ;;  %v2737_v57 = vld [vmem:[%s5876_s2 + $0x24] sm:$0xf0]  ;;  %v2736_v60 = vor.u32 %v3741_v54, %v2735_v52  ;;  %vm1853_vm2 = vcmp.gt.s32.totalorder %v4281_v39, 6 }
  0x14   :  { %200 = vmatpush.bf16.msra.mxu0 %v2760_v40  ;;  %225 = vmatpush.bf16.msra.mxu2 %v2780_v47  ;;  %v2755_v58 = vld [vmem:[%s5876_s2 + $0x38] sm:$0xf]  ;;  %v3745_v59 = vld [vmem:[%s5876_s2 + $0x40] sm:$0xf0]  ;;  %v544_v61 = vsel %vm543_vm1, 1, %v4148_v44  ;;  %v2740_v62 = vor.u32 %v3740_v55, %v2737_v57  ;;  %v1854_v11 = vsel %vm1853_vm2, 1, %v4148_v44 }
  0x15   :  { %213 = vmatpush.bf16.msra.mxu1 %v2764_v45  ;;  %v2723_v63 = vld [vmem:[%s5876_s2] sm:$0xf]  ;;  %v3738_v0 = vld [vmem:[%s5876_s2 + $0x8] sm:$0xf0]  ;;  %v3737_v1 = vld [vmem:[%s5876_s2 + $0x4] sm:$0xf]  ;;  %v2756_v2 = vor.u32 %v3745_v59, %v2755_v58 }
  0x16   :  { %v2725_v3 = vld [vmem:[%s5876_s2 + $0xc] sm:$0xf0]  ;;  %v2743_v4 = vld [vmem:[%s5876_s2 + $0x20] sm:$0xf]  ;;  %v3742_v5 = vld [vmem:[%s5876_s2 + $0x28] sm:$0xf0]  ;;  %546 = vperm.xlu0 %3983, %v544_v61   ;;  %v2724_v6 = vor.u32 %v3738_v0, %v2723_v63 }
  0x17   :  { %v2728_v7 = vor.u32 %v3737_v1, %v2725_v3  ;;  %v2744_v8 = vor.u32 %v3742_v5, %v2743_v4  ;;  %v2731_v9 = vld [vmem:[%s5876_s2 + $0x8] sm:$0xf]  ;;  %v3739_v10 = vld [vmem:[%s5876_s2 + $0x10] sm:$0xf0]  ;;  %vm2639_vm3 = vcmp.gt.s32.totalorder %v4281_v39, 9  ;;  %v33_v52 = vld [vmem:[%s5874_s0] sm:$0xff] }
  0x18   :  { %201 = vmatpush.bf16.msra.mxu0 %v2748_v51  ;;  %226 = vmatpush.bf16.msra.mxu2 %v2768_v56  ;;  %v2732_v12 = vor.u32 %v3739_v10, %v2731_v9  ;;  %v2640_v13 = vsel %vm2639_vm3, 1, %v4148_v44  ;;  %v2908_v14 = vld [vmem:[%s5876_s2 + $0xa8] sm:$0xf]  ;;  %v3783_v15 = vld [vmem:[%s5876_s2 + $0xb0] sm:$0xf0]  ;;  %vm805_vm14 = vcmp.gt.s32.totalorder %v4281_v39, 2 }
  0x19   :  { %214 = vmatpush.bf16.msra.mxu1 %v2752_v53  ;;  %v3782_v16 = vld [vmem:[%s5876_s2 + $0xac] sm:$0xf]  ;;  %v2909_v17 = vor.u32 %v3783_v15, %v2908_v14  ;;  %v2910_v18 = vld [vmem:[%s5876_s2 + $0xb4] sm:$0xf0]  ;;  %v2916_v19 = vld [vmem:[%s5876_s2 + $0xb0] sm:$0xf] }
  0x1a   :  { %v3784_v20 = vld [vmem:[%s5876_s2 + $0xb8] sm:$0xf0]  ;;  %v2913_v21 = vor.u32 %v3782_v16, %v2910_v18  ;;  %v2896_v23 = vld [vmem:[%s5876_s2 + $0x90] sm:$0xf]  ;;  %v3779_v25 = vld [vmem:[%s5876_s2 + $0x94] sm:$0xf] }
  0x1b   :  { %v2917_v22 = vor.u32 %v3784_v20, %v2916_v19  ;;  %456 = vmatpush.bf16.msra.mxu3 %v2909_v17  ;;  %v3780_v24 = vld [vmem:[%s5876_s2 + $0x98] sm:$0xf0]  ;;  %v2898_v27 = vld [vmem:[%s5876_s2 + $0x9c] sm:$0xf0]  ;;  %v2904_v28 = vld [vmem:[%s5876_s2 + $0x98] sm:$0xf] }
  0x1c   :  { %202 = vmatpush.bf16.msra.mxu0 %v2736_v60  ;;  %227 = vmatpush.bf16.msra.mxu2 %v2756_v2  ;;  %v2897_v26 = vor.u32 %v3780_v24, %v2896_v23  ;;  %v3781_v29 = vld [vmem:[%s5876_s2 + $0xa0] sm:$0xf0]  ;;  %v2901_v30 = vor.u32 %v3779_v25, %v2898_v27  ;;  %v2884_v32 = vld [vmem:[%s5876_s2 + $0x78] sm:$0xf]  ;;  %v3776_v34 = vld [vmem:[%s5876_s2 + $0x7c] sm:$0xf] }
  0x1d   :  { %215 = vmatpush.bf16.msra.mxu1 %v2740_v62  ;;  %v2905_v31 = vor.u32 %v3781_v29, %v2904_v28  ;;  %v3777_v33 = vld [vmem:[%s5876_s2 + $0x80] sm:$0xf0]  ;;  %v2886_v36 = vld [vmem:[%s5876_s2 + $0x84] sm:$0xf0]  ;;  %v2892_v38 = vld [vmem:[%s5876_s2 + $0x80] sm:$0xf] }
  0x1e   :  { %1856 = vperm.xlu0 %3983, %v1854_v11   ;;  %v2885_v35 = vor.u32 %v3777_v33, %v2884_v32  ;;  %v2889_v37 = vor.u32 %v3776_v34, %v2886_v36  ;;  %v3778_v40 = vld [vmem:[%s5876_s2 + $0x88] sm:$0xf0]  ;;  %v2872_v42 = vld [vmem:[%s5876_s2 + $0x60] sm:$0xf]  ;;  %v3773_v45 = vld [vmem:[%s5876_s2 + $0x64] sm:$0xf] }
  0x1f   :  { %457 = vmatpush.bf16.msra.mxu3 %v2897_v26  ;;  %v2893_v41 = vor.u32 %v3778_v40, %v2892_v38  ;;  %v3774_v43 = vld [vmem:[%s5876_s2 + $0x68] sm:$0xf0]  ;;  %v2874_v47 = vld [vmem:[%s5876_s2 + $0x6c] sm:$0xf0]  ;;  %v2880_v48 = vld [vmem:[%s5876_s2 + $0x68] sm:$0xf] }
  0x20   :  { %203 = vmatpush.bf16.msra.mxu0 %v2724_v6  ;;  %228 = vmatpush.bf16.msra.mxu2 %v2744_v8  ;;  %v2873_v46 = vor.u32 %v3774_v43, %v2872_v42  ;;  %v3775_v49 = vld [vmem:[%s5876_s2 + $0x70] sm:$0xf0]  ;;  %v2877_v50 = vor.u32 %v3773_v45, %v2874_v47  ;;  %v34_v53 = vld [vmem:[%s5874_s0 + $0x8] sm:$0xff]  ;;  %v2862_v59 = vld [vmem:[%s5876_s2 + $0x54] sm:$0xf0]  ;;  %vm1067_vm15 = vcmp.gt.s32.totalorder %v4281_v39, 3 }
  0x21   :  { %216 = vmatpush.bf16.msra.mxu1 %v2728_v7  ;;  %v2881_v51 = vor.u32 %v3775_v49, %v2880_v48  ;;  %v2860_v54 = vld [vmem:[%s5876_s2 + $0x48] sm:$0xf]  ;;  %v3771_v55 = vld [vmem:[%s5876_s2 + $0x50] sm:$0xf0]  ;;  %v3770_v56 = vld [vmem:[%s5876_s2 + $0x4c] sm:$0xf] }
  0x22   :  { %v2861_v58 = vor.u32 %v3771_v55, %v2860_v54  ;;  %v2868_v60 = vld [vmem:[%s5876_s2 + $0x50] sm:$0xf]  ;;  %v3772_v61 = vld [vmem:[%s5876_s2 + $0x58] sm:$0xf0]  ;;  %v2865_v0 = vor.u32 %v3770_v56, %v2862_v59  ;;  %v3767_v8 = vld [vmem:[%s5876_s2 + $0x34] sm:$0xf] }
  0x23   :  { %204 = vmatmul.bf16.vlgmr.msra.gmra.mxu0 %v4148_v44  ;;  %458 = vmatpush.bf16.msra.mxu3 %v2885_v35  ;;  %v2869_v1 = vor.u32 %v3772_v61, %v2868_v60  ;;  %v2848_v4 = vld [vmem:[%s5876_s2 + $0x30] sm:$0xf]  ;;  %v3768_v5 = vld [vmem:[%s5876_s2 + $0x38] sm:$0xf0]  ;;  %v2850_v9 = vld [vmem:[%s5876_s2 + $0x3c] sm:$0xf0] }
  0x24   :  { %217 = vmatmul.bf16.vlgmr.msra.gmra.mxu1 %v4148_v44  ;;  %229 = vmatpush.bf16.msra.mxu2 %v2732_v12  ;;  %v2849_v7 = vor.u32 %v3768_v5, %v2848_v4  ;;  %v2853_v10 = vor.u32 %v3767_v8, %v2850_v9  ;;  %v2856_v11 = vld [vmem:[%s5876_s2 + $0x38] sm:$0xf]  ;;  %v3769_v12 = vld [vmem:[%s5876_s2 + $0x40] sm:$0xf0]  ;;  %v3764_v16 = vld [vmem:[%s5876_s2 + $0x1c] sm:$0xf] }
  0x25   :  { %469 = vmatpush.bf16.msrb.mxu0 %v2913_v21  ;;  %482 = vmatpush.bf16.msrb.mxu1 %v2917_v22  ;;  %v2836_v14 = vld [vmem:[%s5876_s2 + $0x18] sm:$0xf]  ;;  %v3765_v15 = vld [vmem:[%s5876_s2 + $0x20] sm:$0xf0]  ;;  %v2838_v19 = vld [vmem:[%s5876_s2 + $0x24] sm:$0xf0] }
  0x26   :  { %2642 = vperm.xlu0 %3983, %v2640_v13   ;;  %v2857_v13 = vor.u32 %v3769_v12, %v2856_v11  ;;  %v2837_v18 = vor.u32 %v3765_v15, %v2836_v14  ;;  %v2844_v20 = vld [vmem:[%s5876_s2 + $0x20] sm:$0xf]  ;;  %v3766_v21 = vld [vmem:[%s5876_s2 + $0x28] sm:$0xf0]  ;;  %v2841_v23 = vor.u32 %v3764_v16, %v2838_v19  ;;  %v3761_v29 = vld [vmem:[%s5876_s2 + $0x4] sm:$0xf] }
  0x27   :  { %230 = vmatmul.bf16.vlgmr.msra.gmra.mxu2 %v4148_v44  ;;  %459 = vmatpush.bf16.msra.mxu3 %v2873_v46  ;;  %v2845_v24 = vor.u32 %v3766_v21, %v2844_v20  ;;  %v2824_v27 = vld [vmem:[%s5876_s2] sm:$0xf]  ;;  %v3762_v28 = vld [vmem:[%s5876_s2 + $0x8] sm:$0xf0]  ;;  %v2826_v33 = vld [vmem:[%s5876_s2 + $0xc] sm:$0xf0] }
  0x28   :  { %v2825_v32 = vor.u32 %v3762_v28, %v2824_v27  ;;  %v2829_v35 = vor.u32 %v3761_v29, %v2826_v33  ;;  %v2832_v36 = vld [vmem:[%s5876_s2 + $0x8] sm:$0xf]  ;;  %v4510_v46 = vld [vmem:[%s5877_s3] ss:$0 sm:$0xff]  ;;  %v3807_v12 = vld [vmem:[%s5876_s2 + $0xb0] sm:$0xf0] }
  0x29   :  { %470 = vmatpush.bf16.msrb.mxu0 %v2901_v30  ;;  %483 = vmatpush.bf16.msrb.mxu1 %v2905_v31  ;;  %v3018_v11 = vld [vmem:[%s5876_s2 + $0xa8] sm:$0xf]  ;;  %v3020_v15 = vld [vmem:[%s5876_s2 + $0xb4] sm:$0xf0]  ;;  %v3026_v16 = vld [vmem:[%s5876_s2 + $0xb0] sm:$0xf] }
  0x2a   :  { %v3019_v14 = vor.u32 %v3807_v12, %v3018_v11  ;;  %v3006_v20 = vld [vmem:[%s5876_s2 + $0x90] sm:$0xf]  ;;  %v3804_v21 = vld [vmem:[%s5876_s2 + $0x98] sm:$0xf0]  ;;  %v2820_v29 = vld [vmem:[%s5874_s0 + $0x20] sm:$0xff]  ;;  %s2693_s15 = sshll.u32 %s5880_s6, 4  ;;  %s2694_s15 = int_to_ptr.hbm [resolvable:$true] %s2693_s15 }
  0x2b   :  { %460 = vmatpush.bf16.msra.mxu3 %v2861_v58  ;;  %s4150_s16 = smov [#allocation2]   ;;  %s4151_s18 = smov 128  }
  0x2c   :  { %718 = vmatpush.bf16.msrb.mxu2 %v3019_v14  ;;  %s2691_s17 = sshll.u32 %s4150_s16, 4  ;;  %s4152_s19 = smov 8   ;;  %s2692_s17 = int_to_ptr.vmem [resolvable:$true] %s2691_s17 }
  0x2d   :  { %471 = vmatpush.bf16.msrb.mxu0 %v2889_v37  ;;  %484 = vmatpush.bf16.msrb.mxu1 %v2893_v41  ;;  %v3763_v37 = vld [vmem:[%s5876_s2 + $0x10] sm:$0xf0]  ;;  %s4153_s23 = smov [#allocation4]   ;;  %s2707_s26 = sshll.u32 %s5881_s7, 4  ;;  %s2708_s26 = int_to_ptr.hbm [resolvable:$true] %s2707_s26 }
  0x2e   :  { %v2833_v38 = vor.u32 %v3763_v37, %v2832_v36  ;;  %v3802_v36 = vld [vmem:[%s5876_s2 + $0x88] sm:$0xf0]  ;;  %s2705_s24 = sshll.u32 %s4153_s23, 4  ;;  %s2706_s24 = int_to_ptr.vmem [resolvable:$true] %s2705_s24 }
  0x2f   :  { %461 = vmatpush.bf16.msra.mxu3 %v2849_v7 }
  0x31   :  { %472 = vmatpush.bf16.msrb.mxu0 %v2877_v50  ;;  %485 = vmatpush.bf16.msrb.mxu1 %v2881_v51 }
  0x33   :  { %462 = vmatpush.bf16.msra.mxu3 %v2837_v18 }
  0x35   :  { %473 = vmatpush.bf16.msrb.mxu0 %v2865_v0  ;;  %486 = vmatpush.bf16.msrb.mxu1 %v2869_v1 }
  0x37   :  { %463 = vmatpush.bf16.msra.mxu3 %v2825_v32  ;;  %v3800_v32 = vld [vmem:[%s5876_s2 + $0x7c] sm:$0xf] }
  0x39   :  { %474 = vmatpush.bf16.msrb.mxu0 %v2853_v10  ;;  %487 = vmatpush.bf16.msrb.mxu1 %v2857_v13  ;;  %v3806_v13 = vld [vmem:[%s5876_s2 + $0xac] sm:$0xf] }
  0x3a   :  { %v3023_v18 = vor.u32 %v3806_v13, %v3020_v15  ;;  %v2946_v15 = vld [vmem:[%s5876_s2 + $0x18] sm:$0xf] }
  0x3c   :  { %731 = vmatpush.bf16.msrb.mxu3 %v3023_v18 }
  0x3d   :  { %475 = vmatpush.bf16.msrb.mxu0 %v2841_v23  ;;  %488 = vmatpush.bf16.msrb.mxu1 %v2845_v24  ;;  %v3007_v23 = vor.u32 %v3804_v21, %v3006_v20  ;;  %v3008_v24 = vld [vmem:[%s5876_s2 + $0x9c] sm:$0xf0]  ;;  %v2948_v20 = vld [vmem:[%s5876_s2 + $0x24] sm:$0xf0] }
  0x3f   :  { %719 = vmatpush.bf16.msrb.mxu2 %v3007_v23  ;;  %v3790_v23 = vld [vmem:[%s5876_s2 + $0x28] sm:$0xf0] }
  0x41   :  { %476 = vmatpush.bf16.msrb.mxu0 %v2829_v35  ;;  %489 = vmatpush.bf16.msrb.mxu1 %v2833_v38  ;;  %v3002_v35 = vld [vmem:[%s5876_s2 + $0x80] sm:$0xf] }
  0x80   :  { %v287_v5 = vpop.permute.xlu0 %286 }
  0x81   :  { %vm288_vm12 = vcmp.eq.s32.totalorder %v287_v5, 1  ;;  %v3791_v5 = vld [vmem:[%s5876_s2 + $0x34] sm:$0xf] }
  0x82   :  { %vm2918_vm13 = vmpackc.low %vm288_vm12, %vm288_vm12 }
  0xa0   :  { %v205_v57 = vpop.f32.mrf.mxu0 }
  0xa1   :  { %v235_v62 = vadd.f32 %v205_v57, %v33_v52  ;;  %v218_v63 = vpop.f32.mrf.mxu1  ;;  %v35_v57 = vld [vmem:[%s5874_s0 + $0x10] sm:$0xff] }
  0xa2   :  { %v255_v2 = vadd.f32 %v218_v63, %v34_v53 }
  0xa3   :  { %v2817_v3 = vmul.f32 -1.442695, %v235_v62 }
  0xa4   :  { %v2818_v6 = vmul.f32 -1.442695, %v255_v2 }
  0xa5   :  { %3989 = vpow2.f32 %v2817_v3 }
  0xa6   :  { %3991 = vpow2.f32 %v2818_v6 }
  0xa8   :  { %v207_v17 = vpop.f32.mrf.mxu0 }
  0xa9   :  { %v220_v22 = vpop.f32.mrf.mxu1  ;;  %v3808_v17 = vld [vmem:[%s5876_s2 + $0xb8] sm:$0xf0] }
  0xaa   :  { %v231_v26 = vpop.f32.mrf.mxu2  ;;  %v3027_v19 = vor.u32 %v3808_v17, %v3026_v16  ;;  %v3803_v22 = vld [vmem:[%s5876_s2 + $0x94] sm:$0xf]  ;;  %v3789_v16 = vld [vmem:[%s5876_s2 + $0x20] sm:$0xf0] }
  0xab   :  { %v3990_v25 = vpop.eup %3989  ;;  %v275_v54 = vadd.f32 %v4510_v46, %v231_v26  ;;  %v3805_v26 = vld [vmem:[%s5876_s2 + $0xa0] sm:$0xf0]  ;;  %v3011_v27 = vor.u32 %v3803_v22, %v3008_v24  ;;  %v2954_v22 = vld [vmem:[%s5876_s2 + $0x20] sm:$0xf]  ;;  %v2947_v24 = vor.u32 %v3789_v16, %v2946_v15  ;;  %v3831_v15 = vld [vmem:[%s5876_s2 + $0xb0] sm:$0xf0] }
  0xac   :  { %v3992_v30 = vpop.eup %3991  ;;  %v239_v31 = vadd.f32 1.0, %v3990_v25  ;;  %744 = vmatpush.bf16.msra.mxu0 %v3027_v19  ;;  %v3014_v25 = vld [vmem:[%s5876_s2 + $0x98] sm:$0xf]  ;;  %v3788_v19 = vld [vmem:[%s5876_s2 + $0x1c] sm:$0xf] }
  0xad   :  { %v259_v34 = vadd.f32 1.0, %v3992_v30  ;;  %v3015_v28 = vor.u32 %v3805_v26, %v3014_v25  ;;  %732 = vmatpush.bf16.msrb.mxu3 %v3011_v27  ;;  %v2994_v30 = vld [vmem:[%s5876_s2 + $0x78] sm:$0xf]  ;;  %v2951_v26 = vor.u32 %v3788_v19, %v2948_v20  ;;  %v2934_v27 = vld [vmem:[%s5876_s2] sm:$0xf] }
  0xae   :  { %3993 = vrcp.f32 %v239_v31  ;;  %v251_v49 = vand.u32 2147483648, %v239_v31  ;;  %v249_v51 = vand.u32 2147483647, %v239_v31  ;;  %vm245_vm5 = vweird.f32 %v239_v31  ;;  %v3832_v19 = vld [vmem:[%s5876_s2 + $0xb8] sm:$0xf0] }
  0xaf   :  { %3995 = vrcp.f32 %v259_v34  ;;  %vm265_vm8 = vweird.f32 %v259_v34  ;;  %v271_v61 = vand.u32 2147483648, %v259_v34  ;;  %v269_v62 = vand.u32 2147483647, %v259_v34 }
  0xb0   :  { %v252_v55 = vor.u32 1.1754944e-38, %v251_v49  ;;  %vm250_vm7 = vcmp.eq.f32.partialorder %v249_v51, 8.507059e+37  ;;  %745 = vmatpush.bf16.msra.mxu0 %v3015_v28  ;;  %v2990_v51 = vld [vmem:[%s5876_s2 + $0x68] sm:$0xf]  ;;  %v3786_v28 = vld [vmem:[%s5876_s2 + $0x8] sm:$0xf0] }
  0xb1   :  { %v272_v1 = vor.u32 1.1754944e-38, %v271_v61  ;;  %vm270_vm11 = vcmp.eq.f32.partialorder %v269_v62, 8.507059e+37  ;;  %v2972_v61 = vld [vmem:[%s5876_s2 + $0x54] sm:$0xf0]  ;;  %v2978_v62 = vld [vmem:[%s5876_s2 + $0x50] sm:$0xf] }
  0xb2   :  { %v233_v40 = vpop.f32.mrf.mxu2 }
  0xb3   :  { %v3003_v40 = vor.u32 %v3802_v36, %v3002_v35  ;;  %v2935_v35 = vor.u32 %v3786_v28, %v2934_v27  ;;  %v3115_v27 = vld [vmem:[%s5876_s2 + $0x98] sm:$0xf]  ;;  %v3829_v28 = vld [vmem:[%s5876_s2 + $0xa0] sm:$0xf0] }
  0xb4   :  { %v3994_v41 = vpop.eup %3993 }
  0xb5   :  { %v3996_v42 = vpop.eup %3995  ;;  %v241_v43 = vmul.f32 %v3994_v41, %v239_v31  ;;  %vm246_vm4 = vweird.f32 %v3994_v41  ;;  %v3801_v31 = vld [vmem:[%s5876_s2 + $0x80] sm:$0xf0]  ;;  %746 = vmatpush.bf16.msra.mxu0 %v3003_v40 }
  0xb6   :  { %v261_v45 = vmul.f32 %v3996_v42, %v259_v34  ;;  %vm247_vm6 = vmor %vm245_vm5, %vm246_vm4  ;;  %vm266_vm9 = vweird.f32 %v3996_v42  ;;  %v2995_v33 = vor.u32 %v3801_v31, %v2994_v30  ;;  %v2996_v34 = vld [vmem:[%s5876_s2 + $0x84] sm:$0xf0]  ;;  %v3785_v30 = vld [vmem:[%s5876_s2 + $0x4] sm:$0xf]  ;;  %vm2115_vm5 = vcmp.gt.s32.totalorder %v4281_v39, 7 }
  0xb7   :  { %v242_v47 = vsub.f32 1.0, %v241_v43  ;;  %vm267_vm10 = vmor %vm265_vm8, %vm266_vm9  ;;  %v2999_v38 = vor.u32 %v3800_v32, %v2996_v34  ;;  %v2982_v43 = vld [vmem:[%s5876_s2 + $0x60] sm:$0xf]  ;;  %v2936_v31 = vld [vmem:[%s5876_s2 + $0xc] sm:$0xf0] }
  0xb8   :  { %v262_v48 = vsub.f32 1.0, %v261_v45  ;;  %720 = vmatpush.bf16.msrb.mxu2 %v2995_v33  ;;  %v3798_v45 = vld [vmem:[%s5876_s2 + $0x68] sm:$0xf0]  ;;  %v2942_v32 = vld [vmem:[%s5876_s2 + $0x8] sm:$0xf] }
  0xb9   :  { %v243_v50 = vmul.f32 %v3994_v41, %v242_v47  ;;  %733 = vmatpush.bf16.msrb.mxu3 %v2999_v38  ;;  %v3797_v47 = vld [vmem:[%s5876_s2 + $0x64] sm:$0xf]  ;;  %v2983_v49 = vor.u32 %v3798_v45, %v2982_v43  ;;  %v3787_v33 = vld [vmem:[%s5876_s2 + $0x10] sm:$0xf0]  ;;  %v806_v43 = vsel %vm805_vm14, 1, %v4148_v44 }
  0xba   :  { %v263_v52 = vmul.f32 %v3996_v42, %v262_v48  ;;  %v2943_v38 = vor.u32 %v3787_v33, %v2942_v32  ;;  %808 = vperm.xlu1 %3984, %v806_v43   ;;  %v3825_v32 = vld [vmem:[%s5876_s2 + $0x80] sm:$0xf0]  ;;  %v3824_v33 = vld [vmem:[%s5876_s2 + $0x7c] sm:$0xf]  ;;  %v3083_v43 = vld [vmem:[%s5876_s2 + $0x60] sm:$0xf] }
  0xbb   :  { %v244_v53 = vadd.f32 %v3994_v41, %v243_v50  ;;  %v2984_v50 = vld [vmem:[%s5876_s2 + $0x6c] sm:$0xf0] }
  0xbc   :  { %v264_v59 = vadd.f32 %v3996_v42, %v263_v52  ;;  %v2819_v52 = vld [vmem:[%s5874_s0 + $0x18] sm:$0xff]  ;;  %721 = vmatpush.bf16.msrb.mxu2 %v2983_v49 }
  0xbd   :  { %v248_v56 = vsel %vm247_vm6, %v3994_v41, %v244_v53  ;;  %v2987_v53 = vor.u32 %v3797_v47, %v2984_v50 }
  0xbe   :  { %v253_v58 = vsel %vm250_vm7, %v252_v55, %v248_v56  ;;  %v268_v0 = vsel %vm267_vm10, %v3996_v42, %v264_v59  ;;  %v2970_v56 = vld [vmem:[%s5876_s2 + $0x48] sm:$0xf] }
  0xbf   :  { %v276_v60 = vmul.f32 %v275_v54, %v253_v58  ;;  %v273_v2 = vsel %vm270_vm11, %v272_v1, %v268_v0  ;;  %v3799_v54 = vld [vmem:[%s5876_s2 + $0x70] sm:$0xf0]  ;;  %v3794_v58 = vld [vmem:[%s5876_s2 + $0x4c] sm:$0xf]  ;;  %734 = vmatpush.bf16.msrb.mxu3 %v2987_v53  ;;  %v1068_v53 = vsel %vm1067_vm15, 1, %v4148_v44 }
  0xc0   :  { %v279_v3 = vsub.f32 1.0, %v273_v2  ;;  %v281_v7 = vmul.f32 0.0, %v273_v2  ;;  %v2991_v55 = vor.u32 %v3799_v54, %v2990_v51  ;;  %v2975_v1 = vor.u32 %v3794_v58, %v2972_v61  ;;  %v2821_v61 = vld [vmem:[%s5874_s0 + $0x28] sm:$0xff] }
  0xc1   :  { %v277_v63 = vadd.f32 %v276_v60, %v35_v57  ;;  %v3795_v57 = vld [vmem:[%s5876_s2 + $0x50] sm:$0xf0] }
  0xc2   :  { %v2971_v60 = vor.u32 %v3795_v57, %v2970_v56  ;;  %747 = vmatpush.bf16.msra.mxu0 %v2991_v55  ;;  %1070 = vperm.xlu1 %3984, %v1068_v53   ;;  %v2930_v53 = vld [vmem:[%s5874_s0 + $0x38] sm:$0xff] }
  0xc3   :  { %3997 = vtanh.f32 %v277_v63  ;;  %v3796_v63 = vld [vmem:[%s5876_s2 + $0x58] sm:$0xf0]  ;;  %735 = vmatpush.bf16.msrb.mxu3 %v2975_v1  ;;  %v2116_v1 = vsel %vm2115_vm5, 1, %v4148_v44 }
  0xc4   :  { %v2979_v2 = vor.u32 %v3796_v63, %v2978_v62  ;;  %722 = vmatpush.bf16.msrb.mxu2 %v2971_v60 }
  0xc6   :  { %748 = vmatpush.bf16.msra.mxu0 %v2979_v2 }
  0xc9   :  { %v3998_v4 = vpop.eup %3997 }
  0xca   :  { %v280_v6 = vmul.f32 %v3998_v4, %v279_v3  ;;  %v2958_v3 = vld [vmem:[%s5876_s2 + $0x30] sm:$0xf]  ;;  %v3792_v4 = vld [vmem:[%s5876_s2 + $0x38] sm:$0xf0]  ;;  %2118 = vperm.xlu1 %3984, %v2116_v1  }
  0xcb   :  { %v2959_v13 = vor.u32 %v3792_v4, %v2958_v3  ;;  %v3820_v1 = vld [vmem:[%s5876_s2 + $0x58] sm:$0xf0] }
  0xcc   :  { %v282_v8 = vadd.f32 %v281_v7, %v280_v6  ;;  %v2960_v7 = vld [vmem:[%s5876_s2 + $0x3c] sm:$0xf0] }
  0xcd   :  { %v2963_v14 = vor.u32 %v3791_v5, %v2960_v7  ;;  %723 = vmatpush.bf16.msrb.mxu2 %v2959_v13 }
  0xce   :  { %v4516_v9 = vsel %vm288_vm12, %v282_v8, 0.0  ;;  %v2919_v10 = vpack.c.bf16 %v282_v8, %v282_v8  ;;  %v2966_v8 = vld [vmem:[%s5876_s2 + $0x38] sm:$0xf] }
  0xcf   :  { %290 = vst [vmem:[#allocation2] sm:$0xff] %v4516_v9  ;;  %736 = vmatpush.bf16.msrb.mxu3 %v2963_v14  ;;  %v3119_v14 = vld [vmem:[%s5876_s2 + $0xa8] sm:$0xf] }
  0xd0   :  { %2920 = vmatmul.msk.bf16.vlgmr.msra.gmra.mxu3 %vm2918_vm13, %v2919_v10  ;;  %2923 = vmatmul.msk.bf16.vlgmr.msrb.gmra.mxu0 %vm2918_vm13, %v2919_v10  ;;  %v3120_v16 = vor.u32 %v3831_v15, %v3119_v14  ;;  %v3817_v14 = vld [vmem:[%s5876_s2 + $0x40] sm:$0xf0] }
  0xd1   :  { %2926 = vmatmul.msk.bf16.vlgmr.msrb.gmra.mxu1 %vm2918_vm13, %v2919_v10  ;;  %v3793_v10 = vld [vmem:[%s5876_s2 + $0x40] sm:$0xf0]  ;;  %724 = vmatpush.bf16.msrb.mxu2 %v2947_v24  ;;  %v3827_v24 = vld [vmem:[%s5876_s2 + $0x94] sm:$0xf] }
  0xd2   :  { %v2967_v18 = vor.u32 %v3793_v10, %v2966_v8  ;;  %v547_v8 = vpop.permute.xlu0 %546  ;;  %980 = vmatpush.bf16.msra.mxu1 %v3120_v16 }
  0xd3   :  { %737 = vmatpush.bf16.msrb.mxu3 %v2951_v26  ;;  %vm548_vm9 = vcmp.eq.s32.totalorder %v547_v8, 1  ;;  %v3109_v26 = vld [vmem:[%s5876_s2 + $0x9c] sm:$0xf0]  ;;  %v3815_v8 = vld [vmem:[%s5876_s2 + $0x34] sm:$0xf] }
  0xd4   :  { %749 = vmatpush.bf16.msra.mxu0 %v2967_v18  ;;  %v3127_v18 = vld [vmem:[%s5876_s2 + $0xb0] sm:$0xf] }
  0xd5   :  { %725 = vmatpush.bf16.msrb.mxu2 %v2935_v35  ;;  %v3097_v35 = vld [vmem:[%s5876_s2 + $0x84] sm:$0xf0] }
 0x14d   :  { %v478_v37 = vpop.f32.mrf.mxu0 }
 0x14e   :  { %v515_v41 = vadd.f32 %v2820_v29, %v478_v37  ;;  %v4576_v42 = vpop.f32.mrf.mxu1  ;;  %v2955_v29 = vor.u32 %v3790_v23, %v2954_v22  ;;  %v2939_v37 = vor.u32 %v3785_v30, %v2936_v31  ;;  %v3107_v22 = vld [vmem:[%s5876_s2 + $0x90] sm:$0xf]  ;;  %v3828_v23 = vld [vmem:[%s5876_s2 + $0x98] sm:$0xf0]  ;;  %v3116_v30 = vor.u32 %v3829_v28, %v3115_v27  ;;  %v3095_v31 = vld [vmem:[%s5876_s2 + $0x78] sm:$0xf] }
 0x14f   :  { %v535_v57 = vadd.f32 %v4510_v46, %v4576_v42 }
 0x150   :  { %v2928_v48 = vmul.f32 -1.442695, %v515_v41  ;;  %750 = vmatpush.bf16.msra.mxu0 %v2955_v29  ;;  %738 = vmatpush.bf16.msrb.mxu3 %v2939_v37  ;;  %v3112_v29 = vor.u32 %v3827_v24, %v3109_v26  ;;  %v3826_v37 = vld [vmem:[%s5876_s2 + $0x88] sm:$0xf0] }
 0x151   :  { %v3814_v24 = vld [vmem:[%s5876_s2 + $0x28] sm:$0xf0] }
 0x152   :  { %3999 = vpow2.f32 %v2928_v48 }
 0x153   :  { %v465_v59 = vpop.f32.mrf.mxu3 }
 0x154   :  { %v495_v0 = vadd.f32 %v2819_v52, %v465_v59  ;;  %751 = vmatpush.bf16.msra.mxu0 %v2943_v38  ;;  %v3100_v38 = vor.u32 %v3824_v33, %v3097_v35  ;;  %v3037_v35 = vld [vmem:[%s5876_s2 + $0xc] sm:$0xf0] }
 0x155   :  { %v480_v6 = vpop.f32.mrf.mxu0 }
 0x156   :  { %v2927_v11 = vmul.f32 -1.442695, %v495_v0  ;;  %v493_v12 = vpop.f32.mrf.mxu1 }
 0x158   :  { %v4000_v17 = vpop.eup %3999  ;;  %4001 = vpow2.f32 %v2927_v11 }
 0x159   :  { %v4647_v21 = vadd.f32 1.0, %v4000_v17  ;;  %v3121_v17 = vld [vmem:[%s5876_s2 + $0xb4] sm:$0xf0] }
 0x15b   :  { %v467_v25 = vpop.f32.mrf.mxu3  ;;  %4003 = vrcp.f32 %v4647_v21  ;;  %v531_v62 = vand.u32 2147483648, %v4647_v21  ;;  %vm525_vm6 = vweird.f32 %v4647_v21  ;;  %v529_v0 = vand.u32 2147483647, %v4647_v21 }
 0x15c   :  { %v3108_v25 = vor.u32 %v3828_v23, %v3107_v22  ;;  %v3049_v22 = vld [vmem:[%s5876_s2 + $0x24] sm:$0xf0]  ;;  %v3055_v23 = vld [vmem:[%s5876_s2 + $0x20] sm:$0xf] }
 0x15d   :  { %v532_v3 = vor.u32 1.1754944e-38, %v531_v62  ;;  %vm530_vm8 = vcmp.eq.f32.partialorder %v529_v0, 8.507059e+37  ;;  %v3073_v0 = vld [vmem:[%s5876_s2 + $0x54] sm:$0xf0]  ;;  %v3056_v26 = vor.u32 %v3814_v24, %v3055_v23  ;;  %v3210_v23 = vld [vmem:[%s5876_s2 + $0x9c] sm:$0xf0] }
 0x15e   :  { %v4002_v34 = vpop.eup %4001  ;;  %981 = vmatpush.bf16.msra.mxu1 %v3108_v25  ;;  %v3216_v24 = vld [vmem:[%s5876_s2 + $0x98] sm:$0xf] }
 0x15f   :  { %v499_v36 = vadd.f32 1.0, %v4002_v34  ;;  %v3096_v34 = vor.u32 %v3825_v32, %v3095_v31  ;;  %v3810_v31 = vld [vmem:[%s5876_s2 + $0x8] sm:$0xf0] }
 0x161   :  { %4005 = vrcp.f32 %v499_v36  ;;  %v4004_v40 = vpop.eup %4003  ;;  %v511_v50 = vand.u32 2147483648, %v499_v36  ;;  %v509_v52 = vand.u32 2147483647, %v499_v36  ;;  %vm505_vm1 = vweird.f32 %v499_v36 }
 0x162   :  { %v521_v41 = vmul.f32 %v4004_v40, %v4647_v21  ;;  %vm526_vm4 = vweird.f32 %v4004_v40  ;;  %v3128_v21 = vor.u32 %v3832_v19, %v3127_v18  ;;  %982 = vmatpush.bf16.msra.mxu1 %v3096_v34  ;;  %v3047_v18 = vld [vmem:[%s5876_s2 + $0x18] sm:$0xf]  ;;  %v3813_v19 = vld [vmem:[%s5876_s2 + $0x20] sm:$0xf0] }
 0x163   :  { %v512_v56 = vor.u32 1.1754944e-38, %v511_v50  ;;  %vm510_vm3 = vcmp.eq.f32.partialorder %v509_v52, 8.507059e+37  ;;  %vm527_vm7 = vmor %vm525_vm6, %vm526_vm4  ;;  %v3091_v50 = vld [vmem:[%s5876_s2 + $0x68] sm:$0xf]  ;;  %v2929_v52 = vld [vmem:[%s5874_s0 + $0x30] sm:$0xff] }
 0x164   :  { %v522_v48 = vsub.f32 1.0, %v521_v41  ;;  %1006 = vmatpush.bf16.msra.mxu3 %v3128_v21  ;;  %v3048_v21 = vor.u32 %v3813_v19, %v3047_v18  ;;  %v3809_v34 = vld [vmem:[%s5876_s2 + $0x4] sm:$0xf]  ;;  %v3208_v19 = vld [vmem:[%s5876_s2 + $0x90] sm:$0xf] }
 0x166   :  { %v523_v54 = vmul.f32 %v4004_v40, %v522_v48 }
 0x167   :  { %v4006_v45 = vpop.eup %4005 }
 0x168   :  { %v501_v47 = vmul.f32 %v4006_v45, %v499_v36  ;;  %vm506_vm0 = vweird.f32 %v4006_v45  ;;  %v524_v59 = vadd.f32 %v4004_v40, %v523_v54  ;;  %1007 = vmatpush.bf16.msra.mxu3 %v3116_v30  ;;  %v3103_v36 = vld [vmem:[%s5876_s2 + $0x80] sm:$0xf] }
 0x169   :  { %vm507_vm2 = vmor %vm505_vm1, %vm506_vm0  ;;  %v3035_v30 = vld [vmem:[%s5876_s2] sm:$0xf] }
 0x16a   :  { %v502_v49 = vsub.f32 1.0, %v501_v47  ;;  %v528_v2 = vsel %vm527_vm7, %v4004_v40, %v524_v59  ;;  %v3104_v40 = vor.u32 %v3826_v37, %v3103_v36  ;;  %v3821_v47 = vld [vmem:[%s5876_s2 + $0x64] sm:$0xf]  ;;  %v3819_v59 = vld [vmem:[%s5876_s2 + $0x50] sm:$0xf0]  ;;  %v3036_v33 = vor.u32 %v3810_v31, %v3035_v30 }
 0x16b   :  { %v533_v4 = vsel %vm530_vm8, %v532_v3, %v528_v2  ;;  %v3043_v36 = vld [vmem:[%s5876_s2 + $0x8] sm:$0xf]  ;;  %v3811_v37 = vld [vmem:[%s5876_s2 + $0x10] sm:$0xf0]  ;;  %v3848_v30 = vld [vmem:[%s5876_s2 + $0x7c] sm:$0xf] }
 0x16c   :  { %v503_v51 = vmul.f32 %v4006_v45, %v502_v49  ;;  %v539_v5 = vsub.f32 1.0, %v533_v4  ;;  %v541_v7 = vmul.f32 %v533_v4, %v4516_v9  ;;  %1008 = vmatpush.bf16.msra.mxu3 %v3104_v40  ;;  %v3085_v49 = vld [vmem:[%s5876_s2 + $0x6c] sm:$0xf0]  ;;  %v3044_v40 = vor.u32 %v3811_v37, %v3043_v36  ;;  %v3184_v37 = vld [vmem:[%s5876_s2 + $0x60] sm:$0xf] }
 0x16d   :  { %v3088_v54 = vor.u32 %v3821_v47, %v3085_v49 }
 0x16e   :  { %v504_v55 = vadd.f32 %v4006_v45, %v503_v51  ;;  %v3823_v51 = vld [vmem:[%s5876_s2 + $0x70] sm:$0xf0] }
 0x170   :  { %v508_v58 = vsel %vm507_vm2, %v4006_v45, %v504_v55  ;;  %v3822_v45 = vld [vmem:[%s5876_s2 + $0x68] sm:$0xf0]  ;;  %v3092_v55 = vor.u32 %v3823_v51, %v3091_v50 }
 0x171   :  { %v513_v60 = vsel %vm510_vm3, %v512_v56, %v508_v58  ;;  %v3084_v48 = vor.u32 %v3822_v45, %v3083_v43  ;;  %v3071_v58 = vld [vmem:[%s5876_s2 + $0x48] sm:$0xf] }
 0x172   :  { %v536_v63 = vmul.f32 %v535_v57, %v513_v60  ;;  %1009 = vmatpush.bf16.msra.mxu3 %v3092_v55  ;;  %v3818_v60 = vld [vmem:[%s5876_s2 + $0x4c] sm:$0xf] }
 0x173   :  { %983 = vmatpush.bf16.msra.mxu1 %v3084_v48  ;;  %v3076_v2 = vor.u32 %v3818_v60, %v3073_v0 }
 0x174   :  { %v537_v42 = vadd.f32 %v2821_v61, %v536_v63  ;;  %v3072_v63 = vor.u32 %v3819_v59, %v3071_v58  ;;  %v2931_v59 = vld [vmem:[%s5874_s0 + $0x40] sm:$0xff] }
 0x176   :  { %4007 = vtanh.f32 %v537_v42  ;;  %v3079_v42 = vld [vmem:[%s5876_s2 + $0x50] sm:$0xf] }
 0x177   :  { %v3080_v3 = vor.u32 %v3820_v1, %v3079_v42  ;;  %984 = vmatpush.bf16.msra.mxu1 %v3072_v63 }
 0x179   :  { %1010 = vmatpush.bf16.msra.mxu3 %v3080_v3 }
 0x17c   :  { %v4008_v6 = vpop.eup %4007 }
 0x17d   :  { %v540_v39 = vmul.f32 %v4008_v6, %v539_v5 }
 0x17f   :  { %v542_v10 = vadd.f32 %v541_v7, %v540_v39  ;;  %v3059_v39 = vld [vmem:[%s5876_s2 + $0x30] sm:$0xf]  ;;  %v3816_v7 = vld [vmem:[%s5876_s2 + $0x38] sm:$0xf0] }
 0x181   :  { %v4691_v11 = vsel %vm548_vm9, %v542_v10, %v4516_v9  ;;  %v550_v12 = vsel %vm548_vm9, %v542_v10, 0.0  ;;  %v3830_v9 = vld [vmem:[%s5876_s2 + $0xac] sm:$0xf]  ;;  %v3060_v10 = vor.u32 %v3816_v7, %v3059_v39 }
 0x182   :  { %552 = vst [vmem:[#allocation2 + $0x8] sm:$0xff] %v550_v12  ;;  %v557_v13 = vpack.c.bf16 %v4691_v11, %v4691_v11  ;;  %v3124_v20 = vor.u32 %v3830_v9, %v3121_v17  ;;  %v3061_v12 = vld [vmem:[%s5876_s2 + $0x3c] sm:$0xf0] }
 0x183   :  { %v3064_v15 = vor.u32 %v3815_v8, %v3061_v12  ;;  %985 = vmatpush.bf16.msra.mxu1 %v3060_v10  ;;  %v3220_v12 = vld [vmem:[%s5876_s2 + $0xa8] sm:$0xf] }
 0x184   :  { %726 = vmatmul.bf16.vlgmr.msrb.gmra.mxu2 %v557_v13  ;;  %739 = vmatmul.bf16.vlgmr.msrb.gmra.mxu3 %v557_v13 }
 0x185   :  { %752 = vmatmul.bf16.vlgmr.msra.gmra.mxu0 %v557_v13  ;;  %993 = vmatpush.bf16.msra.mxu2 %v3124_v20  ;;  %v3067_v13 = vld [vmem:[%s5876_s2 + $0x38] sm:$0xf]  ;;  %v3812_v20 = vld [vmem:[%s5876_s2 + $0x1c] sm:$0xf] }
 0x186   :  { %v3068_v9 = vor.u32 %v3817_v14, %v3067_v13  ;;  %v3052_v25 = vor.u32 %v3812_v20, %v3049_v22  ;;  %v3855_v13 = vld [vmem:[%s5876_s2 + $0xb0] sm:$0xf0]  ;;  %v3852_v20 = vld [vmem:[%s5876_s2 + $0x98] sm:$0xf0] }
 0x187   :  { %986 = vmatpush.bf16.msra.mxu1 %v3048_v21  ;;  %v3221_v14 = vor.u32 %v3855_v13, %v3220_v12  ;;  %v3851_v21 = vld [vmem:[%s5876_s2 + $0x94] sm:$0xf]  ;;  %v3209_v22 = vor.u32 %v3852_v20, %v3208_v19  ;;  %v3148_v13 = vld [vmem:[%s5876_s2 + $0x18] sm:$0xf]  ;;  %v3838_v19 = vld [vmem:[%s5876_s2 + $0x28] sm:$0xf0] }
 0x188   :  { %1011 = vmatpush.bf16.msra.mxu3 %v3068_v9  ;;  %v3228_v9 = vld [vmem:[%s5876_s2 + $0xb0] sm:$0xf] }
 0x189   :  { %994 = vmatpush.bf16.msra.mxu2 %v3112_v29  ;;  %1242 = vmatpush.bf16.msrb.mxu0 %v3221_v14  ;;  %v3836_v14 = vld [vmem:[%s5876_s2 + $0x1c] sm:$0xf] }
 0x18b   :  { %987 = vmatpush.bf16.msra.mxu1 %v3036_v33  ;;  %v3204_v33 = vld [vmem:[%s5876_s2 + $0x80] sm:$0xf] }
 0x18c   :  { %1012 = vmatpush.bf16.msra.mxu3 %v3056_v26  ;;  %v3213_v26 = vor.u32 %v3851_v21, %v3210_v23  ;;  %v3136_v23 = vld [vmem:[%s5876_s2] sm:$0xf] }
 0x18d   :  { %995 = vmatpush.bf16.msra.mxu2 %v3100_v38  ;;  %v3040_v38 = vor.u32 %v3809_v34, %v3037_v35  ;;  %1243 = vmatpush.bf16.msrb.mxu0 %v3209_v22  ;;  %v3850_v34 = vld [vmem:[%s5876_s2 + $0x88] sm:$0xf0] }
 0x18e   :  { %v3205_v36 = vor.u32 %v3850_v34, %v3204_v33 }
 0x190   :  { %1013 = vmatpush.bf16.msra.mxu3 %v3044_v40  ;;  %v3845_v40 = vld [vmem:[%s5876_s2 + $0x64] sm:$0xf] }
 0x191   :  { %996 = vmatpush.bf16.msra.mxu2 %v3088_v54 }
 0x195   :  { %997 = vmatpush.bf16.msra.mxu2 %v3076_v2 }
 0x199   :  { %998 = vmatpush.bf16.msra.mxu2 %v3064_v15  ;;  %v3222_v15 = vld [vmem:[%s5876_s2 + $0xb4] sm:$0xf0] }
 0x19d   :  { %999 = vmatpush.bf16.msra.mxu2 %v3052_v25  ;;  %v3853_v25 = vld [vmem:[%s5876_s2 + $0xa0] sm:$0xf0] }
 0x1a1   :  { %1000 = vmatpush.bf16.msra.mxu2 %v3040_v38  ;;  %v3846_v38 = vld [vmem:[%s5876_s2 + $0x68] sm:$0xf0] }
 0x202   :  { %v4749_v41 = vpop.f32.mrf.mxu0 }
 0x207   :  { %v727_v56 = vpop.f32.mrf.mxu2  ;;  %v740_v57 = vpop.f32.mrf.mxu3 }
 0x208   :  { %v757_v61 = vadd.f32 %v2929_v52, %v727_v56  ;;  %v777_v62 = vadd.f32 %v2930_v53, %v740_v57  ;;  %v797_v57 = vadd.f32 %v4510_v46, %v4749_v41 }
 0x20a   :  { %v3028_v4 = vmul.f32 -1.442695, %v757_v61  ;;  %v3029_v5 = vmul.f32 -1.442695, %v777_v62  ;;  %v755_v6 = vpop.f32.mrf.mxu0 }
 0x20c   :  { %4009 = vpow2.f32 %v3028_v4  ;;  %v809_v4 = vpop.permute.xlu1 %808 }
 0x20d   :  { %4011 = vpow2.f32 %v3029_v5  ;;  %vm810_vm2 = vcmp.eq.s32.totalorder %v809_v4, 1  ;;  %v3841_v4 = vld [vmem:[%s5876_s2 + $0x40] sm:$0xf0] }
 0x20f   :  { %v729_v16 = vpop.f32.mrf.mxu2  ;;  %v742_v17 = vpop.f32.mrf.mxu3 }
 0x210   :  { %v3856_v16 = vld [vmem:[%s5876_s2 + $0xb8] sm:$0xf0] }
 0x211   :  { %v3229_v18 = vor.u32 %v3856_v16, %v3228_v9  ;;  %v3150_v16 = vld [vmem:[%s5876_s2 + $0x24] sm:$0xf0] }
 0x212   :  { %v4010_v27 = vpop.eup %4009 }
 0x213   :  { %v4012_v28 = vpop.eup %4011  ;;  %v761_v29 = vadd.f32 1.0, %v4010_v27  ;;  %1268 = vmatpush.bf16.msrb.mxu2 %v3229_v18  ;;  %v3217_v27 = vor.u32 %v3853_v25, %v3216_v24  ;;  %v3153_v18 = vor.u32 %v3836_v14, %v3150_v16  ;;  %v3834_v24 = vld [vmem:[%s5876_s2 + $0x8] sm:$0xf0]  ;;  %v3880_v16 = vld [vmem:[%s5876_s2 + $0xb8] sm:$0xf0] }
 0x214   :  { %v781_v32 = vadd.f32 1.0, %v4012_v28  ;;  %v3196_v28 = vld [vmem:[%s5876_s2 + $0x78] sm:$0xf]  ;;  %v3137_v25 = vor.u32 %v3834_v24, %v3136_v23  ;;  %v3311_v23 = vld [vmem:[%s5876_s2 + $0x9c] sm:$0xf0] }
 0x215   :  { %4013 = vrcp.f32 %v761_v29  ;;  %v773_v50 = vand.u32 2147483648, %v761_v29  ;;  %v771_v53 = vand.u32 2147483647, %v761_v29  ;;  %vm767_vm11 = vweird.f32 %v761_v29  ;;  %v3317_v24 = vld [vmem:[%s5876_s2 + $0x98] sm:$0xf] }
 0x216   :  { %4015 = vrcp.f32 %v781_v32  ;;  %v793_v62 = vand.u32 2147483648, %v781_v32  ;;  %vm787_vm15 = vweird.f32 %v781_v32  ;;  %v791_v0 = vand.u32 2147483647, %v781_v32 }
 0x217   :  { %v774_v56 = vor.u32 1.1754944e-38, %v773_v50  ;;  %vm772_vm13 = vcmp.eq.f32.partialorder %v771_v53, 8.507059e+37  ;;  %1269 = vmatpush.bf16.msrb.mxu2 %v3217_v27  ;;  %v3172_v53 = vld [vmem:[%s5876_s2 + $0x48] sm:$0xf]  ;;  %v3138_v27 = vld [vmem:[%s5876_s2 + $0xc] sm:$0xf0] }
 0x218   :  { %v794_v2 = vor.u32 1.1754944e-38, %v793_v62  ;;  %vm792_vm1 = vcmp.eq.f32.partialorder %v791_v0, 8.507059e+37 }
 0x21b   :  { %v4014_v43 = vpop.eup %4013  ;;  %1270 = vmatpush.bf16.msrb.mxu2 %v3205_v36  ;;  %v4093_v36 = vld [vmem:[%s5875_s1] sm:$0xff] }
 0x21c   :  { %v4016_v45 = vpop.eup %4015  ;;  %v763_v47 = vmul.f32 %v4014_v43, %v761_v29  ;;  %vm768_vm10 = vweird.f32 %v4014_v43  ;;  %v3849_v29 = vld [vmem:[%s5876_s2 + $0x80] sm:$0xf0]  ;;  %vm1329_vm3 = vcmp.gt.s32.totalorder %v4093_v36, 4  ;;  %vm1591_vm4 = vcmp.gt.s32.totalorder %v4093_v36, 5 }
 0x21d   :  { %v783_v48 = vmul.f32 %v4016_v45, %v781_v32  ;;  %vm769_vm12 = vmor %vm767_vm11, %vm768_vm10  ;;  %vm788_vm14 = vweird.f32 %v4016_v45  ;;  %v3197_v31 = vor.u32 %v3849_v29, %v3196_v28  ;;  %v3198_v32 = vld [vmem:[%s5876_s2 + $0x84] sm:$0xf0]  ;;  %vm2377_vm9 = vcmp.gt.s32.totalorder %v4093_v36, 8 }
 0x21e   :  { %v764_v49 = vsub.f32 1.0, %v763_v47  ;;  %vm789_vm0 = vmor %vm787_vm15, %vm788_vm14  ;;  %v3201_v35 = vor.u32 %v3848_v30, %v3198_v32  ;;  %v3192_v47 = vld [vmem:[%s5876_s2 + $0x68] sm:$0xf]  ;;  %v3835_v30 = vld [vmem:[%s5876_s2 + $0x10] sm:$0xf0] }
 0x21f   :  { %v784_v51 = vsub.f32 1.0, %v783_v48  ;;  %1244 = vmatpush.bf16.msrb.mxu0 %v3197_v31  ;;  %v3847_v48 = vld [vmem:[%s5876_s2 + $0x70] sm:$0xf0]  ;;  %v3144_v28 = vld [vmem:[%s5876_s2 + $0x8] sm:$0xf] }
 0x220   :  { %v765_v52 = vmul.f32 %v4014_v43, %v764_v49  ;;  %v3030_v49 = vld [vmem:[%s5874_s0 + $0x48] sm:$0xff]  ;;  %v3145_v33 = vor.u32 %v3835_v30, %v3144_v28  ;;  %v3297_v28 = vld [vmem:[%s5876_s2 + $0x78] sm:$0xf] }
 0x221   :  { %v785_v54 = vmul.f32 %v4016_v45, %v784_v51  ;;  %v3193_v51 = vor.u32 %v3847_v48, %v3192_v47 }
 0x222   :  { %v766_v55 = vadd.f32 %v4014_v43, %v765_v52 }
 0x223   :  { %v786_v61 = vadd.f32 %v4016_v45, %v785_v54  ;;  %1271 = vmatpush.bf16.msrb.mxu2 %v3193_v51  ;;  %v3843_v54 = vld [vmem:[%s5876_s2 + $0x50] sm:$0xf0] }
 0x224   :  { %v770_v58 = vsel %vm769_vm12, %v4014_v43, %v766_v55  ;;  %v3185_v43 = vor.u32 %v3846_v38, %v3184_v37  ;;  %v3842_v55 = vld [vmem:[%s5876_s2 + $0x4c] sm:$0xf]  ;;  %v1330_v37 = vsel %vm1329_vm3, 1, %v4148_v44 }
 0x225   :  { %v775_v60 = vsel %vm772_vm13, %v774_v56, %v770_v58  ;;  %v790_v1 = vsel %vm789_vm0, %v4016_v45, %v786_v61  ;;  %v3186_v45 = vld [vmem:[%s5876_s2 + $0x6c] sm:$0xf0]  ;;  %v3174_v58 = vld [vmem:[%s5876_s2 + $0x54] sm:$0xf0]  ;;  %v3844_v61 = vld [vmem:[%s5876_s2 + $0x58] sm:$0xf0]  ;;  %1332 = vperm.xlu2 %3985, %v1330_v37  }
 0x226   :  { %v798_v63 = vmul.f32 %v797_v57, %v775_v60  ;;  %v795_v46 = vsel %vm792_vm1, %v794_v2, %v790_v1  ;;  %v3189_v50 = vor.u32 %v3845_v40, %v3186_v45  ;;  %1245 = vmatpush.bf16.msrb.mxu0 %v3185_v43  ;;  %v3173_v57 = vor.u32 %v3843_v54, %v3172_v53  ;;  %v3840_v1 = vld [vmem:[%s5876_s2 + $0x38] sm:$0xf0]  ;;  %v3839_v2 = vld [vmem:[%s5876_s2 + $0x34] sm:$0xf]  ;;  %v3285_v37 = vld [vmem:[%s5876_s2 + $0x60] sm:$0xf] }
 0x227   :  { %v801_v41 = vsub.f32 1.0, %v795_v46  ;;  %v803_v6 = vmul.f32 %v795_v46, %v4691_v11  ;;  %v3177_v60 = vor.u32 %v3842_v55, %v3174_v58  ;;  %v3032_v58 = vld [vmem:[%s5874_s0 + $0x58] sm:$0xff] }
 0x228   :  { %v799_v42 = vadd.f32 %v2931_v59, %v798_v63  ;;  %v3180_v59 = vld [vmem:[%s5876_s2 + $0x50] sm:$0xf] }
 0x229   :  { %v3031_v63 = vld [vmem:[%s5874_s0 + $0x50] sm:$0xff]  ;;  %v3181_v0 = vor.u32 %v3844_v61, %v3180_v59 }
 0x22a   :  { %4017 = vtanh.f32 %v799_v42  ;;  %1246 = vmatpush.bf16.msrb.mxu0 %v3173_v57  ;;  %v3160_v42 = vld [vmem:[%s5876_s2 + $0x30] sm:$0xf] }
 0x22b   :  { %1272 = vmatpush.bf16.msrb.mxu2 %v3181_v0  ;;  %v3161_v46 = vor.u32 %v3840_v1, %v3160_v42  ;;  %v2378_v1 = vsel %vm2377_vm9, 1, %v4148_v44 }
 0x22e   :  { %1247 = vmatpush.bf16.msrb.mxu0 %v3161_v46 }
 0x230   :  { %v4018_v3 = vpop.eup %4017 }
 0x231   :  { %v802_v5 = vmul.f32 %v4018_v3, %v801_v41  ;;  %v3162_v41 = vld [vmem:[%s5876_s2 + $0x3c] sm:$0xf0]  ;;  %v3168_v3 = vld [vmem:[%s5876_s2 + $0x38] sm:$0xf] }
 0x233   :  { %v804_v39 = vadd.f32 %v803_v6, %v802_v5  ;;  %v3165_v6 = vor.u32 %v3839_v2, %v3162_v41 }
 0x235   :  { %v4854_v7 = vsel %vm810_vm2, %v804_v39, %v4691_v11  ;;  %v812_v8 = vsel %vm810_vm2, %v804_v39, 0.0  ;;  %v3854_v11 = vld [vmem:[%s5876_s2 + $0xac] sm:$0xf]  ;;  %v3169_v39 = vor.u32 %v3841_v4, %v3168_v3 }
 0x236   :  { %814 = vst [vmem:[#allocation2 + $0x10] sm:$0xff] %v812_v8  ;;  %v819_v10 = vpack.c.bf16 %v4854_v7, %v4854_v7  ;;  %v3225_v17 = vor.u32 %v3854_v11, %v3222_v15  ;;  %v3837_v11 = vld [vmem:[%s5876_s2 + $0x20] sm:$0xf0] }
 0x237   :  { %1273 = vmatpush.bf16.msrb.mxu2 %v3169_v39  ;;  %v3149_v9 = vor.u32 %v3837_v11, %v3148_v13  ;;  %v1071_v39 = vpop.permute.xlu1 %1070  ;;  %v3321_v13 = vld [vmem:[%s5876_s2 + $0xa8] sm:$0xf]  ;;  %v3879_v11 = vld [vmem:[%s5876_s2 + $0xb0] sm:$0xf0] }
 0x238   :  { %988 = vmatmul.bf16.vlgmr.msra.gmra.mxu1 %v819_v10  ;;  %1001 = vmatmul.bf16.vlgmr.msra.gmra.mxu2 %v819_v10  ;;  %vm1072_vm14 = vcmp.eq.s32.totalorder %v1071_v39, 1  ;;  %v3322_v14 = vor.u32 %v3879_v11, %v3321_v13  ;;  %v3269_v39 = vld [vmem:[%s5876_s2 + $0x38] sm:$0xf] }
 0x239   :  { %1014 = vmatmul.bf16.vlgmr.msra.gmra.mxu3 %v819_v10  ;;  %1255 = vmatpush.bf16.msrb.mxu1 %v3225_v17  ;;  %v3156_v17 = vld [vmem:[%s5876_s2 + $0x20] sm:$0xf] }
 0x23a   :  { %1248 = vmatpush.bf16.msrb.mxu0 %v3149_v9  ;;  %v3157_v21 = vor.u32 %v3838_v19, %v3156_v17  ;;  %v3329_v9 = vld [vmem:[%s5876_s2 + $0xb0] sm:$0xf]  ;;  %1504 = vmatpush.bf16.msrb.mxu3 %v3322_v14  ;;  %v3249_v14 = vld [vmem:[%s5876_s2 + $0x18] sm:$0xf] }
 0x23b   :  { %v3309_v19 = vld [vmem:[%s5876_s2 + $0x90] sm:$0xf] }
 0x23c   :  { %1274 = vmatpush.bf16.msrb.mxu2 %v3157_v21  ;;  %v3875_v21 = vld [vmem:[%s5876_s2 + $0x94] sm:$0xf] }
 0x23d   :  { %1256 = vmatpush.bf16.msrb.mxu1 %v3213_v26  ;;  %v3833_v26 = vld [vmem:[%s5876_s2 + $0x4] sm:$0xf] }
 0x23e   :  { %1249 = vmatpush.bf16.msrb.mxu0 %v3137_v25  ;;  %v3141_v32 = vor.u32 %v3833_v26, %v3138_v27  ;;  %v3877_v25 = vld [vmem:[%s5876_s2 + $0xa0] sm:$0xf0]  ;;  %v3314_v26 = vor.u32 %v3875_v21, %v3311_v23 }
 0x23f   :  { %v3318_v27 = vor.u32 %v3877_v25, %v3317_v24  ;;  %v3237_v25 = vld [vmem:[%s5876_s2] sm:$0xf] }
 0x240   :  { %1275 = vmatpush.bf16.msrb.mxu2 %v3145_v33  ;;  %v3305_v33 = vld [vmem:[%s5876_s2 + $0x80] sm:$0xf] }
 0x241   :  { %1257 = vmatpush.bf16.msrb.mxu1 %v3201_v35 }
 0x245   :  { %1258 = vmatpush.bf16.msrb.mxu1 %v3189_v50 }
 0x249   :  { %1259 = vmatpush.bf16.msrb.mxu1 %v3177_v60 }
 0x24d   :  { %1260 = vmatpush.bf16.msrb.mxu1 %v3165_v6 }
 0x251   :  { %1261 = vmatpush.bf16.msrb.mxu1 %v3153_v18  ;;  %v3330_v18 = vor.u32 %v3880_v16, %v3329_v9  ;;  %v3860_v9 = vld [vmem:[%s5876_s2 + $0x1c] sm:$0xf] }
 0x255   :  { %1262 = vmatpush.bf16.msrb.mxu1 %v3141_v32  ;;  %v3299_v32 = vld [vmem:[%s5876_s2 + $0x84] sm:$0xf0] }
 0x259   :  { %1530 = vmatpush.bf16.msra.mxu1 %v3330_v18  ;;  %v3257_v18 = vld [vmem:[%s5876_s2 + $0x20] sm:$0xf] }
 0x25d   :  { %1531 = vmatpush.bf16.msra.mxu1 %v3318_v27 }
 0x2b5   :  { %v989_v52 = vpop.f32.mrf.mxu1 }
 0x2b6   :  { %v1019_v56 = vadd.f32 %v3030_v49, %v989_v52  ;;  %v1592_v49 = vsel %vm1591_vm4, 1, %v4148_v44 }
 0x2b7   :  { %1594 = vperm.xlu2 %3985, %v1592_v49   ;;  %v3131_v49 = vld [vmem:[%s5874_s0 + $0x60] sm:$0xff] }
 0x2b8   :  { %v3129_v62 = vmul.f32 -1.442695, %v1019_v56  ;;  %v5018_v56 = vld [vmem:[%s5877_s3] ss:$0 sm:$0xff] }
 0x2ba   :  { %4019 = vpow2.f32 %v3129_v62 }
 0x2bb   :  { %v1002_v5 = vpop.f32.mrf.mxu2 }
 0x2bc   :  { %v1039_v8 = vadd.f32 %v3031_v63, %v1002_v5  ;;  %v4972_v10 = vpop.f32.mrf.mxu3 }
 0x2bd   :  { %v991_v12 = vpop.f32.mrf.mxu1  ;;  %v1059_v57 = vadd.f32 %v5018_v56, %v4972_v10 }
 0x2be   :  { %v3130_v15 = vmul.f32 -1.442695, %v1039_v8 }
 0x2bf   :  { %2380 = vperm.xlu2 %3985, %v2378_v1  }
 0x2c0   :  { %v4020_v20 = vpop.eup %4019  ;;  %4021 = vpow2.f32 %v3130_v15  ;;  %v3323_v15 = vld [vmem:[%s5876_s2 + $0xb4] sm:$0xf0] }
 0x2c1   :  { %v1023_v22 = vadd.f32 1.0, %v4020_v20  ;;  %v3876_v20 = vld [vmem:[%s5876_s2 + $0x98] sm:$0xf0] }
 0x2c3   :  { %4023 = vrcp.f32 %v1023_v22  ;;  %v1004_v29 = vpop.f32.mrf.mxu2  ;;  %v1035_v45 = vand.u32 2147483648, %v1023_v22  ;;  %v1033_v48 = vand.u32 2147483647, %v1023_v22  ;;  %vm1029_vm6 = vweird.f32 %v1023_v22 }
 0x2c4   :  { %v1017_v31 = vpop.f32.mrf.mxu3  ;;  %v3873_v29 = vld [vmem:[%s5876_s2 + $0x80] sm:$0xf0] }
 0x2c5   :  { %v1036_v53 = vor.u32 1.1754944e-38, %v1035_v45  ;;  %vm1034_vm8 = vcmp.eq.f32.partialorder %v1033_v48, 8.507059e+37  ;;  %v3298_v30 = vor.u32 %v3873_v29, %v3297_v28  ;;  %v3872_v31 = vld [vmem:[%s5876_s2 + $0x7c] sm:$0xf]  ;;  %v3287_v45 = vld [vmem:[%s5876_s2 + $0x6c] sm:$0xf0] }
 0x2c6   :  { %v4022_v34 = vpop.eup %4021  ;;  %v3871_v48 = vld [vmem:[%s5876_s2 + $0x70] sm:$0xf0]  ;;  %v3857_v29 = vld [vmem:[%s5876_s2 + $0x4] sm:$0xf] }
 0x2c7   :  { %v1043_v35 = vadd.f32 1.0, %v4022_v34  ;;  %v3302_v34 = vor.u32 %v3872_v31, %v3299_v32  ;;  %v3245_v31 = vld [vmem:[%s5876_s2 + $0x8] sm:$0xf] }
 0x2c9   :  { %v4024_v38 = vpop.eup %4023  ;;  %4025 = vrcp.f32 %v1043_v35  ;;  %v1055_v61 = vand.u32 2147483648, %v1043_v35  ;;  %v1053_v63 = vand.u32 2147483647, %v1043_v35  ;;  %vm1049_vm11 = vweird.f32 %v1043_v35 }
 0x2ca   :  { %v1025_v40 = vmul.f32 %v4024_v38, %v1023_v22  ;;  %vm1030_vm5 = vweird.f32 %v4024_v38  ;;  %v3310_v22 = vor.u32 %v3876_v20, %v3309_v19  ;;  %v3862_v19 = vld [vmem:[%s5876_s2 + $0x28] sm:$0xf0] }
 0x2cb   :  { %vm1031_vm7 = vmor %vm1029_vm6, %vm1030_vm5  ;;  %v1056_v2 = vor.u32 1.1754944e-38, %v1055_v61  ;;  %vm1054_vm13 = vcmp.eq.f32.partialorder %v1053_v63, 8.507059e+37  ;;  %v3281_v63 = vld [vmem:[%s5876_s2 + $0x50] sm:$0xf]  ;;  %v3258_v21 = vor.u32 %v3862_v19, %v3257_v18  ;;  %v3412_v19 = vld [vmem:[%s5876_s2 + $0x9c] sm:$0xf0] }
 0x2cc   :  { %v1026_v43 = vsub.f32 1.0, %v1025_v40  ;;  %1505 = vmatpush.bf16.msrb.mxu3 %v3310_v22  ;;  %v3869_v40 = vld [vmem:[%s5876_s2 + $0x64] sm:$0xf] }
 0x2ce   :  { %v1027_v47 = vmul.f32 %v4024_v38, %v1026_v43 }
 0x2cf   :  { %v4026_v50 = vpop.eup %4025 }
 0x2d0   :  { %v1045_v51 = vmul.f32 %v4026_v50, %v1043_v35  ;;  %v1028_v52 = vadd.f32 %v4024_v38, %v1027_v47  ;;  %vm1050_vm10 = vweird.f32 %v4026_v50  ;;  %v3874_v35 = vld [vmem:[%s5876_s2 + $0x88] sm:$0xf0]  ;;  %1506 = vmatpush.bf16.msrb.mxu3 %v3298_v30  ;;  %v3293_v47 = vld [vmem:[%s5876_s2 + $0x68] sm:$0xf]  ;;  %v3239_v30 = vld [vmem:[%s5876_s2 + $0xc] sm:$0xf0] }
 0x2d1   :  { %vm1051_vm12 = vmor %vm1049_vm11, %vm1050_vm10  ;;  %v3306_v36 = vor.u32 %v3874_v35, %v3305_v33  ;;  %v3859_v33 = vld [vmem:[%s5876_s2 + $0x10] sm:$0xf0] }
 0x2d2   :  { %v1046_v54 = vsub.f32 1.0, %v1045_v51  ;;  %v1032_v55 = vsel %vm1031_vm7, %v4024_v38, %v1028_v52  ;;  %v3870_v38 = vld [vmem:[%s5876_s2 + $0x68] sm:$0xf0]  ;;  %v3290_v51 = vor.u32 %v3869_v40, %v3287_v45  ;;  %v3294_v52 = vor.u32 %v3871_v48, %v3293_v47 }
 0x2d3   :  { %v1037_v59 = vsel %vm1034_vm8, %v1036_v53, %v1032_v55  ;;  %1532 = vmatpush.bf16.msra.mxu1 %v3306_v36  ;;  %v3286_v43 = vor.u32 %v3870_v38, %v3285_v37  ;;  %v3273_v55 = vld [vmem:[%s5876_s2 + $0x48] sm:$0xf]  ;;  %v3246_v35 = vor.u32 %v3859_v33, %v3245_v31  ;;  %v3898_v31 = vld [vmem:[%s5876_s2 + $0x88] sm:$0xf0] }
 0x2d4   :  { %v1047_v60 = vmul.f32 %v4026_v50, %v1046_v54  ;;  %v1060_v62 = vmul.f32 %v1059_v57, %v1037_v59  ;;  %v3867_v57 = vld [vmem:[%s5876_s2 + $0x50] sm:$0xf0] }
 0x2d5   :  { %1507 = vmatpush.bf16.msrb.mxu3 %v3286_v43  ;;  %v3274_v61 = vor.u32 %v3867_v57, %v3273_v55  ;;  %v3133_v55 = vld [vmem:[%s5874_s0 + $0x70] sm:$0xff] }
 0x2d6   :  { %v1048_v0 = vadd.f32 %v4026_v50, %v1047_v60  ;;  %v1061_v42 = vadd.f32 %v3032_v58, %v1060_v62  ;;  %v3866_v58 = vld [vmem:[%s5876_s2 + $0x4c] sm:$0xf]  ;;  %v3275_v62 = vld [vmem:[%s5876_s2 + $0x54] sm:$0xf0] }
 0x2d7   :  { %1533 = vmatpush.bf16.msra.mxu1 %v3294_v52 }
 0x2d8   :  { %v1052_v46 = vsel %vm1051_vm12, %v4026_v50, %v1048_v0  ;;  %4027 = vtanh.f32 %v1061_v42  ;;  %v3132_v50 = vld [vmem:[%s5874_s0 + $0x68] sm:$0xff]  ;;  %v3868_v0 = vld [vmem:[%s5876_s2 + $0x58] sm:$0xf0]  ;;  %v3278_v42 = vor.u32 %v3866_v58, %v3275_v62 }
 0x2d9   :  { %v1057_v41 = vsel %vm1054_vm13, %v1056_v2, %v1052_v46  ;;  %v3282_v1 = vor.u32 %v3868_v0, %v3281_v63  ;;  %1508 = vmatpush.bf16.msrb.mxu3 %v3274_v61 }
 0x2da   :  { %v1063_v3 = vsub.f32 1.0, %v1057_v41  ;;  %v1065_v6 = vmul.f32 %v1057_v41, %v4854_v7  ;;  %v3261_v41 = vld [vmem:[%s5876_s2 + $0x30] sm:$0xf] }
 0x2db   :  { %1534 = vmatpush.bf16.msra.mxu1 %v3282_v1 }
 0x2de   :  { %v4028_v4 = vpop.eup %4027 }
 0x2df   :  { %v1064_v5 = vmul.f32 %v4028_v4, %v1063_v3  ;;  %v3864_v3 = vld [vmem:[%s5876_s2 + $0x38] sm:$0xf0]  ;;  %v3863_v4 = vld [vmem:[%s5876_s2 + $0x34] sm:$0xf] }
 0x2e1   :  { %v1066_v8 = vadd.f32 %v1065_v6, %v1064_v5  ;;  %v3262_v5 = vor.u32 %v3864_v3, %v3261_v41  ;;  %v3263_v6 = vld [vmem:[%s5876_s2 + $0x3c] sm:$0xf0] }
 0x2e3   :  { %v1074_v10 = vsel %vm1072_vm14, %v1066_v8, 0.0  ;;  %v5028_v12 = vsel %vm1072_vm14, %v1066_v8, %v4854_v7  ;;  %v3878_v7 = vld [vmem:[%s5876_s2 + $0xac] sm:$0xf]  ;;  %v3865_v8 = vld [vmem:[%s5876_s2 + $0x40] sm:$0xf0]  ;;  %1509 = vmatpush.bf16.msrb.mxu3 %v3262_v5 }
 0x2e4   :  { %1076 = vst [vmem:[#allocation2 + $0x18] sm:$0xff] %v1074_v10  ;;  %v1081_v44 = vpack.c.bf16 %v5028_v12, %v5028_v12  ;;  %v3326_v17 = vor.u32 %v3878_v7, %v3323_v15  ;;  %v3266_v10 = vor.u32 %v3863_v4, %v3263_v6  ;;  %v3861_v15 = vld [vmem:[%s5876_s2 + $0x20] sm:$0xf0] }
 0x2e5   :  { %v3250_v16 = vor.u32 %v3861_v15, %v3249_v14 }
 0x2e6   :  { %1250 = vmatmul.bf16.vlgmr.msrb.gmra.mxu0 %v1081_v44  ;;  %1263 = vmatmul.bf16.vlgmr.msrb.gmra.mxu1 %v1081_v44 }
 0x2e7   :  { %1276 = vmatmul.bf16.vlgmr.msrb.gmra.mxu2 %v1081_v44  ;;  %1517 = vmatpush.bf16.msra.mxu0 %v3326_v17  ;;  %v3270_v44 = vor.u32 %v3865_v8, %v3269_v39  ;;  %v3251_v17 = vld [vmem:[%s5876_s2 + $0x24] sm:$0xf0] }
 0x2e8   :  { %v3254_v20 = vor.u32 %v3860_v9, %v3251_v17  ;;  %1510 = vmatpush.bf16.msrb.mxu3 %v3250_v16  ;;  %v3422_v8 = vld [vmem:[%s5876_s2 + $0xa8] sm:$0xf]  ;;  %v3410_v9 = vld [vmem:[%s5876_s2 + $0x90] sm:$0xf]  ;;  %v3900_v16 = vld [vmem:[%s5876_s2 + $0x98] sm:$0xf0] }
 0x2e9   :  { %1535 = vmatpush.bf16.msra.mxu1 %v3270_v44  ;;  %v3899_v17 = vld [vmem:[%s5876_s2 + $0x94] sm:$0xf]  ;;  %v3411_v18 = vor.u32 %v3900_v16, %v3410_v9  ;;  %v3358_v16 = vld [vmem:[%s5876_s2 + $0x20] sm:$0xf] }
 0x2eb   :  { %1518 = vmatpush.bf16.msra.mxu0 %v3314_v26  ;;  %v3858_v26 = vld [vmem:[%s5876_s2 + $0x8] sm:$0xf0] }
 0x2ec   :  { %v3238_v28 = vor.u32 %v3858_v26, %v3237_v25  ;;  %v3398_v25 = vld [vmem:[%s5876_s2 + $0x78] sm:$0xf]  ;;  %v3897_v26 = vld [vmem:[%s5876_s2 + $0x80] sm:$0xf0] }
 0x2ed   :  { %1536 = vmatpush.bf16.msra.mxu1 %v3258_v21  ;;  %v3901_v21 = vld [vmem:[%s5876_s2 + $0xa0] sm:$0xf0] }
 0x2ee   :  { %1511 = vmatpush.bf16.msrb.mxu3 %v3238_v28  ;;  %v3399_v28 = vor.u32 %v3897_v26, %v3398_v25  ;;  %v3346_v25 = vld [vmem:[%s5876_s2 + $0x8] sm:$0xf]  ;;  %v3883_v26 = vld [vmem:[%s5876_s2 + $0x10] sm:$0xf0] }
 0x2ef   :  { %1519 = vmatpush.bf16.msra.mxu0 %v3302_v34  ;;  %v3242_v34 = vor.u32 %v3857_v29, %v3239_v30  ;;  %v3400_v29 = vld [vmem:[%s5876_s2 + $0x84] sm:$0xf0]  ;;  %v3406_v30 = vld [vmem:[%s5876_s2 + $0x80] sm:$0xf] }
 0x2f1   :  { %1537 = vmatpush.bf16.msra.mxu1 %v3246_v35 }
 0x2f3   :  { %1520 = vmatpush.bf16.msra.mxu0 %v3290_v51 }
 0x2f7   :  { %1521 = vmatpush.bf16.msra.mxu0 %v3278_v42 }
 0x2fb   :  { %1522 = vmatpush.bf16.msra.mxu0 %v3266_v10  ;;  %v3903_v10 = vld [vmem:[%s5876_s2 + $0xb0] sm:$0xf0] }
 0x2fc   :  { %v3423_v44 = vor.u32 %v3903_v10, %v3422_v8 }
 0x2fe   :  { %1766 = vmatpush.bf16.msra.mxu2 %v3423_v44  ;;  %v3350_v44 = vld [vmem:[%s5876_s2 + $0x18] sm:$0xf] }
 0x2ff   :  { %1523 = vmatpush.bf16.msra.mxu0 %v3254_v20  ;;  %v3418_v20 = vld [vmem:[%s5876_s2 + $0x98] sm:$0xf] }
 0x302   :  { %1767 = vmatpush.bf16.msra.mxu2 %v3411_v18 }
 0x303   :  { %1524 = vmatpush.bf16.msra.mxu0 %v3242_v34  ;;  %v3407_v34 = vor.u32 %v3898_v31, %v3406_v30  ;;  %v3347_v31 = vor.u32 %v3883_v26, %v3346_v25  ;;  %v3507_v25 = vld [vmem:[%s5876_s2 + $0x80] sm:$0xf]  ;;  %v3922_v26 = vld [vmem:[%s5876_s2 + $0x88] sm:$0xf0] }
 0x306   :  { %1768 = vmatpush.bf16.msra.mxu2 %v3399_v28 }
 0x363   :  { %v1251_v53 = vpop.f32.mrf.mxu0  ;;  %v1264_v54 = vpop.f32.mrf.mxu1 }
 0x364   :  { %v1281_v59 = vadd.f32 %v3131_v49, %v1251_v53  ;;  %v1301_v60 = vadd.f32 %v3132_v50, %v1264_v54 }
 0x366   :  { %v3230_v2 = vmul.f32 -1.442695, %v1281_v59  ;;  %v3231_v46 = vmul.f32 -1.442695, %v1301_v60 }
 0x368   :  { %4029 = vpow2.f32 %v3230_v2 }
 0x369   :  { %4031 = vpow2.f32 %v3231_v46  ;;  %v1333_v46 = vpop.permute.xlu2 %1332 }
 0x36a   :  { %v1277_v13 = vpop.f32.mrf.mxu2  ;;  %vm1334_vm7 = vcmp.eq.s32.totalorder %v1333_v46, 1  ;;  %v3362_v46 = vld [vmem:[%s5876_s2 + $0x30] sm:$0xf] }
 0x36b   :  { %v1253_v11 = vpop.f32.mrf.mxu0  ;;  %v1266_v7 = vpop.f32.mrf.mxu1  ;;  %v1321_v54 = vadd.f32 %v5018_v56, %v1277_v13  ;;  %v3424_v13 = vld [vmem:[%s5876_s2 + $0xb4] sm:$0xf0] }
 0x36c   :  { %v3430_v11 = vld [vmem:[%s5876_s2 + $0xb0] sm:$0xf]  ;;  %v3904_v7 = vld [vmem:[%s5876_s2 + $0xb8] sm:$0xf0] }
 0x36d   :  { %v3431_v15 = vor.u32 %v3904_v7, %v3430_v11 }
 0x36e   :  { %v4030_v22 = vpop.eup %4029 }
 0x36f   :  { %v4032_v23 = vpop.eup %4031  ;;  %v1285_v24 = vadd.f32 1.0, %v4030_v22  ;;  %1792 = vmatpush.bf16.msrb.mxu0 %v3431_v15  ;;  %v3415_v22 = vor.u32 %v3899_v17, %v3412_v19  ;;  %v3352_v15 = vld [vmem:[%s5876_s2 + $0x24] sm:$0xf0]  ;;  %v3886_v17 = vld [vmem:[%s5876_s2 + $0x28] sm:$0xf0] }
 0x370   :  { %v1305_v27 = vadd.f32 1.0, %v4032_v23  ;;  %v3419_v23 = vor.u32 %v3901_v21, %v3418_v20  ;;  %v3338_v20 = vld [vmem:[%s5876_s2] sm:$0xf]  ;;  %v3882_v21 = vld [vmem:[%s5876_s2 + $0x8] sm:$0xf0] }
 0x371   :  { %4033 = vrcp.f32 %v1285_v24  ;;  %v1297_v47 = vand.u32 2147483648, %v1285_v24  ;;  %v1295_v49 = vand.u32 2147483647, %v1285_v24  ;;  %vm1291_vm0 = vweird.f32 %v1285_v24 }
 0x372   :  { %4035 = vrcp.f32 %v1305_v27  ;;  %v1279_v32 = vpop.f32.mrf.mxu2  ;;  %v1317_v60 = vand.u32 2147483648, %v1305_v27  ;;  %vm1311_vm4 = vweird.f32 %v1305_v27  ;;  %v1315_v61 = vand.u32 2147483647, %v1305_v27 }
 0x373   :  { %v1298_v52 = vor.u32 1.1754944e-38, %v1297_v47  ;;  %vm1296_vm2 = vcmp.eq.f32.partialorder %v1295_v49, 8.507059e+37  ;;  %1793 = vmatpush.bf16.msrb.mxu0 %v3419_v23  ;;  %v3388_v47 = vld [vmem:[%s5876_s2 + $0x6c] sm:$0xf0]  ;;  %v3232_v49 = vld [vmem:[%s5874_s0 + $0x78] sm:$0xff]  ;;  %v3339_v28 = vor.u32 %v3882_v21, %v3338_v20 }
 0x374   :  { %v1318_v0 = vor.u32 1.1754944e-38, %v1317_v60  ;;  %vm1316_vm6 = vcmp.eq.f32.partialorder %v1315_v61, 8.507059e+37  ;;  %v3376_v60 = vld [vmem:[%s5876_s2 + $0x54] sm:$0xf0]  ;;  %v3382_v61 = vld [vmem:[%s5876_s2 + $0x50] sm:$0xf] }
 0x375   :  { %v3881_v23 = vld [vmem:[%s5876_s2 + $0x4] sm:$0xf]  ;;  %v3499_v20 = vld [vmem:[%s5876_s2 + $0x78] sm:$0xf] }
 0x376   :  { %v3921_v21 = vld [vmem:[%s5876_s2 + $0x80] sm:$0xf0] }
 0x377   :  { %v4034_v36 = vpop.eup %4033  ;;  %1794 = vmatpush.bf16.msrb.mxu0 %v3407_v34 }
 0x378   :  { %v4036_v37 = vpop.eup %4035  ;;  %v1287_v38 = vmul.f32 %v4034_v36, %v1285_v24  ;;  %vm1292_vm15 = vweird.f32 %v4034_v36  ;;  %v3233_v24 = vld [vmem:[%s5874_s0 + $0x80] sm:$0xff] }
 0x379   :  { %v1307_v40 = vmul.f32 %v4036_v37, %v1305_v27  ;;  %vm1293_vm1 = vmor %vm1291_vm0, %vm1292_vm15  ;;  %vm1312_vm3 = vweird.f32 %v4036_v37  ;;  %v3896_v27 = vld [vmem:[%s5876_s2 + $0x7c] sm:$0xf] }
 0x37a   :  { %v1288_v43 = vsub.f32 1.0, %v1287_v38  ;;  %vm1313_vm5 = vmor %vm1311_vm4, %vm1312_vm3  ;;  %v3403_v33 = vor.u32 %v3896_v27, %v3400_v29  ;;  %v3894_v38 = vld [vmem:[%s5876_s2 + $0x68] sm:$0xf0] }
 0x37b   :  { %v1308_v45 = vsub.f32 1.0, %v1307_v40  ;;  %v3893_v40 = vld [vmem:[%s5876_s2 + $0x64] sm:$0xf] }
 0x37c   :  { %v1289_v48 = vmul.f32 %v4034_v36, %v1288_v43 }
 0x37d   :  { %v1309_v50 = vmul.f32 %v4036_v37, %v1308_v45 }
 0x37e   :  { %v1290_v51 = vadd.f32 %v4034_v36, %v1289_v48  ;;  %v3394_v48 = vld [vmem:[%s5876_s2 + $0x68] sm:$0xf] }
 0x37f   :  { %v1310_v58 = vadd.f32 %v4036_v37, %v1309_v50  ;;  %v3391_v50 = vor.u32 %v3893_v40, %v3388_v47 }
 0x380   :  { %v1294_v53 = vsel %vm1293_vm1, %v4034_v36, %v1290_v51  ;;  %v3895_v51 = vld [vmem:[%s5876_s2 + $0x70] sm:$0xf0] }
 0x381   :  { %v1299_v57 = vsel %vm1296_vm2, %v1298_v52, %v1294_v53  ;;  %v1314_v63 = vsel %vm1313_vm5, %v4036_v37, %v1310_v58  ;;  %v3386_v37 = vld [vmem:[%s5876_s2 + $0x60] sm:$0xf]  ;;  %v3395_v52 = vor.u32 %v3895_v51, %v3394_v48 }
 0x382   :  { %v1322_v59 = vmul.f32 %v1321_v54, %v1299_v57  ;;  %v1319_v42 = vsel %vm1316_vm6, %v1318_v0, %v1314_v63  ;;  %v3387_v45 = vor.u32 %v3894_v38, %v3386_v37  ;;  %v3374_v54 = vld [vmem:[%s5876_s2 + $0x48] sm:$0xf]  ;;  %v3890_v57 = vld [vmem:[%s5876_s2 + $0x4c] sm:$0xf] }
 0x383   :  { %v1325_v1 = vsub.f32 1.0, %v1319_v42  ;;  %v1327_v3 = vmul.f32 %v1319_v42, %v5028_v12  ;;  %1795 = vmatpush.bf16.msrb.mxu0 %v3395_v52  ;;  %v3379_v0 = vor.u32 %v3890_v57, %v3376_v60 }
 0x384   :  { %v1323_v62 = vadd.f32 %v3133_v55, %v1322_v59  ;;  %1769 = vmatpush.bf16.msra.mxu2 %v3387_v45  ;;  %v3891_v55 = vld [vmem:[%s5876_s2 + $0x50] sm:$0xf0] }
 0x385   :  { %v3375_v59 = vor.u32 %v3891_v55, %v3374_v54 }
 0x386   :  { %4037 = vtanh.f32 %v1323_v62  ;;  %v3892_v62 = vld [vmem:[%s5876_s2 + $0x58] sm:$0xf0] }
 0x387   :  { %v3383_v42 = vor.u32 %v3892_v62, %v3382_v61 }
 0x388   :  { %1770 = vmatpush.bf16.msra.mxu2 %v3375_v59 }
 0x389   :  { %1796 = vmatpush.bf16.msrb.mxu0 %v3383_v42 }
 0x38c   :  { %v4038_v2 = vpop.eup %4037 }
 0x38d   :  { %v1326_v41 = vmul.f32 %v4038_v2, %v1325_v1 }
 0x38f   :  { %v1328_v4 = vadd.f32 %v1327_v3, %v1326_v41  ;;  %v3888_v41 = vld [vmem:[%s5876_s2 + $0x38] sm:$0xf0] }
 0x390   :  { %v3363_v3 = vor.u32 %v3888_v41, %v3362_v46 }
 0x391   :  { %v5188_v5 = vsel %vm1334_vm7, %v1328_v4, %v5028_v12  ;;  %v1336_v6 = vsel %vm1334_vm7, %v1328_v4, 0.0  ;;  %v3902_v12 = vld [vmem:[%s5876_s2 + $0xac] sm:$0xf]  ;;  %v3887_v4 = vld [vmem:[%s5876_s2 + $0x34] sm:$0xf] }
 0x392   :  { %1338 = vst [vmem:[#allocation2 + $0x20] sm:$0xff] %v1336_v6  ;;  %v1343_v39 = vpack.c.bf16 %v5188_v5, %v5188_v5  ;;  %v3427_v14 = vor.u32 %v3902_v12, %v3424_v13  ;;  %v3364_v6 = vld [vmem:[%s5876_s2 + $0x3c] sm:$0xf0]  ;;  %v3889_v12 = vld [vmem:[%s5876_s2 + $0x40] sm:$0xf0]  ;;  %1771 = vmatpush.bf16.msra.mxu2 %v3363_v3 }
 0x393   :  { %v3367_v10 = vor.u32 %v3887_v4, %v3364_v6  ;;  %v3885_v13 = vld [vmem:[%s5876_s2 + $0x20] sm:$0xf0]  ;;  %v3523_v4 = vld [vmem:[%s5876_s2 + $0xa8] sm:$0xf]  ;;  %v3927_v6 = vld [vmem:[%s5876_s2 + $0xb0] sm:$0xf0] }
 0x394   :  { %1512 = vmatmul.bf16.vlgmr.msrb.gmra.mxu3 %v1343_v39  ;;  %1525 = vmatmul.bf16.vlgmr.msra.gmra.mxu0 %v1343_v39  ;;  %v3351_v9 = vor.u32 %v3885_v13, %v3350_v44 }
 0x395   :  { %1538 = vmatmul.bf16.vlgmr.msra.gmra.mxu1 %v1343_v39  ;;  %1779 = vmatpush.bf16.msra.mxu3 %v3427_v14  ;;  %v3370_v39 = vld [vmem:[%s5876_s2 + $0x38] sm:$0xf]  ;;  %v3884_v14 = vld [vmem:[%s5876_s2 + $0x1c] sm:$0xf] }
 0x396   :  { %v3371_v7 = vor.u32 %v3889_v12, %v3370_v39  ;;  %v3355_v19 = vor.u32 %v3884_v14, %v3352_v15  ;;  %1772 = vmatpush.bf16.msra.mxu2 %v3351_v9  ;;  %v3524_v39 = vor.u32 %v3927_v6, %v3523_v4  ;;  %v3928_v12 = vld [vmem:[%s5876_s2 + $0xb8] sm:$0xf0]  ;;  %v3923_v14 = vld [vmem:[%s5876_s2 + $0x94] sm:$0xf]  ;;  %v3513_v9 = vld [vmem:[%s5876_s2 + $0x9c] sm:$0xf0] }
 0x397   :  { %v3913_v4 = vld [vmem:[%s5876_s2 + $0x40] sm:$0xf0]  ;;  %v3451_v6 = vld [vmem:[%s5876_s2 + $0x18] sm:$0xf] }
 0x398   :  { %1797 = vmatpush.bf16.msrb.mxu0 %v3371_v7  ;;  %2028 = vmatpush.bf16.msrb.mxu1 %v3524_v39  ;;  %v3924_v7 = vld [vmem:[%s5876_s2 + $0x98] sm:$0xf0]  ;;  %v3909_v39 = vld [vmem:[%s5876_s2 + $0x20] sm:$0xf0] }
 0x399   :  { %1780 = vmatpush.bf16.msra.mxu3 %v3415_v22  ;;  %v3359_v22 = vor.u32 %v3886_v17, %v3358_v16  ;;  %v3519_v16 = vld [vmem:[%s5876_s2 + $0x98] sm:$0xf]  ;;  %v3925_v17 = vld [vmem:[%s5876_s2 + $0xa0] sm:$0xf0] }
 0x39a   :  { %1773 = vmatpush.bf16.msra.mxu2 %v3339_v28  ;;  %v3508_v28 = vor.u32 %v3922_v26, %v3507_v25 }
 0x39c   :  { %1798 = vmatpush.bf16.msrb.mxu0 %v3359_v22  ;;  %v3920_v22 = vld [vmem:[%s5876_s2 + $0x7c] sm:$0xf] }
 0x39d   :  { %1781 = vmatpush.bf16.msra.mxu3 %v3403_v33 }
 0x3a0   :  { %1799 = vmatpush.bf16.msrb.mxu0 %v3347_v31  ;;  %v3918_v31 = vld [vmem:[%s5876_s2 + $0x68] sm:$0xf0] }
 0x3a1   :  { %1782 = vmatpush.bf16.msra.mxu3 %v3391_v50 }
 0x3a5   :  { %1783 = vmatpush.bf16.msra.mxu3 %v3379_v0 }
 0x3a9   :  { %1784 = vmatpush.bf16.msra.mxu3 %v3367_v10  ;;  %v3531_v10 = vld [vmem:[%s5876_s2 + $0xb0] sm:$0xf] }
 0x3aa   :  { %v3532_v13 = vor.u32 %v3928_v12, %v3531_v10  ;;  %v3453_v10 = vld [vmem:[%s5876_s2 + $0x24] sm:$0xf0]  ;;  %v3452_v12 = vor.u32 %v3909_v39, %v3451_v6  ;;  %v3952_v6 = vld [vmem:[%s5876_s2 + $0xb8] sm:$0xf0] }
 0x3ad   :  { %1785 = vmatpush.bf16.msra.mxu3 %v3355_v19  ;;  %v3520_v19 = vor.u32 %v3925_v17, %v3519_v16  ;;  %v3906_v16 = vld [vmem:[%s5876_s2 + $0x8] sm:$0xf0]  ;;  %v3905_v17 = vld [vmem:[%s5876_s2 + $0x4] sm:$0xf] }
 0x411   :  { %v1526_v32 = vpop.f32.mrf.mxu0 }
 0x412   :  { %v1563_v35 = vadd.f32 %v3233_v24, %v1526_v32  ;;  %v5249_v36 = vpop.f32.mrf.mxu1  ;;  %v3340_v24 = vld [vmem:[%s5876_s2 + $0xc] sm:$0xf0] }
 0x413   :  { %v3343_v30 = vor.u32 %v3881_v23, %v3340_v24  ;;  %v1583_v50 = vadd.f32 %v5018_v56, %v5249_v36  ;;  %v3500_v23 = vor.u32 %v3921_v21, %v3499_v20  ;;  %v3501_v24 = vld [vmem:[%s5876_s2 + $0x84] sm:$0xf0]  ;;  %v3907_v20 = vld [vmem:[%s5876_s2 + $0x10] sm:$0xf0] }
 0x414   :  { %v3332_v43 = vmul.f32 -1.442695, %v1563_v35 }
 0x415   :  { %1786 = vmatpush.bf16.msra.mxu3 %v3343_v30  ;;  %v3487_v30 = vld [vmem:[%s5876_s2 + $0x60] sm:$0xf] }
 0x416   :  { %4039 = vpow2.f32 %v3332_v43 }
 0x417   :  { %v1513_v53 = vpop.f32.mrf.mxu3 }
 0x418   :  { %v1543_v58 = vadd.f32 %v3232_v49, %v1513_v53  ;;  %v3234_v53 = vld [vmem:[%s5874_s0 + $0x88] sm:$0xff] }
 0x419   :  { %v1528_v63 = vpop.f32.mrf.mxu0  ;;  %2054 = vmatpush.bf16.msrb.mxu3 %v3532_v13  ;;  %v3910_v13 = vld [vmem:[%s5876_s2 + $0x28] sm:$0xf0] }
 0x41a   :  { %v3331_v1 = vmul.f32 -1.442695, %v1543_v58  ;;  %v1541_v2 = vpop.f32.mrf.mxu1 }
 0x41c   :  { %v4040_v8 = vpop.eup %4039  ;;  %4041 = vpow2.f32 %v3331_v1  ;;  %v1595_v1 = vpop.permute.xlu2 %1594 }
 0x41d   :  { %v5314_v11 = vadd.f32 1.0, %v4040_v8  ;;  %vm1596_vm0 = vcmp.eq.s32.totalorder %v1595_v1, 1  ;;  %v3525_v8 = vld [vmem:[%s5876_s2 + $0xb4] sm:$0xf0]  ;;  %2055 = vmatpush.bf16.msrb.mxu3 %v3520_v19  ;;  %v3465_v1 = vld [vmem:[%s5876_s2 + $0x3c] sm:$0xf0] }
 0x41e   :  { %v3447_v19 = vld [vmem:[%s5876_s2 + $0x8] sm:$0xf] }
 0x41f   :  { %v1515_v18 = vpop.f32.mrf.mxu3  ;;  %4043 = vrcp.f32 %v5314_v11  ;;  %v1579_v55 = vand.u32 2147483648, %v5314_v11  ;;  %vm1573_vm13 = vweird.f32 %v5314_v11  ;;  %v1577_v58 = vand.u32 2147483647, %v5314_v11 }
 0x420   :  { %v3516_v18 = vor.u32 %v3923_v14, %v3513_v9  ;;  %v3439_v9 = vld [vmem:[%s5876_s2] sm:$0xf]  ;;  %v3448_v26 = vor.u32 %v3907_v20, %v3447_v19  ;;  %v3602_v19 = vld [vmem:[%s5876_s2 + $0x84] sm:$0xf0] }
 0x421   :  { %v1580_v36 = vor.u32 1.1754944e-38, %v1579_v55  ;;  %vm1578_vm15 = vcmp.eq.f32.partialorder %v1577_v58, 8.507059e+37  ;;  %2056 = vmatpush.bf16.msrb.mxu3 %v3508_v28  ;;  %v3477_v55 = vld [vmem:[%s5876_s2 + $0x54] sm:$0xf0]  ;;  %v3916_v58 = vld [vmem:[%s5876_s2 + $0x58] sm:$0xf0] }
 0x422   :  { %v4042_v27 = vpop.eup %4041  ;;  %v3608_v20 = vld [vmem:[%s5876_s2 + $0x80] sm:$0xf] }
 0x423   :  { %v1547_v29 = vadd.f32 1.0, %v4042_v27  ;;  %v3504_v27 = vor.u32 %v3920_v22, %v3501_v24  ;;  %v3440_v22 = vor.u32 %v3906_v16, %v3439_v9  ;;  %v3600_v9 = vld [vmem:[%s5876_s2 + $0x78] sm:$0xf]  ;;  %v3945_v16 = vld [vmem:[%s5876_s2 + $0x80] sm:$0xf0] }
 0x425   :  { %4045 = vrcp.f32 %v1547_v29  ;;  %v4044_v32 = vpop.eup %4043  ;;  %v1559_v40 = vand.u32 2147483648, %v1547_v29  ;;  %v1557_v45 = vand.u32 2147483647, %v1547_v29  ;;  %vm1553_vm9 = vweird.f32 %v1547_v29 }
 0x426   :  { %v1569_v33 = vmul.f32 %v4044_v32, %v5314_v11  ;;  %vm1574_vm12 = vweird.f32 %v4044_v32  ;;  %v3511_v11 = vld [vmem:[%s5876_s2 + $0x90] sm:$0xf] }
 0x427   :  { %v1560_v49 = vor.u32 1.1754944e-38, %v1559_v40  ;;  %vm1558_vm11 = vcmp.eq.f32.partialorder %v1557_v45, 8.507059e+37  ;;  %vm1575_vm14 = vmor %vm1573_vm13, %vm1574_vm12  ;;  %v3512_v15 = vor.u32 %v3924_v7, %v3511_v11  ;;  %v3334_v40 = vld [vmem:[%s5874_s0 + $0x98] sm:$0xff] }
 0x428   :  { %v1570_v37 = vsub.f32 1.0, %v1569_v33  ;;  %v3488_v33 = vor.u32 %v3918_v31, %v3487_v30 }
 0x429   :  { %2029 = vmatpush.bf16.msrb.mxu1 %v3512_v15 }
 0x42a   :  { %v1571_v47 = vmul.f32 %v4044_v32, %v1570_v37  ;;  %v3919_v37 = vld [vmem:[%s5876_s2 + $0x70] sm:$0xf0] }
 0x42b   :  { %v4046_v34 = vpop.eup %4045 }
 0x42c   :  { %v1549_v35 = vmul.f32 %v4046_v34, %v1547_v29  ;;  %vm1554_vm8 = vweird.f32 %v4046_v34  ;;  %v1572_v52 = vadd.f32 %v4044_v32, %v1571_v47 }
 0x42d   :  { %vm1555_vm10 = vmor %vm1553_vm9, %vm1554_vm8  ;;  %2030 = vmatpush.bf16.msrb.mxu1 %v3500_v23 }
 0x42e   :  { %v1550_v38 = vsub.f32 1.0, %v1549_v35  ;;  %v1576_v60 = vsel %vm1575_vm14, %v4044_v32, %v1572_v52  ;;  %v3917_v32 = vld [vmem:[%s5876_s2 + $0x64] sm:$0xf]  ;;  %v3495_v35 = vld [vmem:[%s5876_s2 + $0x68] sm:$0xf] }
 0x42f   :  { %v1581_v61 = vsel %vm1578_vm15, %v1580_v36, %v1576_v60  ;;  %v3496_v45 = vor.u32 %v3919_v37, %v3495_v35 }
 0x430   :  { %v1551_v43 = vmul.f32 %v4046_v34, %v1550_v38  ;;  %v1587_v62 = vsub.f32 1.0, %v1581_v61  ;;  %v1589_v42 = vmul.f32 %v1581_v61, %v5188_v5  ;;  %v3333_v38 = vld [vmem:[%s5874_s0 + $0x90] sm:$0xff] }
 0x431   :  { %2031 = vmatpush.bf16.msrb.mxu1 %v3488_v33  ;;  %2057 = vmatpush.bf16.msrb.mxu3 %v3496_v45 }
 0x432   :  { %v1552_v48 = vadd.f32 %v4046_v34, %v1551_v43 }
 0x434   :  { %v1556_v51 = vsel %vm1555_vm10, %v4046_v34, %v1552_v48  ;;  %v3489_v34 = vld [vmem:[%s5876_s2 + $0x6c] sm:$0xf0] }
 0x435   :  { %v1561_v54 = vsel %vm1558_vm11, %v1560_v49, %v1556_v51  ;;  %v3492_v43 = vor.u32 %v3917_v32, %v3489_v34  ;;  %v3475_v49 = vld [vmem:[%s5876_s2 + $0x48] sm:$0xf]  ;;  %v3914_v51 = vld [vmem:[%s5876_s2 + $0x4c] sm:$0xf] }
 0x436   :  { %v1584_v57 = vmul.f32 %v1583_v50, %v1561_v54  ;;  %v3915_v50 = vld [vmem:[%s5876_s2 + $0x50] sm:$0xf0] }
 0x437   :  { %v3476_v54 = vor.u32 %v3915_v50, %v3475_v49  ;;  %v3335_v49 = vld [vmem:[%s5874_s0 + $0xa0] sm:$0xff] }
 0x438   :  { %v1585_v59 = vadd.f32 %v3234_v53, %v1584_v57  ;;  %v3483_v57 = vld [vmem:[%s5876_s2 + $0x50] sm:$0xf] }
 0x439   :  { %v3484_v60 = vor.u32 %v3916_v58, %v3483_v57  ;;  %2032 = vmatpush.bf16.msrb.mxu1 %v3476_v54 }
 0x43a   :  { %4047 = vtanh.f32 %v1585_v59  ;;  %v3480_v59 = vor.u32 %v3914_v51, %v3477_v55 }
 0x43b   :  { %2058 = vmatpush.bf16.msrb.mxu3 %v3484_v60 }
 0x440   :  { %v4048_v63 = vpop.eup %4047 }
 0x441   :  { %v1588_v0 = vmul.f32 %v4048_v63, %v1587_v62  ;;  %v3463_v63 = vld [vmem:[%s5876_s2 + $0x30] sm:$0xf] }
 0x443   :  { %v1590_v2 = vadd.f32 %v1589_v42, %v1588_v0  ;;  %v3912_v0 = vld [vmem:[%s5876_s2 + $0x38] sm:$0xf0]  ;;  %v3911_v42 = vld [vmem:[%s5876_s2 + $0x34] sm:$0xf] }
 0x445   :  { %v5358_v46 = vsel %vm1596_vm0, %v1590_v2, %v5188_v5  ;;  %v1598_v41 = vsel %vm1596_vm0, %v1590_v2, 0.0  ;;  %v3926_v5 = vld [vmem:[%s5876_s2 + $0xac] sm:$0xf]  ;;  %v3464_v2 = vor.u32 %v3912_v0, %v3463_v63 }
 0x446   :  { %1600 = vst [vmem:[#allocation2 + $0x28] sm:$0xff] %v1598_v41  ;;  %v1605_v3 = vpack.c.bf16 %v5358_v46, %v5358_v46  ;;  %v3528_v44 = vor.u32 %v3926_v5, %v3525_v8  ;;  %v3468_v41 = vor.u32 %v3911_v42, %v3465_v1  ;;  %v3908_v8 = vld [vmem:[%s5876_s2 + $0x1c] sm:$0xf]  ;;  %v3624_v1 = vld [vmem:[%s5876_s2 + $0xa8] sm:$0xf] }
 0x447   :  { %2033 = vmatpush.bf16.msrb.mxu1 %v3464_v2  ;;  %v3456_v14 = vor.u32 %v3908_v8, %v3453_v10  ;;  %v3951_v2 = vld [vmem:[%s5876_s2 + $0xb0] sm:$0xf0]  ;;  %v3612_v8 = vld [vmem:[%s5876_s2 + $0x90] sm:$0xf]  ;;  %v3948_v10 = vld [vmem:[%s5876_s2 + $0x98] sm:$0xf0] }
 0x448   :  { %1774 = vmatmul.bf16.vlgmr.msra.gmra.mxu2 %v1605_v3  ;;  %1787 = vmatmul.bf16.vlgmr.msra.gmra.mxu3 %v1605_v3 }
 0x449   :  { %1800 = vmatmul.bf16.vlgmr.msrb.gmra.mxu0 %v1605_v3  ;;  %2041 = vmatpush.bf16.msrb.mxu2 %v3528_v44  ;;  %v3471_v3 = vld [vmem:[%s5876_s2 + $0x38] sm:$0xf]  ;;  %v3459_v44 = vld [vmem:[%s5876_s2 + $0x20] sm:$0xf] }
 0x44a   :  { %v3472_v5 = vor.u32 %v3913_v4, %v3471_v3  ;;  %v3460_v15 = vor.u32 %v3910_v13, %v3459_v44  ;;  %v3626_v3 = vld [vmem:[%s5876_s2 + $0xb4] sm:$0xf0]  ;;  %v3632_v4 = vld [vmem:[%s5876_s2 + $0xb0] sm:$0xf]  ;;  %v3613_v44 = vor.u32 %v3948_v10, %v3612_v8  ;;  %v3614_v13 = vld [vmem:[%s5876_s2 + $0x9c] sm:$0xf0] }
 0x44b   :  { %2034 = vmatpush.bf16.msrb.mxu1 %v3452_v12  ;;  %v3633_v39 = vor.u32 %v3952_v6, %v3632_v4  ;;  %v3947_v12 = vld [vmem:[%s5876_s2 + $0x94] sm:$0xf]  ;;  %v3554_v4 = vld [vmem:[%s5876_s2 + $0x24] sm:$0xf0]  ;;  %v3560_v6 = vld [vmem:[%s5876_s2 + $0x20] sm:$0xf] }
 0x44c   :  { %2059 = vmatpush.bf16.msrb.mxu3 %v3472_v5 }
 0x44d   :  { %2042 = vmatpush.bf16.msrb.mxu2 %v3516_v18  ;;  %v3441_v18 = vld [vmem:[%s5876_s2 + $0xc] sm:$0xf0] }
 0x44e   :  { %v3444_v25 = vor.u32 %v3905_v17, %v3441_v18  ;;  %v3944_v17 = vld [vmem:[%s5876_s2 + $0x7c] sm:$0xf]  ;;  %v3601_v18 = vor.u32 %v3945_v16, %v3600_v9  ;;  %v3931_v16 = vld [vmem:[%s5876_s2 + $0x10] sm:$0xf0] }
 0x44f   :  { %2035 = vmatpush.bf16.msrb.mxu1 %v3440_v22  ;;  %v3605_v22 = vor.u32 %v3944_v17, %v3602_v19 }
 0x450   :  { %2060 = vmatpush.bf16.msrb.mxu3 %v3460_v15 }
 0x451   :  { %2043 = vmatpush.bf16.msrb.mxu2 %v3504_v27 }
 0x454   :  { %2061 = vmatpush.bf16.msrb.mxu3 %v3448_v26  ;;  %v3941_v26 = vld [vmem:[%s5876_s2 + $0x64] sm:$0xf] }
 0x455   :  { %2044 = vmatpush.bf16.msrb.mxu2 %v3492_v43 }
 0x459   :  { %2045 = vmatpush.bf16.msrb.mxu2 %v3480_v59 }
 0x45d   :  { %2046 = vmatpush.bf16.msrb.mxu2 %v3468_v41  ;;  %v3625_v41 = vor.u32 %v3951_v2, %v3624_v1  ;;  %v3552_v1 = vld [vmem:[%s5876_s2 + $0x18] sm:$0xf]  ;;  %v3933_v2 = vld [vmem:[%s5876_s2 + $0x20] sm:$0xf0] }
 0x45f   :  { %2290 = vmatpush.bf16.msra.mxu0 %v3625_v41 }
 0x461   :  { %2047 = vmatpush.bf16.msrb.mxu2 %v3456_v14  ;;  %v3617_v14 = vor.u32 %v3947_v12, %v3614_v13  ;;  %v3930_v13 = vld [vmem:[%s5876_s2 + $0x8] sm:$0xf0] }
 0x463   :  { %2291 = vmatpush.bf16.msra.mxu0 %v3613_v44  ;;  %v3540_v44 = vld [vmem:[%s5876_s2] sm:$0xf] }
 0x465   :  { %2048 = vmatpush.bf16.msrb.mxu2 %v3444_v25  ;;  %v3942_v25 = vld [vmem:[%s5876_s2 + $0x68] sm:$0xf0] }
 0x467   :  { %2292 = vmatpush.bf16.msra.mxu0 %v3601_v18 }
 0x469   :  { %2316 = vmatpush.bf16.msra.mxu2 %v3633_v39  ;;  %v3934_v39 = vld [vmem:[%s5876_s2 + $0x28] sm:$0xf0] }
 0x46a   :  { %v3561_v10 = vor.u32 %v3934_v39, %v3560_v6  ;;  %v3971_v6 = vld [vmem:[%s5876_s2 + $0x94] sm:$0xf]  ;;  %v3715_v39 = vld [vmem:[%s5876_s2 + $0x9c] sm:$0xf0] }
 0x4c6   :  { %v5416_v29 = vpop.f32.mrf.mxu0 }
 0x4cb   :  { %v1775_v47 = vpop.f32.mrf.mxu2  ;;  %v1788_v48 = vpop.f32.mrf.mxu3 }
 0x4cc   :  { %v1805_v52 = vadd.f32 %v3333_v38, %v1775_v47  ;;  %v1825_v53 = vadd.f32 %v3334_v40, %v1788_v48  ;;  %v1845_v47 = vadd.f32 %v5018_v56, %v5416_v29 }
 0x4ce   :  { %v3432_v36 = vmul.f32 -1.442695, %v1805_v52  ;;  %v3433_v61 = vmul.f32 -1.442695, %v1825_v53  ;;  %v1803_v62 = vpop.f32.mrf.mxu0 }
 0x4d0   :  { %4049 = vpow2.f32 %v3432_v36 }
 0x4d1   :  { %4051 = vpow2.f32 %v3433_v61  ;;  %v1857_v61 = vpop.permute.xlu0 %1856 }
 0x4d2   :  { %vm1858_vm9 = vcmp.eq.s32.totalorder %v1857_v61, 1 }
 0x4d3   :  { %v1777_v11 = vpop.f32.mrf.mxu2  ;;  %v1790_v7 = vpop.f32.mrf.mxu3 }
 0x4d4   :  { %v3620_v11 = vld [vmem:[%s5876_s2 + $0x98] sm:$0xf]  ;;  %v3949_v7 = vld [vmem:[%s5876_s2 + $0xa0] sm:$0xf0] }
 0x4d5   :  { %v3621_v15 = vor.u32 %v3949_v7, %v3620_v11  ;;  %v3541_v11 = vor.u32 %v3930_v13, %v3540_v44  ;;  %v3929_v7 = vld [vmem:[%s5876_s2 + $0x4] sm:$0xf]  ;;  %v3701_v13 = vld [vmem:[%s5876_s2 + $0x78] sm:$0xf] }
 0x4d6   :  { %v4050_v21 = vpop.eup %4049 }
 0x4d7   :  { %v4052_v23 = vpop.eup %4051  ;;  %v1809_v24 = vadd.f32 1.0, %v4050_v21  ;;  %2317 = vmatpush.bf16.msra.mxu2 %v3621_v15  ;;  %v3946_v21 = vld [vmem:[%s5876_s2 + $0x88] sm:$0xf0]  ;;  %v3548_v15 = vld [vmem:[%s5876_s2 + $0x8] sm:$0xf] }
 0x4d8   :  { %v1829_v27 = vadd.f32 1.0, %v4052_v23  ;;  %v3609_v23 = vor.u32 %v3946_v21, %v3608_v20  ;;  %v3549_v19 = vor.u32 %v3931_v16, %v3548_v15  ;;  %v3703_v15 = vld [vmem:[%s5876_s2 + $0x84] sm:$0xf0]  ;;  %v3970_v16 = vld [vmem:[%s5876_s2 + $0x88] sm:$0xf0] }
 0x4d9   :  { %4053 = vrcp.f32 %v1809_v24  ;;  %v1821_v34 = vand.u32 2147483648, %v1809_v24  ;;  %v1819_v38 = vand.u32 2147483647, %v1809_v24  ;;  %vm1815_vm2 = vweird.f32 %v1809_v24 }
 0x4da   :  { %4055 = vrcp.f32 %v1829_v27  ;;  %v1841_v53 = vand.u32 2147483648, %v1829_v27  ;;  %vm1835_vm6 = vweird.f32 %v1829_v27  ;;  %v1839_v54 = vand.u32 2147483647, %v1829_v27 }
 0x4db   :  { %v1822_v45 = vor.u32 1.1754944e-38, %v1821_v34  ;;  %vm1820_vm4 = vcmp.eq.f32.partialorder %v1819_v38, 8.507059e+37  ;;  %2318 = vmatpush.bf16.msra.mxu2 %v3609_v23  ;;  %v3939_v38 = vld [vmem:[%s5876_s2 + $0x50] sm:$0xf0] }
 0x4dc   :  { %v1842_v58 = vor.u32 1.1754944e-38, %v1841_v53  ;;  %vm1840_vm8 = vcmp.eq.f32.partialorder %v1839_v54, 8.507059e+37  ;;  %v3564_v54 = vld [vmem:[%s5876_s2 + $0x30] sm:$0xf] }
 0x4df   :  { %v4054_v28 = vpop.eup %4053 }
 0x4e0   :  { %v4056_v30 = vpop.eup %4055  ;;  %v1811_v31 = vmul.f32 %v4054_v28, %v1809_v24  ;;  %vm1816_vm1 = vweird.f32 %v4054_v28  ;;  %v3588_v24 = vld [vmem:[%s5876_s2 + $0x60] sm:$0xf] }
 0x4e1   :  { %v1831_v32 = vmul.f32 %v4056_v30, %v1829_v27  ;;  %vm1817_vm3 = vmor %vm1815_vm2, %vm1816_vm1  ;;  %vm1836_vm5 = vweird.f32 %v4056_v30  ;;  %v3589_v27 = vor.u32 %v3942_v25, %v3588_v24 }
 0x4e2   :  { %v1812_v33 = vsub.f32 1.0, %v1811_v31  ;;  %vm1837_vm7 = vmor %vm1835_vm6, %vm1836_vm5  ;;  %v3943_v31 = vld [vmem:[%s5876_s2 + $0x70] sm:$0xf0] }
 0x4e3   :  { %v1832_v35 = vsub.f32 1.0, %v1831_v32  ;;  %v3434_v32 = vld [vmem:[%s5874_s0 + $0xa8] sm:$0xff]  ;;  %2293 = vmatpush.bf16.msra.mxu0 %v3589_v27 }
 0x4e4   :  { %v1813_v37 = vmul.f32 %v4054_v28, %v1812_v33 }
 0x4e5   :  { %v1833_v40 = vmul.f32 %v4056_v30, %v1832_v35 }
 0x4e6   :  { %v1814_v43 = vadd.f32 %v4054_v28, %v1813_v37  ;;  %v3576_v37 = vld [vmem:[%s5876_s2 + $0x48] sm:$0xf] }
 0x4e7   :  { %v1834_v51 = vadd.f32 %v4056_v30, %v1833_v40  ;;  %v3938_v40 = vld [vmem:[%s5876_s2 + $0x4c] sm:$0xf] }
 0x4e8   :  { %v1818_v48 = vsel %vm1817_vm3, %v4054_v28, %v1814_v43  ;;  %v3590_v28 = vld [vmem:[%s5876_s2 + $0x6c] sm:$0xf0] }
 0x4e9   :  { %v1823_v50 = vsel %vm1820_vm4, %v1822_v45, %v1818_v48  ;;  %v1838_v57 = vsel %vm1837_vm7, %v4056_v30, %v1834_v51  ;;  %v3596_v30 = vld [vmem:[%s5876_s2 + $0x68] sm:$0xf]  ;;  %v3593_v33 = vor.u32 %v3941_v26, %v3590_v28  ;;  %v3577_v45 = vor.u32 %v3939_v38, %v3576_v37  ;;  %v3584_v48 = vld [vmem:[%s5876_s2 + $0x50] sm:$0xf]  ;;  %v3436_v38 = vld [vmem:[%s5874_s0 + $0xb8] sm:$0xff] }
 0x4ea   :  { %v1846_v52 = vmul.f32 %v1845_v47, %v1823_v50  ;;  %v1843_v56 = vsel %vm1840_vm8, %v1842_v58, %v1838_v57  ;;  %v3597_v34 = vor.u32 %v3943_v31, %v3596_v30  ;;  %v3578_v47 = vld [vmem:[%s5876_s2 + $0x54] sm:$0xf0]  ;;  %v3940_v50 = vld [vmem:[%s5876_s2 + $0x58] sm:$0xf0]  ;;  %v3935_v57 = vld [vmem:[%s5876_s2 + $0x34] sm:$0xf] }
 0x4eb   :  { %v1849_v29 = vsub.f32 1.0, %v1843_v56  ;;  %v1851_v36 = vmul.f32 %v1843_v56, %v5358_v46  ;;  %2294 = vmatpush.bf16.msra.mxu0 %v3577_v45  ;;  %v3585_v53 = vor.u32 %v3940_v50, %v3584_v48  ;;  %v3566_v56 = vld [vmem:[%s5876_s2 + $0x3c] sm:$0xf0] }
 0x4ec   :  { %v1847_v55 = vadd.f32 %v3335_v49, %v1846_v52  ;;  %2319 = vmatpush.bf16.msra.mxu2 %v3597_v34  ;;  %v3581_v49 = vor.u32 %v3938_v40, %v3578_v47  ;;  %v3435_v52 = vld [vmem:[%s5874_s0 + $0xb0] sm:$0xff] }
 0x4ee   :  { %4057 = vtanh.f32 %v1847_v55  ;;  %v3936_v55 = vld [vmem:[%s5876_s2 + $0x38] sm:$0xf0] }
 0x4ef   :  { %v3565_v58 = vor.u32 %v3936_v55, %v3564_v54 }
 0x4f0   :  { %2320 = vmatpush.bf16.msra.mxu2 %v3585_v53 }
 0x4f1   :  { %2295 = vmatpush.bf16.msra.mxu0 %v3565_v58 }
 0x4f4   :  { %v4058_v59 = vpop.eup %4057 }
 0x4f5   :  { %v1850_v60 = vmul.f32 %v4058_v59, %v1849_v29  ;;  %v3572_v29 = vld [vmem:[%s5876_s2 + $0x38] sm:$0xf]  ;;  %v3937_v59 = vld [vmem:[%s5876_s2 + $0x40] sm:$0xf0] }
 0x4f6   :  { %v3573_v61 = vor.u32 %v3937_v59, %v3572_v29 }
 0x4f7   :  { %v1852_v62 = vadd.f32 %v1851_v36, %v1850_v60  ;;  %v3569_v36 = vor.u32 %v3935_v57, %v3566_v56  ;;  %v2119_v57 = vpop.permute.xlu1 %2118 }
 0x4f8   :  { %2321 = vmatpush.bf16.msra.mxu2 %v3573_v61  ;;  %vm2120_vm2 = vcmp.eq.s32.totalorder %v2119_v57, 1  ;;  %v3725_v61 = vld [vmem:[%s5876_s2 + $0xa8] sm:$0xf] }
 0x4f9   :  { %v5521_v63 = vsel %vm1858_vm9, %v1852_v62, %v5358_v46  ;;  %v1860_v0 = vsel %vm1858_vm9, %v1852_v62, 0.0  ;;  %v3950_v46 = vld [vmem:[%s5876_s2 + $0xac] sm:$0xf] }
 0x4fa   :  { %1862 = vst [vmem:[#allocation2 + $0x30] sm:$0xff] %v1860_v0  ;;  %v1867_v42 = vpack.c.bf16 %v5521_v63, %v5521_v63  ;;  %v3629_v5 = vor.u32 %v3950_v46, %v3626_v3  ;;  %v3932_v46 = vld [vmem:[%s5876_s2 + $0x1c] sm:$0xf]  ;;  %v3553_v3 = vor.u32 %v3933_v2, %v3552_v1  ;;  %v3733_v1 = vld [vmem:[%s5876_s2 + $0xb0] sm:$0xf] }
 0x4fb   :  { %v3976_v2 = vld [vmem:[%s5876_s2 + $0xb8] sm:$0xf0] }
 0x4fc   :  { %2036 = vmatmul.bf16.vlgmr.msrb.gmra.mxu1 %v1867_v42  ;;  %2049 = vmatmul.bf16.vlgmr.msrb.gmra.mxu2 %v1867_v42 }
 0x4fd   :  { %2062 = vmatmul.bf16.vlgmr.msrb.gmra.mxu3 %v1867_v42  ;;  %2303 = vmatpush.bf16.msra.mxu1 %v3629_v5  ;;  %v3557_v5 = vor.u32 %v3932_v46, %v3554_v4  ;;  %v3972_v4 = vld [vmem:[%s5876_s2 + $0x98] sm:$0xf0] }
 0x4fe   :  { %2296 = vmatpush.bf16.msra.mxu0 %v3553_v3  ;;  %2322 = vmatpush.bf16.msra.mxu2 %v3561_v10  ;;  %v3713_v3 = vld [vmem:[%s5876_s2 + $0x90] sm:$0xf]  ;;  %v3973_v10 = vld [vmem:[%s5876_s2 + $0xa0] sm:$0xf0] }
 0x501   :  { %2304 = vmatpush.bf16.msra.mxu1 %v3617_v14  ;;  %v3542_v14 = vld [vmem:[%s5876_s2 + $0xc] sm:$0xf0] }
 0x502   :  { %2297 = vmatpush.bf16.msra.mxu0 %v3541_v11  ;;  %v3545_v18 = vor.u32 %v3929_v7, %v3542_v14  ;;  %2323 = vmatpush.bf16.msra.mxu2 %v3549_v19  ;;  %v3969_v11 = vld [vmem:[%s5876_s2 + $0x80] sm:$0xf0]  ;;  %v3968_v7 = vld [vmem:[%s5876_s2 + $0x7c] sm:$0xf]  ;;  %v3689_v19 = vld [vmem:[%s5876_s2 + $0x60] sm:$0xf] }
 0x503   :  { %v3702_v14 = vor.u32 %v3969_v11, %v3701_v13  ;;  %v3953_v11 = vld [vmem:[%s5876_s2 + $0x4] sm:$0xf] }
 0x505   :  { %2305 = vmatpush.bf16.msra.mxu1 %v3605_v22 }
 0x509   :  { %2306 = vmatpush.bf16.msra.mxu1 %v3593_v33 }
 0x50d   :  { %2307 = vmatpush.bf16.msra.mxu1 %v3581_v49 }
 0x511   :  { %2308 = vmatpush.bf16.msra.mxu1 %v3569_v36 }
 0x515   :  { %2309 = vmatpush.bf16.msra.mxu1 %v3557_v5  ;;  %v3714_v5 = vor.u32 %v3972_v4, %v3713_v3  ;;  %v3958_v3 = vld [vmem:[%s5876_s2 + $0x28] sm:$0xf0] }
 0x519   :  { %2310 = vmatpush.bf16.msra.mxu1 %v3545_v18 }
 0x579   :  { %v2037_v35 = vpop.f32.mrf.mxu1 }
 0x57a   :  { %v2067_v43 = vadd.f32 %v3434_v32, %v2037_v35  ;;  %v5678_v35 = vld [vmem:[%s5877_s3] ss:$0 sm:$0xff] }
 0x57c   :  { %v3533_v51 = vmul.f32 -1.442695, %v2067_v43 }
 0x57e   :  { %4059 = vpow2.f32 %v3533_v51 }
 0x57f   :  { %v2050_v60 = vpop.f32.mrf.mxu2 }
 0x580   :  { %v2087_v62 = vadd.f32 %v3435_v52, %v2050_v60  ;;  %v2063_v0 = vpop.f32.mrf.mxu3 }
 0x581   :  { %v2039_v42 = vpop.f32.mrf.mxu1  ;;  %v2107_v37 = vadd.f32 %v5678_v35, %v2063_v0 }
 0x582   :  { %v3534_v41 = vmul.f32 -1.442695, %v2087_v62  ;;  %v3975_v62 = vld [vmem:[%s5876_s2 + $0xb0] sm:$0xf0]  ;;  %v3727_v42 = vld [vmem:[%s5876_s2 + $0xb4] sm:$0xf0] }
 0x583   :  { %v3726_v0 = vor.u32 %v3975_v62, %v3725_v61 }
 0x584   :  { %v4060_v8 = vpop.eup %4059  ;;  %4061 = vpow2.f32 %v3534_v41  ;;  %v3734_v41 = vor.u32 %v3976_v2, %v3733_v1  ;;  %v3956_v1 = vld [vmem:[%s5876_s2 + $0x1c] sm:$0xf] }
 0x585   :  { %v2071_v12 = vadd.f32 1.0, %v4060_v8  ;;  %2552 = vmatpush.bf16.msra.mxu3 %v3726_v0  ;;  %v3721_v8 = vld [vmem:[%s5876_s2 + $0x98] sm:$0xf] }
 0x586   :  { %2578 = vmatpush.bf16.msrb.mxu1 %v3734_v41  ;;  %v3722_v44 = vor.u32 %v3973_v10, %v3721_v8  ;;  %v3653_v0 = vld [vmem:[%s5876_s2 + $0x18] sm:$0xf]  ;;  %v3661_v41 = vld [vmem:[%s5876_s2 + $0x20] sm:$0xf] }
 0x587   :  { %4063 = vrcp.f32 %v2071_v12  ;;  %v2052_v9 = vpop.f32.mrf.mxu2  ;;  %v2083_v25 = vand.u32 2147483648, %v2071_v12  ;;  %v2081_v27 = vand.u32 2147483647, %v2071_v12  ;;  %vm2077_vm11 = vweird.f32 %v2071_v12  ;;  %v3641_v10 = vld [vmem:[%s5876_s2] sm:$0xf] }
 0x588   :  { %v2065_v17 = vpop.f32.mrf.mxu3  ;;  %v3709_v9 = vld [vmem:[%s5876_s2 + $0x80] sm:$0xf] }
 0x589   :  { %v2084_v32 = vor.u32 1.1754944e-38, %v2083_v25  ;;  %vm2082_vm13 = vcmp.eq.f32.partialorder %v2081_v27, 8.507059e+37  ;;  %2553 = vmatpush.bf16.msra.mxu3 %v3714_v5  ;;  %v3706_v17 = vor.u32 %v3968_v7, %v3703_v15  ;;  %v3710_v18 = vor.u32 %v3970_v16, %v3709_v9  ;;  %v3535_v25 = vld [vmem:[%s5874_s0 + $0xc0] sm:$0xff]  ;;  %v3643_v7 = vld [vmem:[%s5876_s2 + $0xc] sm:$0xf0] }
 0x58a   :  { %v4062_v20 = vpop.eup %4061  ;;  %2579 = vmatpush.bf16.msrb.mxu1 %v3722_v44  ;;  %v3955_v9 = vld [vmem:[%s5876_s2 + $0x10] sm:$0xf0]  ;;  %v3646_v16 = vor.u32 %v3953_v11, %v3643_v7 }
 0x58b   :  { %v2091_v21 = vadd.f32 1.0, %v4062_v20  ;;  %v3966_v20 = vld [vmem:[%s5876_s2 + $0x68] sm:$0xf0] }
 0x58d   :  { %v4064_v22 = vpop.eup %4063  ;;  %4065 = vrcp.f32 %v2091_v21  ;;  %v2103_v45 = vand.u32 2147483648, %v2091_v21  ;;  %v2101_v48 = vand.u32 2147483647, %v2091_v21  ;;  %vm2097_vm15 = vweird.f32 %v2091_v21  ;;  %2554 = vmatpush.bf16.msra.mxu3 %v3702_v14  ;;  %v3649_v14 = vld [vmem:[%s5876_s2 + $0x8] sm:$0xf] }
 0x58e   :  { %v2073_v23 = vmul.f32 %v4064_v22, %v2071_v12  ;;  %vm2078_vm10 = vweird.f32 %v4064_v22  ;;  %v3718_v12 = vor.u32 %v3971_v6, %v3715_v39  ;;  %2580 = vmatpush.bf16.msrb.mxu1 %v3710_v18  ;;  %v3662_v6 = vor.u32 %v3958_v3, %v3661_v41 }
 0x58f   :  { %vm2079_vm12 = vmor %vm2077_vm11, %vm2078_vm10  ;;  %v2104_v51 = vor.u32 1.1754944e-38, %v2103_v45  ;;  %vm2102_vm1 = vcmp.eq.f32.partialorder %v2101_v48, 8.507059e+37  ;;  %v3679_v45 = vld [vmem:[%s5876_s2 + $0x54] sm:$0xf0]  ;;  %v3964_v48 = vld [vmem:[%s5876_s2 + $0x58] sm:$0xf0] }
 0x590   :  { %v2074_v24 = vsub.f32 1.0, %v2073_v23  ;;  %v3691_v23 = vld [vmem:[%s5876_s2 + $0x6c] sm:$0xf0] }
 0x592   :  { %v2075_v26 = vmul.f32 %v4064_v22, %v2074_v24  ;;  %v3697_v24 = vld [vmem:[%s5876_s2 + $0x68] sm:$0xf] }
 0x593   :  { %v4066_v28 = vpop.eup %4065 }
 0x594   :  { %v2093_v30 = vmul.f32 %v4066_v28, %v2091_v21  ;;  %v2076_v31 = vadd.f32 %v4064_v22, %v2075_v26  ;;  %vm2098_vm14 = vweird.f32 %v4066_v28  ;;  %v3690_v21 = vor.u32 %v3966_v20, %v3689_v19  ;;  %v3536_v26 = vld [vmem:[%s5874_s0 + $0xc8] sm:$0xff] }
 0x595   :  { %vm2099_vm0 = vmor %vm2097_vm15, %vm2098_vm14 }
 0x596   :  { %v2094_v33 = vsub.f32 1.0, %v2093_v30  ;;  %v2080_v34 = vsel %vm2079_vm12, %v4064_v22, %v2076_v31  ;;  %v3965_v22 = vld [vmem:[%s5876_s2 + $0x64] sm:$0xf]  ;;  %2555 = vmatpush.bf16.msra.mxu3 %v3690_v21 }
 0x597   :  { %v2085_v40 = vsel %vm2082_vm13, %v2084_v32, %v2080_v34  ;;  %v3694_v27 = vor.u32 %v3965_v22, %v3691_v23  ;;  %v3963_v34 = vld [vmem:[%s5876_s2 + $0x50] sm:$0xf0] }
 0x598   :  { %v2095_v43 = vmul.f32 %v4066_v28, %v2094_v33  ;;  %v2108_v47 = vmul.f32 %v2107_v37, %v2085_v40  ;;  %v3677_v33 = vld [vmem:[%s5876_s2 + $0x48] sm:$0xf]  ;;  %v3962_v37 = vld [vmem:[%s5876_s2 + $0x4c] sm:$0xf] }
 0x59a   :  { %v2096_v49 = vadd.f32 %v4066_v28, %v2095_v43  ;;  %v2109_v50 = vadd.f32 %v3436_v38, %v2108_v47  ;;  %v3678_v43 = vor.u32 %v3963_v34, %v3677_v33  ;;  %v3685_v47 = vld [vmem:[%s5876_s2 + $0x50] sm:$0xf] }
 0x59b   :  { %v3537_v34 = vld [vmem:[%s5874_s0 + $0xd0] sm:$0xff] }
 0x59c   :  { %v2100_v52 = vsel %vm2099_vm0, %v4066_v28, %v2096_v49  ;;  %4067 = vtanh.f32 %v2109_v50  ;;  %v3967_v28 = vld [vmem:[%s5876_s2 + $0x70] sm:$0xf0]  ;;  %v3682_v49 = vor.u32 %v3962_v37, %v3679_v45  ;;  %v3686_v50 = vor.u32 %v3964_v48, %v3685_v47  ;;  %2556 = vmatpush.bf16.msra.mxu3 %v3678_v43 }
 0x59d   :  { %v2105_v53 = vsel %vm2102_vm1, %v2104_v51, %v2100_v52  ;;  %v3698_v30 = vor.u32 %v3967_v28, %v3697_v24 }
 0x59e   :  { %v2111_v54 = vsub.f32 1.0, %v2105_v53  ;;  %v2113_v56 = vmul.f32 %v2105_v53, %v5521_v63  ;;  %v3665_v53 = vld [vmem:[%s5876_s2 + $0x30] sm:$0xf] }
 0x59f   :  { %2581 = vmatpush.bf16.msrb.mxu1 %v3698_v30 }
 0x5a2   :  { %v4068_v55 = vpop.eup %4067 }
 0x5a3   :  { %v2112_v58 = vmul.f32 %v4068_v55, %v2111_v54  ;;  %v3960_v54 = vld [vmem:[%s5876_s2 + $0x38] sm:$0xf0]  ;;  %v3959_v55 = vld [vmem:[%s5876_s2 + $0x34] sm:$0xf]  ;;  %2582 = vmatpush.bf16.msrb.mxu1 %v3686_v50 }
 0x5a4   :  { %v3666_v57 = vor.u32 %v3960_v54, %v3665_v53 }
 0x5a5   :  { %v2114_v29 = vadd.f32 %v2113_v56, %v2112_v58  ;;  %v3667_v58 = vld [vmem:[%s5876_s2 + $0x3c] sm:$0xf0]  ;;  %v3673_v56 = vld [vmem:[%s5876_s2 + $0x38] sm:$0xf] }
 0x5a6   :  { %2557 = vmatpush.bf16.msra.mxu3 %v3666_v57 }
 0x5a7   :  { %v2122_v59 = vsel %vm2120_vm2, %v2114_v29, 0.0  ;;  %v5686_v60 = vsel %vm2120_vm2, %v2114_v29, %v5521_v63  ;;  %v3974_v63 = vld [vmem:[%s5876_s2 + $0xac] sm:$0xf]  ;;  %v3961_v29 = vld [vmem:[%s5876_s2 + $0x40] sm:$0xf0] }
 0x5a8   :  { %2124 = vst [vmem:[#allocation2 + $0x38] sm:$0xff] %v2122_v59  ;;  %v2129_v36 = vpack.c.bf16 %v5686_v60, %v5686_v60  ;;  %v3730_v46 = vor.u32 %v3974_v63, %v3727_v42  ;;  %v3670_v59 = vor.u32 %v3959_v55, %v3667_v58  ;;  %v3957_v42 = vld [vmem:[%s5876_s2 + $0x20] sm:$0xf0] }
 0x5a9   :  { %v3654_v2 = vor.u32 %v3957_v42, %v3653_v0 }
 0x5aa   :  { %2298 = vmatmul.bf16.vlgmr.msra.gmra.mxu0 %v2129_v36  ;;  %2311 = vmatmul.bf16.vlgmr.msra.gmra.mxu1 %v2129_v36 }
 0x5ab   :  { %2324 = vmatmul.bf16.vlgmr.msra.gmra.mxu2 %v2129_v36  ;;  %2565 = vmatpush.bf16.msrb.mxu0 %v3730_v46  ;;  %v3674_v36 = vor.u32 %v3961_v29, %v3673_v56  ;;  %v3655_v46 = vld [vmem:[%s5876_s2 + $0x24] sm:$0xf0]  ;;  %v3637_v29 = vld [vmem:[%s5874_s0 + $0xe0] sm:$0xff] }
 0x5ac   :  { %v3658_v4 = vor.u32 %v3956_v1, %v3655_v46  ;;  %2558 = vmatpush.bf16.msra.mxu3 %v3654_v2 }
 0x5ad   :  { %2583 = vmatpush.bf16.msrb.mxu1 %v3674_v36 }
 0x5af   :  { %2566 = vmatpush.bf16.msrb.mxu0 %v3718_v12  ;;  %v3954_v12 = vld [vmem:[%s5876_s2 + $0x8] sm:$0xf0] }
 0x5b0   :  { %v3642_v13 = vor.u32 %v3954_v12, %v3641_v10 }
 0x5b1   :  { %2584 = vmatpush.bf16.msrb.mxu1 %v3662_v6 }
 0x5b2   :  { %2559 = vmatpush.bf16.msra.mxu3 %v3642_v13 }
 0x5b3   :  { %2567 = vmatpush.bf16.msrb.mxu0 %v3706_v17  ;;  %v3650_v17 = vor.u32 %v3955_v9, %v3649_v14 }
 0x5b5   :  { %2585 = vmatpush.bf16.msrb.mxu1 %v3650_v17 }
 0x5b7   :  { %2568 = vmatpush.bf16.msrb.mxu0 %v3694_v27 }
 0x5bb   :  { %2569 = vmatpush.bf16.msrb.mxu0 %v3682_v49 }
 0x5bf   :  { %2570 = vmatpush.bf16.msrb.mxu0 %v3670_v59 }
 0x5c3   :  { %2571 = vmatpush.bf16.msrb.mxu0 %v3658_v4 }
 0x5c7   :  { %2572 = vmatpush.bf16.msrb.mxu0 %v3646_v16 }
 0x627   :  { %v2299_v31 = vpop.f32.mrf.mxu0  ;;  %v2312_v32 = vpop.f32.mrf.mxu1 }
 0x628   :  { %v2329_v38 = vadd.f32 %v3535_v25, %v2299_v31  ;;  %v2349_v40 = vadd.f32 %v3536_v26, %v2312_v32 }
 0x62a   :  { %v3634_v51 = vmul.f32 -1.442695, %v2329_v38  ;;  %v3635_v52 = vmul.f32 -1.442695, %v2349_v40 }
 0x62c   :  { %4069 = vpow2.f32 %v3634_v51 }
 0x62d   :  { %4071 = vpow2.f32 %v3635_v52  ;;  %v2381_v52 = vpop.permute.xlu2 %2380 }
 0x62e   :  { %v2325_v61 = vpop.f32.mrf.mxu2  ;;  %vm2382_vm11 = vcmp.eq.s32.totalorder %v2381_v52, 1 }
 0x62f   :  { %v2301_v62 = vpop.f32.mrf.mxu0  ;;  %v2314_v63 = vpop.f32.mrf.mxu1  ;;  %v2369_v32 = vadd.f32 %v5678_v35, %v2325_v61 }
 0x632   :  { %v4070_v5 = vpop.eup %4069 }
 0x633   :  { %v4072_v39 = vpop.eup %4071  ;;  %v2333_v8 = vadd.f32 1.0, %v4070_v5 }
 0x634   :  { %v2353_v44 = vadd.f32 1.0, %v4072_v39 }
 0x635   :  { %4073 = vrcp.f32 %v2333_v8  ;;  %v2345_v24 = vand.u32 2147483648, %v2333_v8  ;;  %v2343_v26 = vand.u32 2147483647, %v2333_v8  ;;  %vm2339_vm4 = vweird.f32 %v2333_v8 }
 0x636   :  { %4075 = vrcp.f32 %v2353_v44  ;;  %v2327_v15 = vpop.f32.mrf.mxu2  ;;  %v2365_v38 = vand.u32 2147483648, %v2353_v44  ;;  %vm2359_vm8 = vweird.f32 %v2353_v44  ;;  %v2363_v43 = vand.u32 2147483647, %v2353_v44 }
 0x637   :  { %v2346_v30 = vor.u32 1.1754944e-38, %v2345_v24  ;;  %vm2344_vm6 = vcmp.eq.f32.partialorder %v2343_v26, 8.507059e+37 }
 0x638   :  { %v2366_v48 = vor.u32 1.1754944e-38, %v2365_v38  ;;  %vm2364_vm10 = vcmp.eq.f32.partialorder %v2363_v43, 8.507059e+37  ;;  %v4149_v38 = vmov 128.0  }
 0x63b   :  { %v4074_v18 = vpop.eup %4073 }
 0x63c   :  { %v4076_v19 = vpop.eup %4075  ;;  %v2335_v20 = vmul.f32 %v4074_v18, %v2333_v8  ;;  %vm2340_vm3 = vweird.f32 %v4074_v18 }
 0x63d   :  { %v2355_v21 = vmul.f32 %v4076_v19, %v2353_v44  ;;  %vm2341_vm5 = vmor %vm2339_vm4, %vm2340_vm3  ;;  %vm2360_vm7 = vweird.f32 %v4076_v19 }
 0x63e   :  { %v2336_v22 = vsub.f32 1.0, %v2335_v20  ;;  %vm2361_vm9 = vmor %vm2359_vm8, %vm2360_vm7 }
 0x63f   :  { %v2356_v23 = vsub.f32 1.0, %v2355_v21 }
 0x640   :  { %v2337_v25 = vmul.f32 %v4074_v18, %v2336_v22 }
 0x641   :  { %v2357_v27 = vmul.f32 %v4076_v19, %v2356_v23 }
 0x642   :  { %v2338_v28 = vadd.f32 %v4074_v18, %v2337_v25 }
 0x643   :  { %v2358_v33 = vadd.f32 %v4076_v19, %v2357_v27 }
 0x644   :  { %v2342_v31 = vsel %vm2341_vm5, %v4074_v18, %v2338_v28  ;;  %v3638_v18 = vld [vmem:[%s5874_s0 + $0xe8] sm:$0xff] }
 0x645   :  { %v2347_v37 = vsel %vm2344_vm6, %v2346_v30, %v2342_v31  ;;  %v2362_v47 = vsel %vm2361_vm9, %v4076_v19, %v2358_v33  ;;  %v2643_v30 = vpop.permute.xlu0 %2642 }
 0x646   :  { %v2370_v40 = vmul.f32 %v2369_v32, %v2347_v37  ;;  %v2367_v49 = vsel %vm2364_vm10, %v2366_v48, %v2362_v47  ;;  %vm2644_vm4 = vcmp.eq.s32.totalorder %v2643_v30, 1 }
 0x647   :  { %v2373_v50 = vsub.f32 1.0, %v2367_v49  ;;  %v2375_v54 = vmul.f32 %v2367_v49, %v5686_v60 }
 0x648   :  { %v2371_v45 = vadd.f32 %v3537_v34, %v2370_v40 }
 0x64a   :  { %4077 = vtanh.f32 %v2371_v45 }
 0x650   :  { %v4078_v51 = vpop.eup %4077 }
 0x651   :  { %v2374_v53 = vmul.f32 %v4078_v51, %v2373_v50 }
 0x653   :  { %v2376_v55 = vadd.f32 %v2375_v54, %v2374_v53 }
 0x655   :  { %v2384_v57 = vsel %vm2382_vm11, %v2376_v55, 0.0  ;;  %v5846_v58 = vsel %vm2382_vm11, %v2376_v55, %v5686_v60  ;;  %v3636_v60 = vld [vmem:[%s5874_s0 + $0xd8] sm:$0xff] }
 0x656   :  { %2386 = vst [vmem:[#allocation2 + $0x40] sm:$0xff] %v2384_v57  ;;  %v2391_v56 = vpack.c.bf16 %v5846_v58, %v5846_v58 }
 0x658   :  { %2560 = vmatmul.bf16.vlgmr.msra.gmra.mxu3 %v2391_v56  ;;  %2573 = vmatmul.bf16.vlgmr.msrb.gmra.mxu0 %v2391_v56 }
 0x659   :  { %2586 = vmatmul.bf16.vlgmr.msrb.gmra.mxu1 %v2391_v56 }
 0x6d5   :  { %v2574_v59 = vpop.f32.mrf.mxu0 }
 0x6d6   :  { %v2611_v36 = vadd.f32 %v3637_v29, %v2574_v59  ;;  %v2587_v61 = vpop.f32.mrf.mxu1 }
 0x6d7   :  { %v2631_v16 = vadd.f32 %v5678_v35, %v2587_v61 }
 0x6d8   :  { %v3736_v62 = vmul.f32 -1.442695, %v2611_v36 }
 0x6da   :  { %4079 = vpow2.f32 %v3736_v62  ;;  %v3987_v62 = vld [vmem:[%s5878_s4] ss:$0 sm:$0xff] }
 0x6db   :  { %v2561_v63 = vpop.f32.mrf.mxu3 }
 0x6dc   :  { %v2591_v0 = vadd.f32 %v3636_v60, %v2561_v63 }
 0x6dd   :  { %v2576_v42 = vpop.f32.mrf.mxu0 }
 0x6de   :  { %v3735_v1 = vmul.f32 -1.442695, %v2591_v0  ;;  %v2589_v2 = vpop.f32.mrf.mxu1  ;;  %v3988_v0 = vld [vmem:[%s5879_s5] ss:$0 sm:$0xff] }
 0x6e0   :  { %v4080_v46 = vpop.eup %4079  ;;  %4081 = vpow2.f32 %v3735_v1 }
 0x6e1   :  { %v2615_v41 = vadd.f32 1.0, %v4080_v46 }
 0x6e3   :  { %v2563_v3 = vpop.f32.mrf.mxu3  ;;  %4083 = vrcp.f32 %v2615_v41  ;;  %v2627_v21 = vand.u32 2147483648, %v2615_v41  ;;  %vm2621_vm1 = vweird.f32 %v2615_v41  ;;  %v2625_v23 = vand.u32 2147483647, %v2615_v41 }
 0x6e5   :  { %v2628_v26 = vor.u32 1.1754944e-38, %v2627_v21  ;;  %vm2626_vm3 = vcmp.eq.f32.partialorder %v2625_v23, 8.507059e+37 }
 0x6e6   :  { %v4082_v4 = vpop.eup %4081 }
 0x6e7   :  { %v2595_v6 = vadd.f32 1.0, %v4082_v4 }
 0x6e9   :  { %4085 = vrcp.f32 %v2595_v6  ;;  %v4084_v5 = vpop.eup %4083  ;;  %v2607_v13 = vand.u32 2147483648, %v2595_v6  ;;  %v2605_v7 = vand.u32 2147483647, %v2595_v6  ;;  %vm2601_vm13 = vweird.f32 %v2595_v6 }
 0x6ea   :  { %v2617_v39 = vmul.f32 %v4084_v5, %v2615_v41  ;;  %vm2622_vm0 = vweird.f32 %v4084_v5 }
 0x6eb   :  { %v2608_v9 = vor.u32 1.1754944e-38, %v2607_v13  ;;  %vm2606_vm15 = vcmp.eq.f32.partialorder %v2605_v7, 8.507059e+37  ;;  %vm2623_vm2 = vmor %vm2621_vm1, %vm2622_vm0 }
 0x6ec   :  { %v2618_v12 = vsub.f32 1.0, %v2617_v39 }
 0x6ee   :  { %v2619_v14 = vmul.f32 %v4084_v5, %v2618_v12 }
 0x6ef   :  { %v4086_v8 = vpop.eup %4085 }
 0x6f0   :  { %v2597_v10 = vmul.f32 %v4086_v8, %v2595_v6  ;;  %vm2602_vm12 = vweird.f32 %v4086_v8  ;;  %v2620_v20 = vadd.f32 %v4084_v5, %v2619_v14 }
 0x6f1   :  { %vm2603_vm14 = vmor %vm2601_vm13, %vm2602_vm12 }
 0x6f2   :  { %v2598_v44 = vsub.f32 1.0, %v2597_v10  ;;  %v2624_v25 = vsel %vm2623_vm2, %v4084_v5, %v2620_v20 }
 0x6f3   :  { %v2629_v35 = vsel %vm2626_vm3, %v2628_v26, %v2624_v25 }
 0x6f4   :  { %v2599_v11 = vmul.f32 %v4086_v8, %v2598_v44  ;;  %v2635_v27 = vsub.f32 1.0, %v2629_v35  ;;  %v2637_v32 = vmul.f32 %v2629_v35, %v5846_v58 }
 0x6f6   :  { %v2600_v15 = vadd.f32 %v4086_v8, %v2599_v11 }
 0x6f8   :  { %v2604_v17 = vsel %vm2603_vm14, %v4086_v8, %v2600_v15 }
 0x6f9   :  { %v2609_v19 = vsel %vm2606_vm15, %v2608_v9, %v2604_v17 }
 0x6fa   :  { %v2632_v22 = vmul.f32 %v2631_v16, %v2609_v19 }
 0x6fc   :  { %v2633_v24 = vadd.f32 %v3638_v18, %v2632_v22 }
 0x6fe   :  { %4087 = vtanh.f32 %v2633_v24 }
 0x6ff   :  { %4089 = vrcp.f32 %v4149_v38 }
 0x704   :  { %v4088_v28 = vpop.eup %4087 }
 0x705   :  { %v2636_v31 = vmul.f32 %v4088_v28, %v2635_v27  ;;  %v4090_v40 = vpop.eup %4089 }
 0x706   :  { %v2652_v43 = vmul.f32 128.0, %v4090_v40  ;;  %vm2656_vm5 = vweird.f32 %v4090_v40 }
 0x707   :  { %v2638_v33 = vadd.f32 %v2637_v32, %v2636_v31 }
 0x708   :  { %v2653_v45 = vsub.f32 1.0, %v2652_v43 }
 0x709   :  { %v2645_v34 = vsel %vm2644_vm4, %v2638_v33, %v5846_v58  ;;  %v2646_v37 = vsel %vm2644_vm4, %v2638_v33, 0.0 }
 0x70a   :  { %2648 = vst [vmem:[#allocation2 + $0x48] sm:$0xff] %v2646_v37  ;;  %2649 = vadd.xlane.f32.xlu1 %v2645_v34  ;;  %v2654_v47 = vmul.f32 %v4090_v40, %v2653_v45 }
 0x70b   :  { %2699 = dma.vmem_to_hbm [thread:$0]  %s2692_s17, 1280, %s2694_s15, [#allocation3], %s4151_s18, %s4151_s18, %s4152_s19  }
 0x70c   :  { %v2655_v48 = vadd.f32 %v4090_v40, %v2654_v47 }
 0x70e   :  { %v2657_v49 = vsel %vm2656_vm5, %v4090_v40, %v2655_v48 }
 0x77d   :  { %v2650_v50 = vpop.xlane.xlu1 %2649 }
 0x77e   :  { %v2658_v51 = vmul.f32 %v2657_v49, %v2650_v50 }
 0x780   :  { %v2659_v52 = vsub.f32 %v2645_v34, %v2658_v51 }
 0x782   :  { %v2660_v53 = vmul.f32 %v2659_v52, %v2659_v52 }
 0x784   :  { %2661 = vadd.xlane.f32.xlu2 %v2660_v53 }
 0x7f7   :  { %v2662_v54 = vpop.xlane.xlu2 %2661 }
 0x7f8   :  { %v2663_v55 = vmul.f32 %v2662_v54, %v2657_v49 }
 0x7fa   :  { %v2664_v57 = vadd.f32 1e-05, %v2663_v55 }
 0x7fc   :  { %4091 = vrsqrt.f32 %v2664_v57  ;;  %vm2671_vm7 = vweird.f32 %v2664_v57 }
 0x802   :  { %v4092_v58 = vpop.eup %4091 }
 0x803   :  { %v2666_v56 = vmul.f32 %v4092_v58, %v2664_v57  ;;  %vm2672_vm6 = vweird.f32 %v4092_v58 }
 0x804   :  { %vm2673_vm8 = vmor %vm2671_vm7, %vm2672_vm6 }
 0x805   :  { %v2667_v29 = vmul.f32 %v4092_v58, %v2666_v56 }
 0x807   :  { %v2668_v59 = vmul.f32 0.5, %v2667_v29 }
 0x809   :  { %v2669_v36 = vsub.f32 1.5, %v2668_v59 }
 0x80b   :  { %v2670_v61 = vmul.f32 %v4092_v58, %v2669_v36 }
 0x80d   :  { %v2674_v60 = vsel %vm2673_vm8, %v4092_v58, %v2670_v61 }
 0x80e   :  { %v2675_v63 = vmul.f32 %v2674_v60, %v2659_v52 }
 0x810   :  { %v2680_v42 = vmul.f32 %v3987_v62, %v2675_v63 }
 0x812   :  { %v2685_v1 = vadd.f32 %v3988_v0, %v2680_v42 }
 0x814   :  { %2686 = vst [vmem:[#allocation4] sm:$0xff] %v2685_v1 }
 0x815   :  { %2710 = dma.vmem_to_hbm [thread:$0]  %s2706_s24, 128, %s2708_s26, [#allocation5]  }
 0x816   :  { %4144 = dma.done.wait [#allocation3], 1280  }
 0x817   :  { %4145 = vsyncadd [#allocation3], 4294966016 }
 0x818   :  { %4146 = dma.done.wait [#allocation5], 128  }
 0x819   :  { %4147 = vsyncadd [#allocation5], 4294967168 }
 0x81a   :  { %2719 = vsyncpa [#allocation3], 1 }
 0x81b   :  { %2720 = vsyncpa [#allocation5], 1 }

</bundles_post_ra>
